<compile_context>
chip_gen: v5e
topology: v5e:2x2
jax: 0.10.0
libtpu: 0.0.40
codegen_flags: <defaults>
</compile_context>

<pallas_src>
import math

import jax
import jax.numpy as jnp
import numpy as np
from jax.experimental import pallas as pl
from jax.experimental.pallas import tpu as pltpu

# ---------------- model dims (small, consistent with the module) -----------
B = 8
C, H, W = 1, 16, 16
NX = C * H * W        # 256   (torch default 28**2)
NH = 256              # torch default 1024
NZ = 32               # torch default 200
NW = 16               # torch default 150
NCLASSES = 8          # torch default 10
LEAKY_SLOPE = 0.01    # nn.LeakyReLU default
TEMP = 0.1            # RelaxedOneHotCategorical temperature
LOG2PI = float(np.log(2.0 * np.pi))
LOG_PRIOR = float(np.log(1.0 / NCLASSES))   # y_prior logits (uniform)
EPS = 1e-12


# ---------------- in-kernel helpers -----------------------------------------
def _softplus(v):
    # numerically stable softplus built from exp/log/abs/max (all VPU/EUP ops)
    return jnp.maximum(v, 0.0) + jnp.log(1.0 + jnp.exp(-jnp.abs(v)))


def _softclip(v, lo, hi):
    # ut.softclip(tensor, min, max): two-sided soft clamp via softplus
    v = lo + _softplus(v - lo)
    v = hi - _softplus(hi - v)
    return v


def _mlp3(h, w1, b1, w2, b2, w3, b3):
    """Linear -> [folded BN] -> LeakyReLU -> Linear -> [folded BN] -> LeakyReLU
    -> Linear.  Weights are bf16, accumulation in f32 (MXU native path)."""
    h = jnp.dot(h.astype(jnp.bfloat16), w1[...],
                preferred_element_type=jnp.float32) + b1[...]
    h = jnp.where(h > 0, h, LEAKY_SLOPE * h)
    h = jnp.dot(h.astype(jnp.bfloat16), w2[...],
                preferred_element_type=jnp.float32) + b2[...]
    h = jnp.where(h > 0, h, LEAKY_SLOPE * h)
    return jnp.dot(h.astype(jnp.bfloat16), w3[...],
                   preferred_element_type=jnp.float32) + b3[...]


# ---------------- the single fused forward kernel ---------------------------
def fused_vae_kernel(
        # data + noise
        x_ref, ls_ref, noise_w_ref, noise_z_ref, gumbel_ref,
        # Qwz weights
        qwz_w1, qwz_b1, qwz_w2, qwz_b2, qwz_w3, qwz_b3,
        # Qy weights
        qy_w1, qy_b1, qy_w2, qy_b2, qy_w3, qy_b3,
        # Px weights
        px_w1, px_b1, px_w2, px_b2, px_w3, px_b3,
        # Pz weights
        pz_w1, pz_b1, pz_w2, pz_b2, pz_w3, pz_b3,
        # outputs
        wz_out, mu_w_out, lv_w_out, mu_z_out, lv_z_out,
        w_out, z_out, qy_out, y_out, rec_out, loss_out):
    x = x_ref[...]                                   # (B, NX) f32

    # ---- Qwz encoder: x -> wz = [mu_w | mu_z | logvar_w_raw | logvar_z_raw]
    wz = _mlp3(x, qwz_w1, qwz_b1, qwz_w2, qwz_b2, qwz_w3, qwz_b3)  # (B, 2*(NW+NZ))
    wz_out[...] = wz
    mu_w = wz[:, :NW]
    mu_z = wz[:, NW:NW + NZ]
    logvar_w = jnp.tanh(wz[:, NW + NZ:2 * NW + NZ])
    logvar_z = jnp.tanh(wz[:, 2 * NW + NZ:])
    mu_w_out[...] = mu_w
    lv_w_out[...] = logvar_w
    mu_z_out[...] = mu_z
    lv_z_out[...] = logvar_z

    # ---- reparameterization (noise supplied as inputs)
    w = mu_w + noise_w_ref[...] * jnp.exp(0.5 * logvar_w)
    z = mu_z + noise_z_ref[...] * jnp.exp(0.5 * logvar_z)
    w_out[...] = w
    z_out[...] = z

    # ---- Qy([w, z]) -> q_y (softmax) ---------------------------------------
    wz_cat = jnp.concatenate([w, z], axis=1)                       # (B, NW+NZ)
    logits_y = _mlp3(wz_cat, qy_w1, qy_b1, qy_w2, qy_b2, qy_w3, qy_b3)
    m = jnp.max(logits_y, axis=-1, keepdims=True)
    e = jnp.exp(logits_y - m)
    q_y = e * pl.reciprocal(jnp.sum(e, axis=-1, keepdims=True), approx=True)
    qy_out[...] = q_y

    # ---- RelaxedOneHotCategorical(T=0.1, probs=q_y).rsample()
    # softmax((log q_y + g)/T) == softmax((logits_y + g)/T)  (shift invariant),
    # which avoids log(0) on underflowed softmax entries.
    sg = (logits_y + gumbel_ref[...]) * (1.0 / TEMP)
    sg = sg - jnp.max(sg, axis=-1, keepdims=True)
    eg = jnp.exp(sg)
    y_out[...] = eg * pl.reciprocal(jnp.sum(eg, axis=-1, keepdims=True),
                                    approx=True)

    # ---- Px(z) -> rec; Gaussian NLL with learned sigma_x --------------------
    rec = _mlp3(z, px_w1, px_b1, px_w2, px_b2, px_w3, px_b3)       # (B, NX)
    rec_out[...] = rec
    ls = _softclip(ls_ref[...], -2.0, 2.0)                         # (1, NX)
    inv_var = jnp.exp(-2.0 * ls)
    nll = 0.5 * (rec - x) ** 2 * inv_var + ls + 0.5 * LOG2PI
    loss_rec = jnp.mean(jnp.sum(nll, axis=-1, keepdims=True))

    # ---- Pz(w) -> class-conditional priors; loss_z --------------------------
    zw = _mlp3(w, pz_w1, pz_b1, pz_w2, pz_b2, pz_w3, pz_b3)        # (B, 2*NC*NZ)
    exp_lv_z = jnp.exp(logvar_z)
    loss_z_acc = jnp.zeros((x.shape[0], 1), jnp.float32)
    for c in range(NCLASSES):                    # static unroll, tiny lane slices
        base = c * 2 * NZ
        mu_c = zw[:, base:base + NZ]
        lv_c = jnp.tanh(zw[:, base + NZ:base + 2 * NZ])
        kld_c = 0.5 * (-1.0 + (exp_lv_z + (mu_z - mu_c) ** 2) * jnp.exp(-lv_c)
                       + lv_c - logvar_z)
        loss_z_acc = loss_z_acc + q_y[:, c:c + 1] * jnp.sum(
            kld_c, axis=-1, keepdims=True)
    loss_z = jnp.mean(loss_z_acc)

    # ---- remaining KL / categorical losses ----------------------------------
    loss_w = jnp.mean(jnp.sum(
        -0.5 * (1.0 + logvar_w - mu_w ** 2 - jnp.exp(logvar_w)),
        axis=-1, keepdims=True))
    qm = jnp.mean(q_y, axis=0, keepdims=True)                      # (1, NC)
    loss_l = jnp.sum(qm * (jnp.log(qm + EPS) - LOG_PRIOR))
    loss_y = -1.0 * jnp.mean(jnp.max(q_y, axis=-1, keepdims=True))
    total = loss_rec + loss_z + loss_w + 10.0 * loss_l

    loss_out[0] = loss_rec
    loss_out[1] = loss_z
    loss_out[2] = loss_w
    loss_out[3] = loss_l
    loss_out[4] = loss_y
    loss_out[5] = total


# ---------------- deterministic parameter init -------------------------------
def init_linear(key, din, dout, post_scale=1.0):
    kw, kb = jax.random.split(key)
    bound = 1.0 / math.sqrt(din)
    Wm = jax.random.uniform(kw, (din, dout), jnp.float32, -bound, bound)
    b = jax.random.uniform(kb, (1, dout), jnp.float32, -bound, bound)
    return Wm * post_scale, b * post_scale


def init_mlp3(key, din, dh, dout):
    """3-layer MLP; eval-mode BatchNorm1d (mean=0, var=1, gamma=1, beta=0)
    folded directly into the first two Linear layers."""
    k1, k2, k3 = jax.random.split(key, 3)
    bn_scale = 1.0 / math.sqrt(1.0 + 1e-5)
    W1, b1 = init_linear(k1, din, dh, bn_scale)
    W2, b2 = init_linear(k2, dh, dh, bn_scale)
    W3, b3 = init_linear(k3, dh, dout)
    return (W1.astype(jnp.bfloat16), b1,
            W2.astype(jnp.bfloat16), b2,
            W3.astype(jnp.bfloat16), b3)


def init_params(key):
    ks = jax.random.split(key, 4)
    return {
        "logsigma_x": jnp.zeros((1, NX), jnp.float32),
        "Qwz": init_mlp3(ks[0], NX, NH, 2 * NW + 2 * NZ),
        "Qy":  init_mlp3(ks[1], NW + NZ, NH, NCLASSES),
        "Px":  init_mlp3(ks[2], NZ, NH, NX),
        "Pz":  init_mlp3(ks[3], NW, NH, 2 * NCLASSES * NZ),
    }


# ---------------- forward pass ------------------------------------------------
def vae_forward(x_img, params, key):
    x = x_img.reshape(x_img.shape[0], -1).astype(jnp.float32)   # nn.Flatten()
    nbatch = x.shape[0]
    k_w, k_z, k_g = jax.random.split(key, 3)
    noise_w = jax.random.normal(k_w, (nbatch, NW), jnp.float32)
    noise_z = jax.random.normal(k_z, (nbatch, NZ), jnp.float32)
    gumbel = jax.random.gumbel(k_g, (nbatch, NCLASSES), jnp.float32)

    flat_w = []
    for name in ("Qwz", "Qy", "Px", "Pz"):
        flat_w.extend(params[name])

    vmem = pl.BlockSpec(memory_space=pltpu.MemorySpace.VMEM)
    smem = pl.BlockSpec(memory_space=pltpu.MemorySpace.SMEM)
    out_shapes = (
        jax.ShapeDtypeStruct((nbatch, 2 * (NW + NZ)), jnp.float32),  # wz_flat
        jax.ShapeDtypeStruct((nbatch, NW), jnp.float32),             # mu_w
        jax.ShapeDtypeStruct((nbatch, NW), jnp.float32),             # logvar_w
        jax.ShapeDtypeStruct((nbatch, NZ), jnp.float32),             # mu_z
        jax.ShapeDtypeStruct((nbatch, NZ), jnp.float32),             # logvar_z
        jax.ShapeDtypeStruct((nbatch, NW), jnp.float32),             # w
        jax.ShapeDtypeStruct((nbatch, NZ), jnp.float32),             # z
        jax.ShapeDtypeStruct((nbatch, NCLASSES), jnp.float32),       # q_y
        jax.ShapeDtypeStruct((nbatch, NCLASSES), jnp.float32),       # y
        jax.ShapeDtypeStruct((nbatch, NX), jnp.float32),             # rec
        jax.ShapeDtypeStruct((6,), jnp.float32),                     # losses
    )
    outs = pl.pallas_call(
        fused_vae_kernel,
        out_shape=out_shapes,
        in_specs=[vmem] * (5 + len(flat_w)),
        out_specs=tuple([vmem] * 10 + [smem]),
    )(x, params["logsigma_x"], noise_w, noise_z, gumbel, *flat_w)

    (wz_flat, mu_w, logvar_w, mu_z, logvar_z,
     w, z, q_y, y, rec, lv) = outs

    losses = dict(rec=lv[0], loss_z=lv[1], loss_w=lv[2], loss_l=lv[3],
                  loss_y=lv[4], total_loss=lv[5])
    # TODO(synk): torch returns distribution objects (Qw/Qz/Pz/Qx/Qy); only the
    # underlying parameter tensors are produced here.
    output = dict(wz=wz_flat.reshape(nbatch, 2, NW + NZ),
                  mu_z=mu_z, mu_w=mu_w, logvar_z=logvar_z, logvar_w=logvar_w,
                  q_y=q_y, w=w, z=z, y=y, rec=rec, losses=losses)
    return output


# ---------------- main --------------------------------------------------------
if __name__ == "__main__":
    root = jax.random.PRNGKey(0)
    k_param, k_x, k_fwd = jax.random.split(root, 3)
    params = init_params(k_param)
    x_img = jax.random.uniform(k_x, (B, C, H, W), jnp.float32)  # NCHW in [0,1)

    fwd = jax.jit(vae_forward)
    out = fwd(x_img, params, k_fwd)
    jax.block_until_ready(out)

    tl = float(out["losses"]["total_loss"])
    assert np.isfinite(tl), "total_loss is not finite"
    assert out["rec"].shape == (B, NX)
    assert out["q_y"].shape == (B, NCLASSES)
    assert out["wz"].shape == (B, 2, NW + NZ)
    assert np.isfinite(float(out["losses"]["rec"]))
    assert np.isfinite(float(out["losses"]["loss_z"]))
    print("KERNEL_OK")
</pallas_src>

<mosaic_0001>
module attributes {stable_mosaic.version = 11 : i64} {
  func.func @fused_vae_kernel(%arg0: memref<8x256xf32, #tpu.memory_space<vmem>>, %arg1: memref<1x256xf32, #tpu.memory_space<vmem>>, %arg2: memref<8x16xf32, #tpu.memory_space<vmem>>, %arg3: memref<8x32xf32, #tpu.memory_space<vmem>>, %arg4: memref<8x8xf32, #tpu.memory_space<vmem>>, %arg5: memref<256x256xbf16, #tpu.memory_space<vmem>>, %arg6: memref<1x256xf32, #tpu.memory_space<vmem>>, %arg7: memref<256x256xbf16, #tpu.memory_space<vmem>>, %arg8: memref<1x256xf32, #tpu.memory_space<vmem>>, %arg9: memref<256x96xbf16, #tpu.memory_space<vmem>>, %arg10: memref<1x96xf32, #tpu.memory_space<vmem>>, %arg11: memref<48x256xbf16, #tpu.memory_space<vmem>>, %arg12: memref<1x256xf32, #tpu.memory_space<vmem>>, %arg13: memref<256x256xbf16, #tpu.memory_space<vmem>>, %arg14: memref<1x256xf32, #tpu.memory_space<vmem>>, %arg15: memref<256x8xbf16, #tpu.memory_space<vmem>>, %arg16: memref<1x8xf32, #tpu.memory_space<vmem>>, %arg17: memref<32x256xbf16, #tpu.memory_space<vmem>>, %arg18: memref<1x256xf32, #tpu.memory_space<vmem>>, %arg19: memref<256x256xbf16, #tpu.memory_space<vmem>>, %arg20: memref<1x256xf32, #tpu.memory_space<vmem>>, %arg21: memref<256x256xbf16, #tpu.memory_space<vmem>>, %arg22: memref<1x256xf32, #tpu.memory_space<vmem>>, %arg23: memref<16x256xbf16, #tpu.memory_space<vmem>>, %arg24: memref<1x256xf32, #tpu.memory_space<vmem>>, %arg25: memref<256x256xbf16, #tpu.memory_space<vmem>>, %arg26: memref<1x256xf32, #tpu.memory_space<vmem>>, %arg27: memref<256x512xbf16, #tpu.memory_space<vmem>>, %arg28: memref<1x512xf32, #tpu.memory_space<vmem>>, %arg29: memref<8x96xf32, #tpu.memory_space<vmem>>, %arg30: memref<8x16xf32, #tpu.memory_space<vmem>>, %arg31: memref<8x16xf32, #tpu.memory_space<vmem>>, %arg32: memref<8x32xf32, #tpu.memory_space<vmem>>, %arg33: memref<8x32xf32, #tpu.memory_space<vmem>>, %arg34: memref<8x16xf32, #tpu.memory_space<vmem>>, %arg35: memref<8x32xf32, #tpu.memory_space<vmem>>, %arg36: memref<8x8xf32, #tpu.memory_space<vmem>>, %arg37: memref<8x8xf32, #tpu.memory_space<vmem>>, %arg38: memref<8x256xf32, #tpu.memory_space<vmem>>, %arg39: memref<6xf32, #tpu.memory_space<smem>>) attributes {dimension_semantics = [], scalar_prefetch = 0 : i64, scratch_operands = 0 : i64, tpu.core_type = #tpu.core_type<tc>} {
    %c0 = arith.constant 0 : index
    %c0_0 = arith.constant 0 : index
    %0 = vector.load %arg0[%c0, %c0_0] : memref<8x256xf32, #tpu.memory_space<vmem>>, vector<8x256xf32>
    %1 = arith.truncf %0 : vector<8x256xf32> to vector<8x256xbf16>
    %c0_1 = arith.constant 0 : index
    %c0_2 = arith.constant 0 : index
    %2 = vector.load %arg5[%c0_1, %c0_2] : memref<256x256xbf16, #tpu.memory_space<vmem>>, vector<256x256xbf16>
    %cst = arith.constant dense<0.000000e+00> : vector<8x256xf32>
    %3 = tpu.matmul %1, %2, %cst {dimension_numbers = #tpu.dot_dimension_numbers<[1], [0], [0], [1], [0, 0, 1, 1], [], []>} : vector<8x256xbf16>, vector<256x256xbf16>, vector<8x256xf32> -> vector<8x256xf32>
    %c0_3 = arith.constant 0 : index
    %c0_4 = arith.constant 0 : index
    %4 = vector.load %arg6[%c0_3, %c0_4] : memref<1x256xf32, #tpu.memory_space<vmem>>, vector<1x256xf32>
    %5 = vector.broadcast %4 : vector<1x256xf32> to vector<8x256xf32>
    %6 = arith.addf %3, %5 : vector<8x256xf32>
    %cst_5 = arith.constant 0.000000e+00 : f32
    %7 = vector.broadcast %cst_5 : f32 to vector<8x256xf32>
    %8 = arith.cmpf ogt, %6, %7 : vector<8x256xf32>
    %cst_6 = arith.constant 0.00999999977 : f32
    %9 = vector.broadcast %cst_6 : f32 to vector<8x256xf32>
    %10 = arith.mulf %9, %6 : vector<8x256xf32>
    %11 = arith.select %8, %6, %10 : vector<8x256xi1>, vector<8x256xf32>
    %12 = arith.truncf %11 : vector<8x256xf32> to vector<8x256xbf16>
    %c0_7 = arith.constant 0 : index
    %c0_8 = arith.constant 0 : index
    %13 = vector.load %arg7[%c0_7, %c0_8] : memref<256x256xbf16, #tpu.memory_space<vmem>>, vector<256x256xbf16>
    %cst_9 = arith.constant dense<0.000000e+00> : vector<8x256xf32>
    %14 = tpu.matmul %12, %13, %cst_9 {dimension_numbers = #tpu.dot_dimension_numbers<[1], [0], [0], [1], [0, 0, 1, 1], [], []>} : vector<8x256xbf16>, vector<256x256xbf16>, vector<8x256xf32> -> vector<8x256xf32>
    %c0_10 = arith.constant 0 : index
    %c0_11 = arith.constant 0 : index
    %15 = vector.load %arg8[%c0_10, %c0_11] : memref<1x256xf32, #tpu.memory_space<vmem>>, vector<1x256xf32>
    %16 = vector.broadcast %15 : vector<1x256xf32> to vector<8x256xf32>
    %17 = arith.addf %14, %16 : vector<8x256xf32>
    %cst_12 = arith.constant 0.000000e+00 : f32
    %18 = vector.broadcast %cst_12 : f32 to vector<8x256xf32>
    %19 = arith.cmpf ogt, %17, %18 : vector<8x256xf32>
    %cst_13 = arith.constant 0.00999999977 : f32
    %20 = vector.broadcast %cst_13 : f32 to vector<8x256xf32>
    %21 = arith.mulf %20, %17 : vector<8x256xf32>
    %22 = arith.select %19, %17, %21 : vector<8x256xi1>, vector<8x256xf32>
    %23 = arith.truncf %22 : vector<8x256xf32> to vector<8x256xbf16>
    %c0_14 = arith.constant 0 : index
    %c0_15 = arith.constant 0 : index
    %24 = vector.load %arg9[%c0_14, %c0_15] : memref<256x96xbf16, #tpu.memory_space<vmem>>, vector<256x96xbf16>
    %cst_16 = arith.constant dense<0.000000e+00> : vector<8x96xf32>
    %25 = tpu.matmul %23, %24, %cst_16 {dimension_numbers = #tpu.dot_dimension_numbers<[1], [0], [0], [1], [0, 0, 1, 1], [], []>} : vector<8x256xbf16>, vector<256x96xbf16>, vector<8x96xf32> -> vector<8x96xf32>
    %c0_17 = arith.constant 0 : index
    %c0_18 = arith.constant 0 : index
    %26 = vector.load %arg10[%c0_17, %c0_18] : memref<1x96xf32, #tpu.memory_space<vmem>>, vector<1x96xf32>
    %27 = vector.broadcast %26 : vector<1x96xf32> to vector<8x96xf32>
    %28 = arith.addf %25, %27 : vector<8x96xf32>
    %c0_19 = arith.constant 0 : index
    %c0_20 = arith.constant 0 : index
    %29 = vector.load %arg29[%c0_19, %c0_20] : memref<8x96xf32, #tpu.memory_space<vmem>>, vector<8x96xf32>
    tpu.vector_store %arg29[%c0_19, %c0_20], %28 {strides = array<i32>} : memref<8x96xf32, #tpu.memory_space<vmem>>, vector<8x96xf32>,
    %30 = vector.extract_strided_slice %28 {offsets = [0, 0], sizes = [8, 16], strides = [1, 1]} : vector<8x96xf32> to vector<8x16xf32>
    %31 = vector.extract_strided_slice %28 {offsets = [0, 16], sizes = [8, 32], strides = [1, 1]} : vector<8x96xf32> to vector<8x32xf32>
    %32 = vector.extract_strided_slice %28 {offsets = [0, 48], sizes = [8, 16], strides = [1, 1]} : vector<8x96xf32> to vector<8x16xf32>
    %33 = math.tanh %32 : vector<8x16xf32>
    %34 = vector.extract_strided_slice %28 {offsets = [0, 64], sizes = [8, 32], strides = [1, 1]} : vector<8x96xf32> to vector<8x32xf32>
    %35 = math.tanh %34 : vector<8x32xf32>
    %c0_21 = arith.constant 0 : index
    %c0_22 = arith.constant 0 : index
    %36 = vector.load %arg30[%c0_21, %c0_22] : memref<8x16xf32, #tpu.memory_space<vmem>>, vector<8x16xf32>
    tpu.vector_store %arg30[%c0_21, %c0_22], %30 {strides = array<i32>} : memref<8x16xf32, #tpu.memory_space<vmem>>, vector<8x16xf32>,
    %c0_23 = arith.constant 0 : index
    %c0_24 = arith.constant 0 : index
    %37 = vector.load %arg31[%c0_23, %c0_24] : memref<8x16xf32, #tpu.memory_space<vmem>>, vector<8x16xf32>
    tpu.vector_store %arg31[%c0_23, %c0_24], %33 {strides = array<i32>} : memref<8x16xf32, #tpu.memory_space<vmem>>, vector<8x16xf32>,
    %c0_25 = arith.constant 0 : index
    %c0_26 = arith.constant 0 : index
    %38 = vector.load %arg32[%c0_25, %c0_26] : memref<8x32xf32, #tpu.memory_space<vmem>>, vector<8x32xf32>
    tpu.vector_store %arg32[%c0_25, %c0_26], %31 {strides = array<i32>} : memref<8x32xf32, #tpu.memory_space<vmem>>, vector<8x32xf32>,
    %c0_27 = arith.constant 0 : index
    %c0_28 = arith.constant 0 : index
    %39 = vector.load %arg33[%c0_27, %c0_28] : memref<8x32xf32, #tpu.memory_space<vmem>>, vector<8x32xf32>
    tpu.vector_store %arg33[%c0_27, %c0_28], %35 {strides = array<i32>} : memref<8x32xf32, #tpu.memory_space<vmem>>, vector<8x32xf32>,
    %c0_29 = arith.constant 0 : index
    %c0_30 = arith.constant 0 : index
    %40 = vector.load %arg2[%c0_29, %c0_30] : memref<8x16xf32, #tpu.memory_space<vmem>>, vector<8x16xf32>
    %cst_31 = arith.constant 5.000000e-01 : f32
    %41 = vector.broadcast %cst_31 : f32 to vector<8x16xf32>
    %42 = arith.mulf %41, %33 : vector<8x16xf32>
    %43 = math.exp %42 : vector<8x16xf32>
    %44 = arith.mulf %40, %43 : vector<8x16xf32>
    %45 = arith.addf %30, %44 : vector<8x16xf32>
    %c0_32 = arith.constant 0 : index
    %c0_33 = arith.constant 0 : index
    %46 = vector.load %arg3[%c0_32, %c0_33] : memref<8x32xf32, #tpu.memory_space<vmem>>, vector<8x32xf32>
    %cst_34 = arith.constant 5.000000e-01 : f32
    %47 = vector.broadcast %cst_34 : f32 to vector<8x32xf32>
    %48 = arith.mulf %47, %35 : vector<8x32xf32>
    %49 = math.exp %48 : vector<8x32xf32>
    %50 = arith.mulf %46, %49 : vector<8x32xf32>
    %51 = arith.addf %31, %50 : vector<8x32xf32>
    %c0_35 = arith.constant 0 : index
    %c0_36 = arith.constant 0 : index
    %52 = vector.load %arg34[%c0_35, %c0_36] : memref<8x16xf32, #tpu.memory_space<vmem>>, vector<8x16xf32>
    tpu.vector_store %arg34[%c0_35, %c0_36], %45 {strides = array<i32>} : memref<8x16xf32, #tpu.memory_space<vmem>>, vector<8x16xf32>,
    %c0_37 = arith.constant 0 : index
    %c0_38 = arith.constant 0 : index
    %53 = vector.load %arg35[%c0_37, %c0_38] : memref<8x32xf32, #tpu.memory_space<vmem>>, vector<8x32xf32>
    tpu.vector_store %arg35[%c0_37, %c0_38], %51 {strides = array<i32>} : memref<8x32xf32, #tpu.memory_space<vmem>>, vector<8x32xf32>,
    %54 = tpu.concatenate %45, %51 in 1 : vector<8x16xf32>, vector<8x32xf32> -> vector<8x48xf32>
    %55 = arith.truncf %54 : vector<8x48xf32> to vector<8x48xbf16>
    %c0_39 = arith.constant 0 : index
    %c0_40 = arith.constant 0 : index
    %56 = vector.load %arg11[%c0_39, %c0_40] : memref<48x256xbf16, #tpu.memory_space<vmem>>, vector<48x256xbf16>
    %cst_41 = arith.constant dense<0.000000e+00> : vector<8x256xf32>
    %57 = tpu.matmul %55, %56, %cst_41 {dimension_numbers = #tpu.dot_dimension_numbers<[1], [0], [0], [1], [0, 0, 1, 1], [], []>} : vector<8x48xbf16>, vector<48x256xbf16>, vector<8x256xf32> -> vector<8x256xf32>
    %c0_42 = arith.constant 0 : index
    %c0_43 = arith.constant 0 : index
    %58 = vector.load %arg12[%c0_42, %c0_43] : memref<1x256xf32, #tpu.memory_space<vmem>>, vector<1x256xf32>
    %59 = vector.broadcast %58 : vector<1x256xf32> to vector<8x256xf32>
    %60 = arith.addf %57, %59 : vector<8x256xf32>
    %cst_44 = arith.constant 0.000000e+00 : f32
    %61 = vector.broadcast %cst_44 : f32 to vector<8x256xf32>
    %62 = arith.cmpf ogt, %60, %61 : vector<8x256xf32>
    %cst_45 = arith.constant 0.00999999977 : f32
    %63 = vector.broadcast %cst_45 : f32 to vector<8x256xf32>
    %64 = arith.mulf %63, %60 : vector<8x256xf32>
    %65 = arith.select %62, %60, %64 : vector<8x256xi1>, vector<8x256xf32>
    %66 = arith.truncf %65 : vector<8x256xf32> to vector<8x256xbf16>
    %c0_46 = arith.constant 0 : index
    %c0_47 = arith.constant 0 : index
    %67 = vector.load %arg13[%c0_46, %c0_47] : memref<256x256xbf16, #tpu.memory_space<vmem>>, vector<256x256xbf16>
    %cst_48 = arith.constant dense<0.000000e+00> : vector<8x256xf32>
    %68 = tpu.matmul %66, %67, %cst_48 {dimension_numbers = #tpu.dot_dimension_numbers<[1], [0], [0], [1], [0, 0, 1, 1], [], []>} : vector<8x256xbf16>, vector<256x256xbf16>, vector<8x256xf32> -> vector<8x256xf32>
    %c0_49 = arith.constant 0 : index
    %c0_50 = arith.constant 0 : index
    %69 = vector.load %arg14[%c0_49, %c0_50] : memref<1x256xf32, #tpu.memory_space<vmem>>, vector<1x256xf32>
    %70 = vector.broadcast %69 : vector<1x256xf32> to vector<8x256xf32>
    %71 = arith.addf %68, %70 : vector<8x256xf32>
    %cst_51 = arith.constant 0.000000e+00 : f32
    %72 = vector.broadcast %cst_51 : f32 to vector<8x256xf32>
    %73 = arith.cmpf ogt, %71, %72 : vector<8x256xf32>
    %cst_52 = arith.constant 0.00999999977 : f32
    %74 = vector.broadcast %cst_52 : f32 to vector<8x256xf32>
    %75 = arith.mulf %74, %71 : vector<8x256xf32>
    %76 = arith.select %73, %71, %75 : vector<8x256xi1>, vector<8x256xf32>
    %77 = arith.truncf %76 : vector<8x256xf32> to vector<8x256xbf16>
    %c0_53 = arith.constant 0 : index
    %c0_54 = arith.constant 0 : index
    %78 = vector.load %arg15[%c0_53, %c0_54] : memref<256x8xbf16, #tpu.memory_space<vmem>>, vector<256x8xbf16>
    %cst_55 = arith.constant dense<0.000000e+00> : vector<8x8xf32>
    %79 = tpu.matmul %77, %78, %cst_55 {dimension_numbers = #tpu.dot_dimension_numbers<[1], [0], [0], [1], [0, 0, 1, 1], [], []>} : vector<8x256xbf16>, vector<256x8xbf16>, vector<8x8xf32> -> vector<8x8xf32>
    %c0_56 = arith.constant 0 : index
    %c0_57 = arith.constant 0 : index
    %80 = vector.load %arg16[%c0_56, %c0_57] : memref<1x8xf32, #tpu.memory_space<vmem>>, vector<1x8xf32>
    %81 = vector.broadcast %80 : vector<1x8xf32> to vector<8x8xf32>
    %82 = arith.addf %79, %81 : vector<8x8xf32>
    %cst_58 = arith.constant dense<0xFF800000> : vector<8xf32>
    %83 = vector.multi_reduction <maximumf>, %82, %cst_58 [1] : vector<8x8xf32> to vector<8xf32>
    %84 = vector.shape_cast %83 : vector<8xf32> to vector<8x1xf32>
    %85 = vector.broadcast %84 : vector<8x1xf32> to vector<8x8xf32>
    %86 = arith.subf %82, %85 : vector<8x8xf32>
    %87 = math.exp %86 : vector<8x8xf32>
    %cst_59 = arith.constant dense<0.000000e+00> : vector<8xf32>
    %88 = vector.multi_reduction <add>, %87, %cst_59 [1] : vector<8x8xf32> to vector<8xf32>
    %89 = vector.shape_cast %88 : vector<8xf32> to vector<8x1xf32>
    %90 = tpu.reciprocal %89 {approx = true} : vector<8x1xf32> -> vector<8x1xf32>
    %91 = vector.broadcast %90 : vector<8x1xf32> to vector<8x8xf32>
    %92 = arith.mulf %87, %91 : vector<8x8xf32>
    %c0_60 = arith.constant 0 : index
    %c0_61 = arith.constant 0 : index
    %93 = vector.load %arg36[%c0_60, %c0_61] : memref<8x8xf32, #tpu.memory_space<vmem>>, vector<8x8xf32>
    tpu.vector_store %arg36[%c0_60, %c0_61], %92 {strides = array<i32>} : memref<8x8xf32, #tpu.memory_space<vmem>>, vector<8x8xf32>,
    %c0_62 = arith.constant 0 : index
    %c0_63 = arith.constant 0 : index
    %94 = vector.load %arg4[%c0_62, %c0_63] : memref<8x8xf32, #tpu.memory_space<vmem>>, vector<8x8xf32>
    %95 = arith.addf %82, %94 : vector<8x8xf32>
    %cst_64 = arith.constant 1.000000e+01 : f32
    %96 = vector.broadcast %cst_64 : f32 to vector<8x8xf32>
    %97 = arith.mulf %95, %96 : vector<8x8xf32>
    %cst_65 = arith.constant dense<0xFF800000> : vector<8xf32>
    %98 = vector.multi_reduction <maximumf>, %97, %cst_65 [1] : vector<8x8xf32> to vector<8xf32>
    %99 = vector.shape_cast %98 : vector<8xf32> to vector<8x1xf32>
    %100 = vector.broadcast %99 : vector<8x1xf32> to vector<8x8xf32>
    %101 = arith.subf %97, %100 : vector<8x8xf32>
    %102 = math.exp %101 : vector<8x8xf32>
    %cst_66 = arith.constant dense<0.000000e+00> : vector<8xf32>
    %103 = vector.multi_reduction <add>, %102, %cst_66 [1] : vector<8x8xf32> to vector<8xf32>
    %104 = vector.shape_cast %103 : vector<8xf32> to vector<8x1xf32>
    %105 = tpu.reciprocal %104 {approx = true} : vector<8x1xf32> -> vector<8x1xf32>
    %106 = vector.broadcast %105 : vector<8x1xf32> to vector<8x8xf32>
    %107 = arith.mulf %102, %106 : vector<8x8xf32>
    %c0_67 = arith.constant 0 : index
    %c0_68 = arith.constant 0 : index
    %108 = vector.load %arg37[%c0_67, %c0_68] : memref<8x8xf32, #tpu.memory_space<vmem>>, vector<8x8xf32>
    tpu.vector_store %arg37[%c0_67, %c0_68], %107 {strides = array<i32>} : memref<8x8xf32, #tpu.memory_space<vmem>>, vector<8x8xf32>,
    %109 = arith.truncf %51 : vector<8x32xf32> to vector<8x32xbf16>
    %c0_69 = arith.constant 0 : index
    %c0_70 = arith.constant 0 : index
    %110 = vector.load %arg17[%c0_69, %c0_70] : memref<32x256xbf16, #tpu.memory_space<vmem>>, vector<32x256xbf16>
    %cst_71 = arith.constant dense<0.000000e+00> : vector<8x256xf32>
    %111 = tpu.matmul %109, %110, %cst_71 {dimension_numbers = #tpu.dot_dimension_numbers<[1], [0], [0], [1], [0, 0, 1, 1], [], []>} : vector<8x32xbf16>, vector<32x256xbf16>, vector<8x256xf32> -> vector<8x256xf32>
    %c0_72 = arith.constant 0 : index
    %c0_73 = arith.constant 0 : index
    %112 = vector.load %arg18[%c0_72, %c0_73] : memref<1x256xf32, #tpu.memory_space<vmem>>, vector<1x256xf32>
    %113 = vector.broadcast %112 : vector<1x256xf32> to vector<8x256xf32>
    %114 = arith.addf %111, %113 : vector<8x256xf32>
    %cst_74 = arith.constant 0.000000e+00 : f32
    %115 = vector.broadcast %cst_74 : f32 to vector<8x256xf32>
    %116 = arith.cmpf ogt, %114, %115 : vector<8x256xf32>
    %cst_75 = arith.constant 0.00999999977 : f32
    %117 = vector.broadcast %cst_75 : f32 to vector<8x256xf32>
    %118 = arith.mulf %117, %114 : vector<8x256xf32>
    %119 = arith.select %116, %114, %118 : vector<8x256xi1>, vector<8x256xf32>
    %120 = arith.truncf %119 : vector<8x256xf32> to vector<8x256xbf16>
    %c0_76 = arith.constant 0 : index
    %c0_77 = arith.constant 0 : index
    %121 = vector.load %arg19[%c0_76, %c0_77] : memref<256x256xbf16, #tpu.memory_space<vmem>>, vector<256x256xbf16>
    %cst_78 = arith.constant dense<0.000000e+00> : vector<8x256xf32>
    %122 = tpu.matmul %120, %121, %cst_78 {dimension_numbers = #tpu.dot_dimension_numbers<[1], [0], [0], [1], [0, 0, 1, 1], [], []>} : vector<8x256xbf16>, vector<256x256xbf16>, vector<8x256xf32> -> vector<8x256xf32>
    %c0_79 = arith.constant 0 : index
    %c0_80 = arith.constant 0 : index
    %123 = vector.load %arg20[%c0_79, %c0_80] : memref<1x256xf32, #tpu.memory_space<vmem>>, vector<1x256xf32>
    %124 = vector.broadcast %123 : vector<1x256xf32> to vector<8x256xf32>
    %125 = arith.addf %122, %124 : vector<8x256xf32>
    %cst_81 = arith.constant 0.000000e+00 : f32
    %126 = vector.broadcast %cst_81 : f32 to vector<8x256xf32>
    %127 = arith.cmpf ogt, %125, %126 : vector<8x256xf32>
    %cst_82 = arith.constant 0.00999999977 : f32
    %128 = vector.broadcast %cst_82 : f32 to vector<8x256xf32>
    %129 = arith.mulf %128, %125 : vector<8x256xf32>
    %130 = arith.select %127, %125, %129 : vector<8x256xi1>, vector<8x256xf32>
    %131 = arith.truncf %130 : vector<8x256xf32> to vector<8x256xbf16>
    %c0_83 = arith.constant 0 : index
    %c0_84 = arith.constant 0 : index
    %132 = vector.load %arg21[%c0_83, %c0_84] : memref<256x256xbf16, #tpu.memory_space<vmem>>, vector<256x256xbf16>
    %cst_85 = arith.constant dense<0.000000e+00> : vector<8x256xf32>
    %133 = tpu.matmul %131, %132, %cst_85 {dimension_numbers = #tpu.dot_dimension_numbers<[1], [0], [0], [1], [0, 0, 1, 1], [], []>} : vector<8x256xbf16>, vector<256x256xbf16>, vector<8x256xf32> -> vector<8x256xf32>
    %c0_86 = arith.constant 0 : index
    %c0_87 = arith.constant 0 : index
    %134 = vector.load %arg22[%c0_86, %c0_87] : memref<1x256xf32, #tpu.memory_space<vmem>>, vector<1x256xf32>
    %135 = vector.broadcast %134 : vector<1x256xf32> to vector<8x256xf32>
    %136 = arith.addf %133, %135 : vector<8x256xf32>
    %c0_88 = arith.constant 0 : index
    %c0_89 = arith.constant 0 : index
    %137 = vector.load %arg38[%c0_88, %c0_89] : memref<8x256xf32, #tpu.memory_space<vmem>>, vector<8x256xf32>
    tpu.vector_store %arg38[%c0_88, %c0_89], %136 {strides = array<i32>} : memref<8x256xf32, #tpu.memory_space<vmem>>, vector<8x256xf32>,
    %c0_90 = arith.constant 0 : index
    %c0_91 = arith.constant 0 : index
    %138 = vector.load %arg1[%c0_90, %c0_91] : memref<1x256xf32, #tpu.memory_space<vmem>>, vector<1x256xf32>
    %cst_92 = arith.constant -2.000000e+00 : f32
    %139 = vector.broadcast %cst_92 : f32 to vector<1x256xf32>
    %140 = arith.subf %138, %139 : vector<1x256xf32>
    %cst_93 = arith.constant 0.000000e+00 : f32
    %141 = vector.broadcast %cst_93 : f32 to vector<1x256xf32>
    %142 = arith.maximumf %140, %141 : vector<1x256xf32>
    %143 = math.absf %140 : vector<1x256xf32>
    %cst_94 = arith.constant 0.000000e+00 : f32
    %144 = vector.broadcast %cst_94 : f32 to vector<1x256xf32>
    %145 = arith.subf %144, %143 : vector<1x256xf32>
    %146 = math.exp %145 : vector<1x256xf32>
    %cst_95 = arith.constant 1.000000e+00 : f32
    %147 = vector.broadcast %cst_95 : f32 to vector<1x256xf32>
    %148 = arith.addf %147, %146 : vector<1x256xf32>
    %149 = math.log %148 : vector<1x256xf32>
    %150 = arith.addf %142, %149 : vector<1x256xf32>
    %cst_96 = arith.constant -2.000000e+00 : f32
    %151 = vector.broadcast %cst_96 : f32 to vector<1x256xf32>
    %152 = arith.addf %151, %150 : vector<1x256xf32>
    %cst_97 = arith.constant 2.000000e+00 : f32
    %153 = vector.broadcast %cst_97 : f32 to vector<1x256xf32>
    %154 = arith.subf %153, %152 : vector<1x256xf32>
    %cst_98 = arith.constant 0.000000e+00 : f32
    %155 = vector.broadcast %cst_98 : f32 to vector<1x256xf32>
    %156 = arith.maximumf %154, %155 : vector<1x256xf32>
    %157 = math.absf %154 : vector<1x256xf32>
    %cst_99 = arith.constant 0.000000e+00 : f32
    %158 = vector.broadcast %cst_99 : f32 to vector<1x256xf32>
    %159 = arith.subf %158, %157 : vector<1x256xf32>
    %160 = math.exp %159 : vector<1x256xf32>
    %cst_100 = arith.constant 1.000000e+00 : f32
    %161 = vector.broadcast %cst_100 : f32 to vector<1x256xf32>
    %162 = arith.addf %161, %160 : vector<1x256xf32>
    %163 = math.log %162 : vector<1x256xf32>
    %164 = arith.addf %156, %163 : vector<1x256xf32>
    %cst_101 = arith.constant 2.000000e+00 : f32
    %165 = vector.broadcast %cst_101 : f32 to vector<1x256xf32>
    %166 = arith.subf %165, %164 : vector<1x256xf32>
    %cst_102 = arith.constant -2.000000e+00 : f32
    %167 = vector.broadcast %cst_102 : f32 to vector<1x256xf32>
    %168 = arith.mulf %167, %166 : vector<1x256xf32>
    %169 = math.exp %168 : vector<1x256xf32>
    %170 = arith.subf %136, %0 : vector<8x256xf32>
    %171 = arith.mulf %170, %170 : vector<8x256xf32>
    %cst_103 = arith.constant 5.000000e-01 : f32
    %172 = vector.broadcast %cst_103 : f32 to vector<8x256xf32>
    %173 = arith.mulf %172, %171 : vector<8x256xf32>
    %174 = vector.broadcast %169 : vector<1x256xf32> to vector<8x256xf32>
    %175 = arith.mulf %173, %174 : vector<8x256xf32>
    %176 = vector.broadcast %166 : vector<1x256xf32> to vector<8x256xf32>
    %177 = arith.addf %175, %176 : vector<8x256xf32>
    %cst_104 = arith.constant 0.918938517 : f32
    %178 = vector.broadcast %cst_104 : f32 to vector<8x256xf32>
    %179 = arith.addf %177, %178 : vector<8x256xf32>
    %cst_105 = arith.constant dense<0.000000e+00> : vector<8xf32>
    %180 = vector.multi_reduction <add>, %179, %cst_105 [1] : vector<8x256xf32> to vector<8xf32>
    %181 = vector.shape_cast %180 : vector<8xf32> to vector<8x1xf32>
    %182 = vector.shape_cast %181 : vector<8x1xf32> to vector<1x8x1xf32>
    %cst_106 = arith.constant dense<0.000000e+00> : vector<1xf32>
    %183 = vector.multi_reduction <add>, %182, %cst_106 [1, 2] : vector<1x8x1xf32> to vector<1xf32>
    %184 = vector.shape_cast %183 : vector<1xf32> to vector<1x1x1xf32>
    %185 = vector.extract %184[0, 0, 0] : f32 from vector<1x1x1xf32>
    %cst_107 = arith.constant 8.000000e+00 : f32
    %186 = arith.divf %185, %cst_107 : f32
    %187 = arith.truncf %45 : vector<8x16xf32> to vector<8x16xbf16>
    %c0_108 = arith.constant 0 : index
    %c0_109 = arith.constant 0 : index
    %188 = vector.load %arg23[%c0_108, %c0_109] : memref<16x256xbf16, #tpu.memory_space<vmem>>, vector<16x256xbf16>
    %cst_110 = arith.constant dense<0.000000e+00> : vector<8x256xf32>
    %189 = tpu.matmul %187, %188, %cst_110 {dimension_numbers = #tpu.dot_dimension_numbers<[1], [0], [0], [1], [0, 0, 1, 1], [], []>} : vector<8x16xbf16>, vector<16x256xbf16>, vector<8x256xf32> -> vector<8x256xf32>
    %c0_111 = arith.constant 0 : index
    %c0_112 = arith.constant 0 : index
    %190 = vector.load %arg24[%c0_111, %c0_112] : memref<1x256xf32, #tpu.memory_space<vmem>>, vector<1x256xf32>
    %191 = vector.broadcast %190 : vector<1x256xf32> to vector<8x256xf32>
    %192 = arith.addf %189, %191 : vector<8x256xf32>
    %cst_113 = arith.constant 0.000000e+00 : f32
    %193 = vector.broadcast %cst_113 : f32 to vector<8x256xf32>
    %194 = arith.cmpf ogt, %192, %193 : vector<8x256xf32>
    %cst_114 = arith.constant 0.00999999977 : f32
    %195 = vector.broadcast %cst_114 : f32 to vector<8x256xf32>
    %196 = arith.mulf %195, %192 : vector<8x256xf32>
    %197 = arith.select %194, %192, %196 : vector<8x256xi1>, vector<8x256xf32>
    %198 = arith.truncf %197 : vector<8x256xf32> to vector<8x256xbf16>
    %c0_115 = arith.constant 0 : index
    %c0_116 = arith.constant 0 : index
    %199 = vector.load %arg25[%c0_115, %c0_116] : memref<256x256xbf16, #tpu.memory_space<vmem>>, vector<256x256xbf16>
    %cst_117 = arith.constant dense<0.000000e+00> : vector<8x256xf32>
    %200 = tpu.matmul %198, %199, %cst_117 {dimension_numbers = #tpu.dot_dimension_numbers<[1], [0], [0], [1], [0, 0, 1, 1], [], []>} : vector<8x256xbf16>, vector<256x256xbf16>, vector<8x256xf32> -> vector<8x256xf32>
    %c0_118 = arith.constant 0 : index
    %c0_119 = arith.constant 0 : index
    %201 = vector.load %arg26[%c0_118, %c0_119] : memref<1x256xf32, #tpu.memory_space<vmem>>, vector<1x256xf32>
    %202 = vector.broadcast %201 : vector<1x256xf32> to vector<8x256xf32>
    %203 = arith.addf %200, %202 : vector<8x256xf32>
    %cst_120 = arith.constant 0.000000e+00 : f32
    %204 = vector.broadcast %cst_120 : f32 to vector<8x256xf32>
    %205 = arith.cmpf ogt, %203, %204 : vector<8x256xf32>
    %cst_121 = arith.constant 0.00999999977 : f32
    %206 = vector.broadcast %cst_121 : f32 to vector<8x256xf32>
    %207 = arith.mulf %206, %203 : vector<8x256xf32>
    %208 = arith.select %205, %203, %207 : vector<8x256xi1>, vector<8x256xf32>
    %209 = arith.truncf %208 : vector<8x256xf32> to vector<8x256xbf16>
    %c0_122 = arith.constant 0 : index
    %c0_123 = arith.constant 0 : index
    %210 = vector.load %arg27[%c0_122, %c0_123] : memref<256x512xbf16, #tpu.memory_space<vmem>>, vector<256x512xbf16>
    %cst_124 = arith.constant dense<0.000000e+00> : vector<8x512xf32>
    %211 = tpu.matmul %209, %210, %cst_124 {dimension_numbers = #tpu.dot_dimension_numbers<[1], [0], [0], [1], [0, 0, 1, 1], [], []>} : vector<8x256xbf16>, vector<256x512xbf16>, vector<8x512xf32> -> vector<8x512xf32>
    %c0_125 = arith.constant 0 : index
    %c0_126 = arith.constant 0 : index
    %212 = vector.load %arg28[%c0_125, %c0_126] : memref<1x512xf32, #tpu.memory_space<vmem>>, vector<1x512xf32>
    %213 = vector.broadcast %212 : vector<1x512xf32> to vector<8x512xf32>
    %214 = arith.addf %211, %213 : vector<8x512xf32>
    %215 = math.exp %35 : vector<8x32xf32>
    %cst_127 = arith.constant 0.000000e+00 : f32
    %216 = vector.broadcast %cst_127 : f32 to vector<8x1xf32>
    %217 = vector.extract_strided_slice %214 {offsets = [0, 0], sizes = [8, 32], strides = [1, 1]} : vector<8x512xf32> to vector<8x32xf32>
    %218 = vector.extract_strided_slice %214 {offsets = [0, 32], sizes = [8, 32], strides = [1, 1]} : vector<8x512xf32> to vector<8x32xf32>
    %219 = math.tanh %218 : vector<8x32xf32>
    %220 = arith.subf %31, %217 : vector<8x32xf32>
    %221 = arith.mulf %220, %220 : vector<8x32xf32>
    %222 = arith.addf %215, %221 : vector<8x32xf32>
    %cst_128 = arith.constant 0.000000e+00 : f32
    %223 = vector.broadcast %cst_128 : f32 to vector<8x32xf32>
    %224 = arith.subf %223, %219 : vector<8x32xf32>
    %225 = math.exp %224 : vector<8x32xf32>
    %226 = arith.mulf %222, %225 : vector<8x32xf32>
    %cst_129 = arith.constant -1.000000e+00 : f32
    %227 = vector.broadcast %cst_129 : f32 to vector<8x32xf32>
    %228 = arith.addf %227, %226 : vector<8x32xf32>
    %229 = arith.addf %228, %219 : vector<8x32xf32>
    %230 = arith.subf %229, %35 : vector<8x32xf32>
    %cst_130 = arith.constant 5.000000e-01 : f32
    %231 = vector.broadcast %cst_130 : f32 to vector<8x32xf32>
    %232 = arith.mulf %231, %230 : vector<8x32xf32>
    %233 = vector.extract_strided_slice %92 {offsets = [0, 0], sizes = [8, 1], strides = [1, 1]} : vector<8x8xf32> to vector<8x1xf32>
    %cst_131 = arith.constant dense<0.000000e+00> : vector<8xf32>
    %234 = vector.multi_reduction <add>, %232, %cst_131 [1] : vector<8x32xf32> to vector<8xf32>
    %235 = vector.shape_cast %234 : vector<8xf32> to vector<8x1xf32>
    %236 = arith.mulf %233, %235 : vector<8x1xf32>
    %237 = arith.addf %216, %236 : vector<8x1xf32>
    %238 = vector.extract_strided_slice %214 {offsets = [0, 64], sizes = [8, 32], strides = [1, 1]} : vector<8x512xf32> to vector<8x32xf32>
    %239 = vector.extract_strided_slice %214 {offsets = [0, 96], sizes = [8, 32], strides = [1, 1]} : vector<8x512xf32> to vector<8x32xf32>
    %240 = math.tanh %239 : vector<8x32xf32>
    %241 = arith.subf %31, %238 : vector<8x32xf32>
    %242 = arith.mulf %241, %241 : vector<8x32xf32>
    %243 = arith.addf %215, %242 : vector<8x32xf32>
    %cst_132 = arith.constant 0.000000e+00 : f32
    %244 = vector.broadcast %cst_132 : f32 to vector<8x32xf32>
    %245 = arith.subf %244, %240 : vector<8x32xf32>
    %246 = math.exp %245 : vector<8x32xf32>
    %247 = arith.mulf %243, %246 : vector<8x32xf32>
    %cst_133 = arith.constant -1.000000e+00 : f32
    %248 = vector.broadcast %cst_133 : f32 to vector<8x32xf32>
    %249 = arith.addf %248, %247 : vector<8x32xf32>
    %250 = arith.addf %249, %240 : vector<8x32xf32>
    %251 = arith.subf %250, %35 : vector<8x32xf32>
    %cst_134 = arith.constant 5.000000e-01 : f32
    %252 = vector.broadcast %cst_134 : f32 to vector<8x32xf32>
    %253 = arith.mulf %252, %251 : vector<8x32xf32>
    %254 = vector.extract_strided_slice %92 {offsets = [0, 1], sizes = [8, 1], strides = [1, 1]} : vector<8x8xf32> to vector<8x1xf32>
    %cst_135 = arith.constant dense<0.000000e+00> : vector<8xf32>
    %255 = vector.multi_reduction <add>, %253, %cst_135 [1] : vector<8x32xf32> to vector<8xf32>
    %256 = vector.shape_cast %255 : vector<8xf32> to vector<8x1xf32>
    %257 = arith.mulf %254, %256 : vector<8x1xf32>
    %258 = arith.addf %237, %257 : vector<8x1xf32>
    %259 = vector.extract_strided_slice %214 {offsets = [0, 128], sizes = [8, 32], strides = [1, 1]} : vector<8x512xf32> to vector<8x32xf32>
    %260 = vector.extract_strided_slice %214 {offsets = [0, 160], sizes = [8, 32], strides = [1, 1]} : vector<8x512xf32> to vector<8x32xf32>
    %261 = math.tanh %260 : vector<8x32xf32>
    %262 = arith.subf %31, %259 : vector<8x32xf32>
    %263 = arith.mulf %262, %262 : vector<8x32xf32>
    %264 = arith.addf %215, %263 : vector<8x32xf32>
    %cst_136 = arith.constant 0.000000e+00 : f32
    %265 = vector.broadcast %cst_136 : f32 to vector<8x32xf32>
    %266 = arith.subf %265, %261 : vector<8x32xf32>
    %267 = math.exp %266 : vector<8x32xf32>
    %268 = arith.mulf %264, %267 : vector<8x32xf32>
    %cst_137 = arith.constant -1.000000e+00 : f32
    %269 = vector.broadcast %cst_137 : f32 to vector<8x32xf32>
    %270 = arith.addf %269, %268 : vector<8x32xf32>
    %271 = arith.addf %270, %261 : vector<8x32xf32>
    %272 = arith.subf %271, %35 : vector<8x32xf32>
    %cst_138 = arith.constant 5.000000e-01 : f32
    %273 = vector.broadcast %cst_138 : f32 to vector<8x32xf32>
    %274 = arith.mulf %273, %272 : vector<8x32xf32>
    %275 = vector.extract_strided_slice %92 {offsets = [0, 2], sizes = [8, 1], strides = [1, 1]} : vector<8x8xf32> to vector<8x1xf32>
    %cst_139 = arith.constant dense<0.000000e+00> : vector<8xf32>
    %276 = vector.multi_reduction <add>, %274, %cst_139 [1] : vector<8x32xf32> to vector<8xf32>
    %277 = vector.shape_cast %276 : vector<8xf32> to vector<8x1xf32>
    %278 = arith.mulf %275, %277 : vector<8x1xf32>
    %279 = arith.addf %258, %278 : vector<8x1xf32>
    %280 = vector.extract_strided_slice %214 {offsets = [0, 192], sizes = [8, 32], strides = [1, 1]} : vector<8x512xf32> to vector<8x32xf32>
    %281 = vector.extract_strided_slice %214 {offsets = [0, 224], sizes = [8, 32], strides = [1, 1]} : vector<8x512xf32> to vector<8x32xf32>
    %282 = math.tanh %281 : vector<8x32xf32>
    %283 = arith.subf %31, %280 : vector<8x32xf32>
    %284 = arith.mulf %283, %283 : vector<8x32xf32>
    %285 = arith.addf %215, %284 : vector<8x32xf32>
    %cst_140 = arith.constant 0.000000e+00 : f32
    %286 = vector.broadcast %cst_140 : f32 to vector<8x32xf32>
    %287 = arith.subf %286, %282 : vector<8x32xf32>
    %288 = math.exp %287 : vector<8x32xf32>
    %289 = arith.mulf %285, %288 : vector<8x32xf32>
    %cst_141 = arith.constant -1.000000e+00 : f32
    %290 = vector.broadcast %cst_141 : f32 to vector<8x32xf32>
    %291 = arith.addf %290, %289 : vector<8x32xf32>
    %292 = arith.addf %291, %282 : vector<8x32xf32>
    %293 = arith.subf %292, %35 : vector<8x32xf32>
    %cst_142 = arith.constant 5.000000e-01 : f32
    %294 = vector.broadcast %cst_142 : f32 to vector<8x32xf32>
    %295 = arith.mulf %294, %293 : vector<8x32xf32>
    %296 = vector.extract_strided_slice %92 {offsets = [0, 3], sizes = [8, 1], strides = [1, 1]} : vector<8x8xf32> to vector<8x1xf32>
    %cst_143 = arith.constant dense<0.000000e+00> : vector<8xf32>
    %297 = vector.multi_reduction <add>, %295, %cst_143 [1] : vector<8x32xf32> to vector<8xf32>
    %298 = vector.shape_cast %297 : vector<8xf32> to vector<8x1xf32>
    %299 = arith.mulf %296, %298 : vector<8x1xf32>
    %300 = arith.addf %279, %299 : vector<8x1xf32>
    %301 = vector.extract_strided_slice %214 {offsets = [0, 256], sizes = [8, 32], strides = [1, 1]} : vector<8x512xf32> to vector<8x32xf32>
    %302 = vector.extract_strided_slice %214 {offsets = [0, 288], sizes = [8, 32], strides = [1, 1]} : vector<8x512xf32> to vector<8x32xf32>
    %303 = math.tanh %302 : vector<8x32xf32>
    %304 = arith.subf %31, %301 : vector<8x32xf32>
    %305 = arith.mulf %304, %304 : vector<8x32xf32>
    %306 = arith.addf %215, %305 : vector<8x32xf32>
    %cst_144 = arith.constant 0.000000e+00 : f32
    %307 = vector.broadcast %cst_144 : f32 to vector<8x32xf32>
    %308 = arith.subf %307, %303 : vector<8x32xf32>
    %309 = math.exp %308 : vector<8x32xf32>
    %310 = arith.mulf %306, %309 : vector<8x32xf32>
    %cst_145 = arith.constant -1.000000e+00 : f32
    %311 = vector.broadcast %cst_145 : f32 to vector<8x32xf32>
    %312 = arith.addf %311, %310 : vector<8x32xf32>
    %313 = arith.addf %312, %303 : vector<8x32xf32>
    %314 = arith.subf %313, %35 : vector<8x32xf32>
    %cst_146 = arith.constant 5.000000e-01 : f32
    %315 = vector.broadcast %cst_146 : f32 to vector<8x32xf32>
    %316 = arith.mulf %315, %314 : vector<8x32xf32>
    %317 = vector.extract_strided_slice %92 {offsets = [0, 4], sizes = [8, 1], strides = [1, 1]} : vector<8x8xf32> to vector<8x1xf32>
    %cst_147 = arith.constant dense<0.000000e+00> : vector<8xf32>
    %318 = vector.multi_reduction <add>, %316, %cst_147 [1] : vector<8x32xf32> to vector<8xf32>
    %319 = vector.shape_cast %318 : vector<8xf32> to vector<8x1xf32>
    %320 = arith.mulf %317, %319 : vector<8x1xf32>
    %321 = arith.addf %300, %320 : vector<8x1xf32>
    %322 = vector.extract_strided_slice %214 {offsets = [0, 320], sizes = [8, 32], strides = [1, 1]} : vector<8x512xf32> to vector<8x32xf32>
    %323 = vector.extract_strided_slice %214 {offsets = [0, 352], sizes = [8, 32], strides = [1, 1]} : vector<8x512xf32> to vector<8x32xf32>
    %324 = math.tanh %323 : vector<8x32xf32>
    %325 = arith.subf %31, %322 : vector<8x32xf32>
    %326 = arith.mulf %325, %325 : vector<8x32xf32>
    %327 = arith.addf %215, %326 : vector<8x32xf32>
    %cst_148 = arith.constant 0.000000e+00 : f32
    %328 = vector.broadcast %cst_148 : f32 to vector<8x32xf32>
    %329 = arith.subf %328, %324 : vector<8x32xf32>
    %330 = math.exp %329 : vector<8x32xf32>
    %331 = arith.mulf %327, %330 : vector<8x32xf32>
    %cst_149 = arith.constant -1.000000e+00 : f32
    %332 = vector.broadcast %cst_149 : f32 to vector<8x32xf32>
    %333 = arith.addf %332, %331 : vector<8x32xf32>
    %334 = arith.addf %333, %324 : vector<8x32xf32>
    %335 = arith.subf %334, %35 : vector<8x32xf32>
    %cst_150 = arith.constant 5.000000e-01 : f32
    %336 = vector.broadcast %cst_150 : f32 to vector<8x32xf32>
    %337 = arith.mulf %336, %335 : vector<8x32xf32>
    %338 = vector.extract_strided_slice %92 {offsets = [0, 5], sizes = [8, 1], strides = [1, 1]} : vector<8x8xf32> to vector<8x1xf32>
    %cst_151 = arith.constant dense<0.000000e+00> : vector<8xf32>
    %339 = vector.multi_reduction <add>, %337, %cst_151 [1] : vector<8x32xf32> to vector<8xf32>
    %340 = vector.shape_cast %339 : vector<8xf32> to vector<8x1xf32>
    %341 = arith.mulf %338, %340 : vector<8x1xf32>
    %342 = arith.addf %321, %341 : vector<8x1xf32>
    %343 = vector.extract_strided_slice %214 {offsets = [0, 384], sizes = [8, 32], strides = [1, 1]} : vector<8x512xf32> to vector<8x32xf32>
    %344 = vector.extract_strided_slice %214 {offsets = [0, 416], sizes = [8, 32], strides = [1, 1]} : vector<8x512xf32> to vector<8x32xf32>
    %345 = math.tanh %344 : vector<8x32xf32>
    %346 = arith.subf %31, %343 : vector<8x32xf32>
    %347 = arith.mulf %346, %346 : vector<8x32xf32>
    %348 = arith.addf %215, %347 : vector<8x32xf32>
    %cst_152 = arith.constant 0.000000e+00 : f32
    %349 = vector.broadcast %cst_152 : f32 to vector<8x32xf32>
    %350 = arith.subf %349, %345 : vector<8x32xf32>
    %351 = math.exp %350 : vector<8x32xf32>
    %352 = arith.mulf %348, %351 : vector<8x32xf32>
    %cst_153 = arith.constant -1.000000e+00 : f32
    %353 = vector.broadcast %cst_153 : f32 to vector<8x32xf32>
    %354 = arith.addf %353, %352 : vector<8x32xf32>
    %355 = arith.addf %354, %345 : vector<8x32xf32>
    %356 = arith.subf %355, %35 : vector<8x32xf32>
    %cst_154 = arith.constant 5.000000e-01 : f32
    %357 = vector.broadcast %cst_154 : f32 to vector<8x32xf32>
    %358 = arith.mulf %357, %356 : vector<8x32xf32>
    %359 = vector.extract_strided_slice %92 {offsets = [0, 6], sizes = [8, 1], strides = [1, 1]} : vector<8x8xf32> to vector<8x1xf32>
    %cst_155 = arith.constant dense<0.000000e+00> : vector<8xf32>
    %360 = vector.multi_reduction <add>, %358, %cst_155 [1] : vector<8x32xf32> to vector<8xf32>
    %361 = vector.shape_cast %360 : vector<8xf32> to vector<8x1xf32>
    %362 = arith.mulf %359, %361 : vector<8x1xf32>
    %363 = arith.addf %342, %362 : vector<8x1xf32>
    %364 = vector.extract_strided_slice %214 {offsets = [0, 448], sizes = [8, 32], strides = [1, 1]} : vector<8x512xf32> to vector<8x32xf32>
    %365 = vector.extract_strided_slice %214 {offsets = [0, 480], sizes = [8, 32], strides = [1, 1]} : vector<8x512xf32> to vector<8x32xf32>
    %366 = math.tanh %365 : vector<8x32xf32>
    %367 = arith.subf %31, %364 : vector<8x32xf32>
    %368 = arith.mulf %367, %367 : vector<8x32xf32>
    %369 = arith.addf %215, %368 : vector<8x32xf32>
    %cst_156 = arith.constant 0.000000e+00 : f32
    %370 = vector.broadcast %cst_156 : f32 to vector<8x32xf32>
    %371 = arith.subf %370, %366 : vector<8x32xf32>
    %372 = math.exp %371 : vector<8x32xf32>
    %373 = arith.mulf %369, %372 : vector<8x32xf32>
    %cst_157 = arith.constant -1.000000e+00 : f32
    %374 = vector.broadcast %cst_157 : f32 to vector<8x32xf32>
    %375 = arith.addf %374, %373 : vector<8x32xf32>
    %376 = arith.addf %375, %366 : vector<8x32xf32>
    %377 = arith.subf %376, %35 : vector<8x32xf32>
    %cst_158 = arith.constant 5.000000e-01 : f32
    %378 = vector.broadcast %cst_158 : f32 to vector<8x32xf32>
    %379 = arith.mulf %378, %377 : vector<8x32xf32>
    %380 = vector.extract_strided_slice %92 {offsets = [0, 7], sizes = [8, 1], strides = [1, 1]} : vector<8x8xf32> to vector<8x1xf32>
    %cst_159 = arith.constant dense<0.000000e+00> : vector<8xf32>
    %381 = vector.multi_reduction <add>, %379, %cst_159 [1] : vector<8x32xf32> to vector<8xf32>
    %382 = vector.shape_cast %381 : vector<8xf32> to vector<8x1xf32>
    %383 = arith.mulf %380, %382 : vector<8x1xf32>
    %384 = arith.addf %363, %383 : vector<8x1xf32>
    %385 = vector.shape_cast %384 : vector<8x1xf32> to vector<1x8x1xf32>
    %cst_160 = arith.constant dense<0.000000e+00> : vector<1xf32>
    %386 = vector.multi_reduction <add>, %385, %cst_160 [1, 2] : vector<1x8x1xf32> to vector<1xf32>
    %387 = vector.shape_cast %386 : vector<1xf32> to vector<1x1x1xf32>
    %388 = vector.extract %387[0, 0, 0] : f32 from vector<1x1x1xf32>
    %cst_161 = arith.constant 8.000000e+00 : f32
    %389 = arith.divf %388, %cst_161 : f32
    %cst_162 = arith.constant 1.000000e+00 : f32
    %390 = vector.broadcast %cst_162 : f32 to vector<8x16xf32>
    %391 = arith.addf %390, %33 : vector<8x16xf32>
    %392 = arith.mulf %30, %30 : vector<8x16xf32>
    %393 = arith.subf %391, %392 : vector<8x16xf32>
    %394 = math.exp %33 : vector<8x16xf32>
    %395 = arith.subf %393, %394 : vector<8x16xf32>
    %cst_163 = arith.constant -5.000000e-01 : f32
    %396 = vector.broadcast %cst_163 : f32 to vector<8x16xf32>
    %397 = arith.mulf %396, %395 : vector<8x16xf32>
    %cst_164 = arith.constant dense<0.000000e+00> : vector<8xf32>
    %398 = vector.multi_reduction <add>, %397, %cst_164 [1] : vector<8x16xf32> to vector<8xf32>
    %399 = vector.shape_cast %398 : vector<8xf32> to vector<8x1xf32>
    %400 = vector.shape_cast %399 : vector<8x1xf32> to vector<1x8x1xf32>
    %cst_165 = arith.constant dense<0.000000e+00> : vector<1xf32>
    %401 = vector.multi_reduction <add>, %400, %cst_165 [1, 2] : vector<1x8x1xf32> to vector<1xf32>
    %402 = vector.shape_cast %401 : vector<1xf32> to vector<1x1x1xf32>
    %403 = vector.extract %402[0, 0, 0] : f32 from vector<1x1x1xf32>
    %cst_166 = arith.constant 8.000000e+00 : f32
    %404 = arith.divf %403, %cst_166 : f32
    %cst_167 = arith.constant dense<0.000000e+00> : vector<8xf32>
    %405 = vector.multi_reduction <add>, %92, %cst_167 [0] : vector<8x8xf32> to vector<8xf32>
    %406 = vector.shape_cast %405 : vector<8xf32> to vector<1x8xf32>
    %cst_168 = arith.constant 8.000000e+00 : f32
    %407 = vector.broadcast %cst_168 : f32 to vector<1x8xf32>
    %408 = arith.divf %406, %407 : vector<1x8xf32>
    %cst_169 = arith.constant 9.99999996E-13 : f32
    %409 = vector.broadcast %cst_169 : f32 to vector<1x8xf32>
    %410 = arith.addf %408, %409 : vector<1x8xf32>
    %411 = math.log %410 : vector<1x8xf32>
    %cst_170 = arith.constant -2.07944155 : f32
    %412 = vector.broadcast %cst_170 : f32 to vector<1x8xf32>
    %413 = arith.subf %411, %412 : vector<1x8xf32>
    %414 = arith.mulf %408, %413 : vector<1x8xf32>
    %415 = vector.shape_cast %414 : vector<1x8xf32> to vector<1x1x8xf32>
    %cst_171 = arith.constant dense<0.000000e+00> : vector<1xf32>
    %416 = vector.multi_reduction <add>, %415, %cst_171 [1, 2] : vector<1x1x8xf32> to vector<1xf32>
    %417 = vector.shape_cast %416 : vector<1xf32> to vector<1x1x1xf32>
    %418 = vector.extract %417[0, 0, 0] : f32 from vector<1x1x1xf32>
    %cst_172 = arith.constant dense<0xFF800000> : vector<8xf32>
    %419 = vector.multi_reduction <maximumf>, %92, %cst_172 [1] : vector<8x8xf32> to vector<8xf32>
    %420 = vector.shape_cast %419 : vector<8xf32> to vector<8x1xf32>
    %421 = vector.shape_cast %420 : vector<8x1xf32> to vector<1x8x1xf32>
    %cst_173 = arith.constant dense<0.000000e+00> : vector<1xf32>
    %422 = vector.multi_reduction <add>, %421, %cst_173 [1, 2] : vector<1x8x1xf32> to vector<1xf32>
    %423 = vector.shape_cast %422 : vector<1xf32> to vector<1x1x1xf32>
    %424 = vector.extract %423[0, 0, 0] : f32 from vector<1x1x1xf32>
    %cst_174 = arith.constant 8.000000e+00 : f32
    %425 = arith.divf %424, %cst_174 : f32
    %cst_175 = arith.constant -1.000000e+00 : f32
    %426 = arith.mulf %cst_175, %425 : f32
    %427 = arith.addf %186, %389 : f32
    %428 = arith.addf %427, %404 : f32
    %cst_176 = arith.constant 1.000000e+01 : f32
    %429 = arith.mulf %cst_176, %418 : f32
    %430 = arith.addf %428, %429 : f32
    %c0_177 = arith.constant 0 : index
    %431 = memref.load %arg39[%c0_177] : memref<6xf32, #tpu.memory_space<smem>>
    memref.store %186, %arg39[%c0_177] : memref<6xf32, #tpu.memory_space<smem>>
    %c1 = arith.constant 1 : index
    %432 = memref.load %arg39[%c1] : memref<6xf32, #tpu.memory_space<smem>>
    memref.store %389, %arg39[%c1] : memref<6xf32, #tpu.memory_space<smem>>
    %c2 = arith.constant 2 : index
    %433 = memref.load %arg39[%c2] : memref<6xf32, #tpu.memory_space<smem>>
    memref.store %404, %arg39[%c2] : memref<6xf32, #tpu.memory_space<smem>>
    %c3 = arith.constant 3 : index
    %434 = memref.load %arg39[%c3] : memref<6xf32, #tpu.memory_space<smem>>
    memref.store %418, %arg39[%c3] : memref<6xf32, #tpu.memory_space<smem>>
    %c4 = arith.constant 4 : index
    %435 = memref.load %arg39[%c4] : memref<6xf32, #tpu.memory_space<smem>>
    memref.store %426, %arg39[%c4] : memref<6xf32, #tpu.memory_space<smem>>
    %c5 = arith.constant 5 : index
    %436 = memref.load %arg39[%c5] : memref<6xf32, #tpu.memory_space<smem>>
    memref.store %430, %arg39[%c5] : memref<6xf32, #tpu.memory_space<smem>>
    return
  }
}

</mosaic_0001>

<bundles_post_ra>
// kernel: vae_forward.3
= control target key start
LH: loop header
LB: loop body
LE: loop exit
PB: predicated region body
PF: predicated region fallthrough
CT: control target
= control target key end

     0   :  { %s5615_s6 = smov 1   ;;  %s5616_s10 = smov 2   ;;  %s6317_s0 = inlined_call_operand.smem [shape: u32[40], index: -1, kind: input, shape index: {}] }
   0x1   :  { %s5696_s5 = sld [smem:[%s6317_s0]]   ;;  %s5617_s14 = smov 3  }
   0x2   :  { %s5701_s9 = sld [smem:[%s6317_s0 + %s5615_s6]]   ;;  %s5618_s18 = smov 4  }
   0x3   :  { %s5706_s13 = sld [smem:[%s6317_s0 + %s5616_s10]]   ;;  %s5619_s22 = smov 5  }
   0x4   :  { %s5711_s17 = sld [smem:[%s6317_s0 + %s5617_s14]]   ;;  %s5620_s26 = smov 6  }
   0x5   :  { %s5716_s21 = sld [smem:[%s6317_s0 + %s5618_s18]]   ;;  %s5621_s30 = smov 7  }
   0x6   :  { %s5721_s25 = sld [smem:[%s6317_s0 + %s5619_s22]]   ;;  %s5622_s4 = smov 8  }
   0x7   :  { %s5726_s29 = sld [smem:[%s6317_s0 + %s5620_s26]]   ;;  %s5623_s10 = smov 9  }
   0x8   :  { %6327 = sst [smem:[#allocation38_spill]] %s5701_s9  ;;  %s5624_s15 = smov 10  }
   0x9   :  { %6328 = sst [smem:[#allocation39_spill]] %s5706_s13  ;;  %s5625_s20 = smov 11  }
   0xa   :  { %6329 = sst [smem:[#allocation40_spill]] %s5711_s17  ;;  %s5626_s26 = smov 12  }
   0xb   :  { %6330 = sst [smem:[#allocation41_spill]] %s5716_s21  ;;  %s5627_s1 = smov 13  }
   0xc   :  { %s5731_s3 = sld [smem:[%s6317_s0 + %s5621_s30]]   ;;  %s5628_s7 = smov 14  }
   0xd   :  { %s5736_s8 = sld [smem:[%s6317_s0 + %s5622_s4]]   ;;  %s5630_s22 = smov 16  }
   0xe   :  { %s5741_s14 = sld [smem:[%s6317_s0 + %s5623_s10]]   ;;  %s5631_s28 = smov 17  }
   0xf   :  { %s5746_s19 = sld [smem:[%s6317_s0 + %s5624_s15]]   ;;  %s5629_s15 = smov 15  }
  0x10   :  { %s5751_s24 = sld [smem:[%s6317_s0 + %s5625_s20]]  }
  0x11   :  { %s5756_s30 = sld [smem:[%s6317_s0 + %s5626_s26]]  }
  0x12   :  { %s5761_s6 = sld [smem:[%s6317_s0 + %s5627_s1]]  }
  0x13   :  { %s5766_s12 = sld [smem:[%s6317_s0 + %s5628_s7]]   ;;  %s5632_s7 = smov 18  }
  0x14   :  { %s5771_s20 = sld [smem:[%s6317_s0 + %s5629_s15]]   ;;  %s5633_s15 = smov 19  }
  0x15   :  { %s5776_s27 = sld [smem:[%s6317_s0 + %s5630_s22]]   ;;  %s5634_s22 = smov 20  }
  0x16   :  { %s5781_s4 = sld [smem:[%s6317_s0 + %s5631_s28]]   ;;  %s5635_s28 = smov 21  }
  0x17   :  { %6331 = sst [smem:[#allocation42_spill]] %s5756_s30 }
  0x18   :  { %s5786_s9 = sld [smem:[%s6317_s0 + %s5632_s7]]   ;;  %s5636_s7 = smov 22  }
  0x19   :  { %6332 = sst [smem:[#allocation43_spill]] %s5766_s12 }
  0x1a   :  { %6333 = sst [smem:[#allocation44_spill]] %s5771_s20 }
  0x1b   :  { %6334 = sst [smem:[#allocation45_spill]] %s5776_s27 }
  0x1c   :  { %6335 = sst [smem:[#allocation46_spill]] %s5781_s4 }
  0x1d   :  { %s5791_s21 = sld [smem:[%s6317_s0 + %s5633_s15]]   ;;  %s5637_s15 = smov 23  }
  0x1e   :  { %6336 = sst [smem:[#allocation47_spill]] %s5786_s9 }
  0x1f   :  { %s5796_s27 = sld [smem:[%s6317_s0 + %s5634_s22]]   ;;  %s5638_s22 = smov 24  }
  0x20   :  { %s5801_s12 = sld [smem:[%s6317_s0 + %s5635_s28]]   ;;  %s5639_s28 = smov 25  }
  0x21   :  { %s5806_s9 = sld [smem:[%s6317_s0 + %s5636_s7]]   ;;  %s5640_s7 = smov 26  }
  0x22   :  { %s5811_s30 = sld [smem:[%s6317_s0 + %s5637_s15]]   ;;  %s5641_s15 = smov 27  }
  0x23   :  { %s5821_s20 = sld [smem:[%s6317_s0 + %s5639_s28]]   ;;  %s5643_s28 = smov 29  }
  0x24   :  { %s5841_s4 = sld [smem:[%s6317_s0 + %s5643_s28]]   ;;  %s5647_s28 = smov 33  }
  0x25   :  { %6337 = sst [smem:[#allocation48_spill]] %s5796_s27 }
  0x26   :  { %s5816_s27 = sld [smem:[%s6317_s0 + %s5638_s22]]   ;;  %s5642_s22 = smov 28  }
  0x27   :  { %6338 = sst [smem:[#allocation49_spill]] %s5806_s9 }
  0x28   :  { %6339 = sst [smem:[#allocation50_spill]] %s5811_s30 }
  0x29   :  { %s5826_s9 = sld [smem:[%s6317_s0 + %s5640_s7]]   ;;  %s5644_s7 = smov 30  }
  0x2a   :  { %s5831_s30 = sld [smem:[%s6317_s0 + %s5641_s15]]   ;;  %s5645_s15 = smov 31  }
  0x2b   :  { %s5851_s13 = sld [smem:[%s6317_s0 + %s5645_s15]]   ;;  %s5649_s15 = smov 35  }
  0x2c   :  { %6340 = sst [smem:[#allocation51_spill]] %s5816_s27 }
  0x2d   :  { %s5836_s27 = sld [smem:[%s6317_s0 + %s5642_s22]]   ;;  %s5646_s22 = smov 32  }
  0x2e   :  { %s5861_s17 = sld [smem:[%s6317_s0 + %s5647_s28]]   ;;  %s5651_s28 = smov 37  }
  0x2f   :  { %6341 = sst [smem:[#allocation52_spill]] %s5826_s9 }
  0x30   :  { %s5846_s9 = sld [smem:[%s6317_s0 + %s5644_s7]]   ;;  %s5648_s7 = smov 34  }
  0x31   :  { %6344 = sst [smem:[#allocation55_spill]] %s5851_s13 }
  0x32   :  { %s5871_s13 = sld [smem:[%s6317_s0 + %s5649_s15]]   ;;  %s5653_s15 = smov 39  }
  0x33   :  { %6342 = sst [smem:[#allocation53_spill]] %s5836_s27 }
  0x34   :  { %s5856_s27 = sld [smem:[%s6317_s0 + %s5646_s22]]   ;;  %s5650_s22 = smov 36  }
  0x35   :  { %6346 = sst [smem:[#allocation57_spill]] %s5861_s17 }
  0x36   :  { %6343 = sst [smem:[#allocation54_spill]] %s5846_s9 }
  0x37   :  { %s5866_s9 = sld [smem:[%s6317_s0 + %s5648_s7]]   ;;  %s5652_s7 = smov 38  }
  0x38   :  { %6348 = sst [smem:[#allocation59_spill]] %s5871_s13 }
  0x39   :  { %s5881_s17 = sld [smem:[%s6317_s0 + %s5651_s28]]  }
  0x3a   :  { %6345 = sst [smem:[#allocation56_spill]] %s5856_s27 }
  0x3b   :  { %s5876_s27 = sld [smem:[%s6317_s0 + %s5650_s22]]  }
  0x3c   :  { %s5891_s13 = sld [smem:[%s6317_s0 + %s5653_s15]]  }
  0x3d   :  { %6347 = sst [smem:[#allocation58_spill]] %s5866_s9 }
  0x3e   :  { %s5886_s9 = sld [smem:[%s6317_s0 + %s5652_s7]]  }
  0x3f   :  { %85 = vsyncpa [#allocation3], 0 }
  0x40   :  { %86 = vsyncpa [#allocation7], 0 }
  0x41   :  { %87 = vsyncpa [#allocation10], 0 }
  0x42   :  { %88 = vsyncpa [#allocation13], 0 }
  0x43   :  { %89 = vsyncpa [#allocation4], 0 }
  0x44   :  { %90 = vsyncpa [#allocation16], 0 }
  0x45   :  { %91 = vsyncpa [#allocation19], 0 }
  0x46   :  { %92 = vsyncpa [#allocation22], 0 }
  0x47   :  { %93 = vsyncpa [#allocation25], 0 }
  0x48   :  { %94 = vsyncpa [#allocation5], 0  ;;  %s136_s22 = sshll.u32 %s5761_s6, 4  ;;  %s5654_s23 = smov [#allocation6]   ;;  %s137_s22 = int_to_ptr.hbm [resolvable:$true] %s136_s22 }
  0x49   :  { %s138_s26 = sshll.u32 %s5654_s23, 4  ;;  %s174_s0 = sshll.u32 %s5801_s12, 4  ;;  %s139_s26 = int_to_ptr.vmem [resolvable:$true] %s138_s26  ;;  %s175_s0 = int_to_ptr.hbm [resolvable:$true] %s174_s0 }
  0x4a   :  { %s5223_s28 = sshra.s32 %s137_s22, 4  ;;  %s5227_s2 = scalar_lea.hbm %s5761_s6, 256  ;;  %s5224_s28 = int_to_ptr.hbm [resolvable:$true] %s5223_s28 }
  0x4b   :  { %s5225_s1 = scalar_lea.hbm %s5224_s28, 256  ;;  %p5228_p1 = scmp.lt.s32.totalorder %s5224_s28, %s5761_s6 }
  0x4c   :  { %p5226_p0 = scmp.ne.s32.totalorder %s5224_s28, %s5225_s1  ;;  %p5229_p2 = scmp.lt.s32.totalorder %s5227_s2, %s5225_s1 }
  0x4e   :  { %p5230_p3 = por %p5229_p2, %p5228_p1 }
  0x50   :  { %p5231_p4 = pnand %p5230_p3, %p5226_p0 }
  0x52   :  { %5234 = shalt.err (!%p5231_p4)
}
  0x53   :  { %s5655_s7 = smov 128   ;;  %s5656_s10 = smov 8  }
  0x54   :  { %144 = dma.hbm_to_vmem [thread:$0]  %s137_s22, 4096, %s139_s26, [#allocation7], %s5655_s7, %s5655_s7, %s5656_s10  }
  0x55   :  { %s5657_s11 = smov [#allocation9]   ;;  %s113_s16 = sshll.u32 %s5731_s3, 4  ;;  %s5901_s16 = int_to_ptr.hbm [resolvable:$true] %s113_s16 }
  0x56   :  { %s176_s15 = sshll.u32 %s5657_s11, 4  ;;  %s5247_s6 = sshra.s32 %s175_s0, 4  ;;  %s177_s15 = int_to_ptr.vmem [resolvable:$true] %s176_s15  ;;  %s5248_s6 = int_to_ptr.hbm [resolvable:$true] %s5247_s6 }
  0x57   :  { %s5249_s18 = scalar_lea.hbm %s5248_s6, 256  ;;  %s5251_s23 = scalar_lea.hbm %s5801_s12, 256 }
  0x58   :  { %p5250_p5 = scmp.ne.s32.totalorder %s5248_s6, %s5249_s18  ;;  %p5252_p6 = scmp.lt.s32.totalorder %s5248_s6, %s5801_s12 }
  0x59   :  { %p5253_p7 = scmp.lt.s32.totalorder %s5251_s23, %s5249_s18 }
  0x5b   :  { %p5254_p8 = por %p5253_p7, %p5252_p6 }
  0x5d   :  { %p5255_p9 = pnand %p5254_p8, %p5250_p5 }
  0x5f   :  { %5258 = shalt.err (!%p5255_p9)
}
  0x60   :  { %182 = dma.hbm_to_vmem [thread:$0]  %s175_s0, 4096, %s177_s15, [#allocation10], %s5655_s7, %s5655_s7, %s5656_s10  }
  0x61   :  { %s159_s22 = sshll.u32 %s5791_s21, 4  ;;  %s5658_s26 = smov [#allocation2]   ;;  %s5909_s22 = int_to_ptr.hbm [resolvable:$true] %s159_s22 }
  0x62   :  { %s115_s28 = sshll.u32 %s5658_s26, 4  ;;  %s5271_s1 = sshra.s32 %s5901_s16, 4  ;;  %s116_s28 = int_to_ptr.vmem [resolvable:$true] %s115_s28  ;;  %s5272_s1 = int_to_ptr.hbm [resolvable:$true] %s5271_s1 }
  0x63   :  { %s5273_s12 = scalar_lea.hbm %s5272_s1, 256  ;;  %s5275_s2 = scalar_lea.hbm %s5731_s3, 256 }
  0x64   :  { %p5274_p10 = scmp.ne.s32.totalorder %s5272_s1, %s5273_s12  ;;  %p5276_p11 = scmp.lt.s32.totalorder %s5272_s1, %s5731_s3 }
  0x65   :  { %p5277_p12 = scmp.lt.s32.totalorder %s5275_s2, %s5273_s12 }
  0x67   :  { %p5278_p13 = por %p5277_p12, %p5276_p11 }
  0x69   :  { %p5279_p0 = pnand %p5278_p13, %p5274_p10 }
  0x6b   :  { %5282 = shalt.err (!%p5279_p0)
}
  0x6c   :  { %121 = dma.hbm_to_vmem [thread:$0]  %s5901_s16, 4096, %s116_s28, [#allocation3], %s5655_s7, %s5655_s7, %s5656_s10  }
  0x6d   :  { %s5659_s0 = smov [#allocation8]   ;;  %s193_s15 = sshll.u32 %s5821_s20, 4  ;;  %s5919_s15 = int_to_ptr.hbm [resolvable:$true] %s193_s15 }
  0x6e   :  { %s161_s11 = sshll.u32 %s5659_s0, 4  ;;  %s5295_s3 = sshra.s32 %s5909_s22, 4  ;;  %s162_s11 = int_to_ptr.vmem [resolvable:$true] %s161_s11  ;;  %s5296_s3 = int_to_ptr.hbm [resolvable:$true] %s5295_s3 }
  0x6f   :  { %s5297_s6 = scalar_lea.hbm %s5296_s3, 256  ;;  %s5299_s18 = scalar_lea.hbm %s5791_s21, 256 }
  0x70   :  { %p5298_p1 = scmp.ne.s32.totalorder %s5296_s3, %s5297_s6  ;;  %p5300_p2 = scmp.lt.s32.totalorder %s5296_s3, %s5791_s21 }
  0x71   :  { %p5301_p3 = scmp.lt.s32.totalorder %s5299_s18, %s5297_s6 }
  0x73   :  { %p5302_p4 = por %p5301_p3, %p5300_p2 }
  0x75   :  { %p5303_p5 = pnand %p5302_p4, %p5298_p1 }
  0x77   :  { %5306 = shalt.err (!%p5303_p5)
}
  0x78   :  { %167 = dma.hbm_to_vmem [thread:$0]  %s5909_s22, 4096, %s162_s11, [#allocation7], %s5655_s7, %s5655_s7, %s5656_s10  }
  0x79   :  { %s208_s16 = sshll.u32 %s5831_s30, 4  ;;  %s5660_s23 = smov [#allocation11]   ;;  %s5929_s16 = int_to_ptr.hbm [resolvable:$true] %s208_s16 }
  0x7a   :  { %s195_s26 = sshll.u32 %s5660_s23, 4  ;;  %s5319_s21 = sshra.s32 %s5919_s15, 4  ;;  %s196_s26 = int_to_ptr.vmem [resolvable:$true] %s195_s26  ;;  %s5320_s21 = int_to_ptr.hbm [resolvable:$true] %s5319_s21 }
  0x7b   :  { %s5321_s28 = scalar_lea.hbm %s5320_s21, 256  ;;  %s5323_s1 = scalar_lea.hbm %s5821_s20, 256 }
  0x7c   :  { %p5322_p6 = scmp.ne.s32.totalorder %s5320_s21, %s5321_s28  ;;  %p5324_p7 = scmp.lt.s32.totalorder %s5320_s21, %s5821_s20 }
  0x7d   :  { %p5325_p8 = scmp.lt.s32.totalorder %s5323_s1, %s5321_s28 }
  0x7f   :  { %p5326_p9 = por %p5325_p8, %p5324_p7 }
  0x81   :  { %p5327_p10 = pnand %p5326_p9, %p5322_p6 }
  0x83   :  { %5330 = shalt.err (!%p5327_p10)
}
  0x84   :  { %201 = dma.hbm_to_vmem [thread:$0]  %s5919_s15, 4096, %s196_s26, [#allocation10], %s5655_s7, %s5655_s7, %s5656_s10  }
  0x85   :  { %s5661_s22 = smov [#allocation12]   ;;  %s5343_s2 = sshra.s32 %s5929_s16, 4  ;;  %s5344_s2 = int_to_ptr.hbm [resolvable:$true] %s5343_s2 }
  0x86   :  { %s210_s12 = sshll.u32 %s5661_s22, 4  ;;  %s5345_s0 = scalar_lea.hbm %s5344_s2, 512  ;;  %s211_s12 = int_to_ptr.vmem [resolvable:$true] %s210_s12 }
  0x87   :  { %p5346_p11 = scmp.ne.s32.totalorder %s5344_s2, %s5345_s0  ;;  %s5347_s20 = scalar_lea.hbm %s5831_s30, 512 }
  0x88   :  { %p5348_p12 = scmp.lt.s32.totalorder %s5344_s2, %s5831_s30  ;;  %p5349_p13 = scmp.lt.s32.totalorder %s5347_s20, %s5345_s0 }
  0x8a   :  { %p5350_p0 = por %p5349_p13, %p5348_p12 }
  0x8c   :  { %p5351_p1 = pnand %p5350_p0, %p5346_p11 }
  0x8e   :  { %5354 = shalt.err (!%p5351_p1)
}
  0x8f   :  { %s5662_s11 = smov 256   ;;  %s5663_s3 = smov 16  }
  0x90   :  { %216 = dma.hbm_to_vmem [thread:$0]  %s5929_s16, 8192, %s211_s12, [#allocation13], %s5662_s11, %s5662_s11, %s5663_s3  }
  0x91   :  { %5595 = dma.done.wait [#allocation3], 4096  }
  0x92   :  { %5596 = vsyncadd [#allocation3], 4294963200 }
  0x93   :  { %5597 = dma.done.wait [#allocation7], 8192  }
  0x94   :  { %5598 = vsyncadd [#allocation7], 4294959104 }
  0x95   :  { %5599 = dma.done.wait [#allocation10], 8192  }
  0x96   :  { %5600 = vsyncadd [#allocation10], 4294959104 }
  0x97   :  { %5601 = dma.done.wait [#allocation13], 8192  }
  0x98   :  { %5602 = vsyncadd [#allocation13], 4294959104  ;;  %v3640_v0 = vld [vmem:[%s5721_s25 + $0x70] sm:$0xf]  ;;  %v4805_v1 = vld [vmem:[%s5721_s25 + $0x74] sm:$0xf0] }
  0x99   :  { %v3704_v2 = vld [vmem:[%s5721_s25 + $0xf0] sm:$0xf]  ;;  %v3641_v3 = vor.u32 %v4805_v1, %v3640_v0  ;;  %v4821_v4 = vld [vmem:[%s5721_s25 + $0xf4] sm:$0xf0]  ;;  %v4804_v5 = vld [vmem:[%s5721_s25 + $0x74] sm:$0xf] }
  0x9a   :  { %v3642_v6 = vld [vmem:[%s5721_s25 + $0x78] sm:$0xf0]  ;;  %v3705_v7 = vor.u32 %v4821_v4, %v3704_v2  ;;  %v4820_v9 = vld [vmem:[%s5721_s25 + $0xf4] sm:$0xf]  ;;  %v3632_v11 = vld [vmem:[%s5721_s25 + $0x60] sm:$0xf] }
  0x9b   :  { %v3645_v8 = vor.u32 %v4804_v5, %v3642_v6  ;;  %v3706_v10 = vld [vmem:[%s5721_s25 + $0xf8] sm:$0xf0]  ;;  %446 = vmatpush.bf16.msra.mxu0 %v3641_v3  ;;  %v4803_v13 = vld [vmem:[%s5721_s25 + $0x64] sm:$0xf0]  ;;  %v3696_v14 = vld [vmem:[%s5721_s25 + $0xe0] sm:$0xf] }
  0x9c   :  { %v3709_v12 = vor.u32 %v4820_v9, %v3706_v10  ;;  %v4819_v15 = vld [vmem:[%s5721_s25 + $0xe4] sm:$0xf0]  ;;  %459 = vmatpush.bf16.msra.mxu1 %v3705_v7  ;;  %v3633_v16 = vor.u32 %v4803_v13, %v3632_v11  ;;  %v4802_v18 = vld [vmem:[%s5721_s25 + $0x64] sm:$0xf]  ;;  %v3634_v19 = vld [vmem:[%s5721_s25 + $0x68] sm:$0xf0] }
  0x9d   :  { %472 = vmatpush.bf16.msra.mxu2 %v3645_v8  ;;  %v3697_v17 = vor.u32 %v4819_v15, %v3696_v14  ;;  %v4818_v20 = vld [vmem:[%s5721_s25 + $0xe4] sm:$0xf]  ;;  %v3637_v21 = vor.u32 %v4802_v18, %v3634_v19  ;;  %v3698_v22 = vld [vmem:[%s5721_s25 + $0xe8] sm:$0xf0]  ;;  %v3624_v23 = vld [vmem:[%s5721_s25 + $0x50] sm:$0xf] }
  0x9e   :  { %485 = vmatpush.bf16.msra.mxu3 %v3709_v12  ;;  %v4801_v24 = vld [vmem:[%s5721_s25 + $0x54] sm:$0xf0]  ;;  %v3701_v25 = vor.u32 %v4818_v20, %v3698_v22  ;;  %v3688_v26 = vld [vmem:[%s5721_s25 + $0xd0] sm:$0xf]  ;;  %v4800_v28 = vld [vmem:[%s5721_s25 + $0x54] sm:$0xf] }
  0x9f   :  { %v4817_v27 = vld [vmem:[%s5721_s25 + $0xd4] sm:$0xf0]  ;;  %447 = vmatpush.bf16.msra.mxu0 %v3633_v16  ;;  %v3625_v29 = vor.u32 %v4801_v24, %v3624_v23  ;;  %v3626_v30 = vld [vmem:[%s5721_s25 + $0x58] sm:$0xf0]  ;;  %v4816_v31 = vld [vmem:[%s5721_s25 + $0xd4] sm:$0xf] }
  0xa0   :  { %v3690_v32 = vld [vmem:[%s5721_s25 + $0xd8] sm:$0xf0]  ;;  %460 = vmatpush.bf16.msra.mxu1 %v3697_v17  ;;  %v3689_v33 = vor.u32 %v4817_v27, %v3688_v26  ;;  %v3629_v34 = vor.u32 %v4800_v28, %v3626_v30  ;;  %v3616_v35 = vld [vmem:[%s5721_s25 + $0x40] sm:$0xf]  ;;  %v4799_v36 = vld [vmem:[%s5721_s25 + $0x44] sm:$0xf0] }
  0xa1   :  { %473 = vmatpush.bf16.msra.mxu2 %v3637_v21  ;;  %v3680_v37 = vld [vmem:[%s5721_s25 + $0xc0] sm:$0xf]  ;;  %v3693_v38 = vor.u32 %v4816_v31, %v3690_v32  ;;  %v4815_v39 = vld [vmem:[%s5721_s25 + $0xc4] sm:$0xf0]  ;;  %v4798_v40 = vld [vmem:[%s5721_s25 + $0x44] sm:$0xf]  ;;  %v3617_v44 = vor.u32 %v4799_v36, %v3616_v35 }
  0xa2   :  { %486 = vmatpush.bf16.msra.mxu3 %v3701_v25  ;;  %v3618_v41 = vld [vmem:[%s5721_s25 + $0x48] sm:$0xf0]  ;;  %v4814_v42 = vld [vmem:[%s5721_s25 + $0xc4] sm:$0xf]  ;;  %v3681_v45 = vor.u32 %v4815_v39, %v3680_v37  ;;  %v3608_v47 = vld [vmem:[%s5721_s25 + $0x30] sm:$0xf] }
  0xa3   :  { %v3682_v43 = vld [vmem:[%s5721_s25 + $0xc8] sm:$0xf0]  ;;  %448 = vmatpush.bf16.msra.mxu0 %v3625_v29  ;;  %v3621_v46 = vor.u32 %v4798_v40, %v3618_v41  ;;  %v4797_v48 = vld [vmem:[%s5721_s25 + $0x34] sm:$0xf0]  ;;  %v3672_v49 = vld [vmem:[%s5721_s25 + $0xb0] sm:$0xf] }
  0xa4   :  { %461 = vmatpush.bf16.msra.mxu1 %v3689_v33  ;;  %v3685_v50 = vor.u32 %v4814_v42, %v3682_v43  ;;  %v4813_v51 = vld [vmem:[%s5721_s25 + $0xb4] sm:$0xf0]  ;;  %v4796_v52 = vld [vmem:[%s5721_s25 + $0x34] sm:$0xf]  ;;  %v3610_v53 = vld [vmem:[%s5721_s25 + $0x38] sm:$0xf0]  ;;  %v3609_v56 = vor.u32 %v4797_v48, %v3608_v47 }
  0xa5   :  { %474 = vmatpush.bf16.msra.mxu2 %v3629_v34  ;;  %v4812_v54 = vld [vmem:[%s5721_s25 + $0xb4] sm:$0xf]  ;;  %v3674_v55 = vld [vmem:[%s5721_s25 + $0xb8] sm:$0xf0]  ;;  %v3673_v57 = vor.u32 %v4813_v51, %v3672_v49  ;;  %v3613_v58 = vor.u32 %v4796_v52, %v3610_v53  ;;  %v3600_v59 = vld [vmem:[%s5721_s25 + $0x20] sm:$0xf] }
  0xa6   :  { %487 = vmatpush.bf16.msra.mxu3 %v3693_v38  ;;  %v4795_v60 = vld [vmem:[%s5721_s25 + $0x24] sm:$0xf0]  ;;  %v3664_v61 = vld [vmem:[%s5721_s25 + $0xa0] sm:$0xf]  ;;  %v3677_v62 = vor.u32 %v4812_v54, %v3674_v55  ;;  %v4794_v0 = vld [vmem:[%s5721_s25 + $0x24] sm:$0xf] }
  0xa7   :  { %449 = vmatpush.bf16.msra.mxu0 %v3617_v44  ;;  %v4811_v63 = vld [vmem:[%s5721_s25 + $0xa4] sm:$0xf0]  ;;  %v3602_v1 = vld [vmem:[%s5721_s25 + $0x28] sm:$0xf0]  ;;  %v4810_v2 = vld [vmem:[%s5721_s25 + $0xa4] sm:$0xf]  ;;  %v3601_v4 = vor.u32 %v4795_v60, %v3600_v59 }
  0xa8   :  { %462 = vmatpush.bf16.msra.mxu1 %v3681_v45  ;;  %v3666_v3 = vld [vmem:[%s5721_s25 + $0xa8] sm:$0xf0]  ;;  %v3665_v5 = vor.u32 %v4811_v63, %v3664_v61  ;;  %v3605_v6 = vor.u32 %v4794_v0, %v3602_v1  ;;  %v3592_v7 = vld [vmem:[%s5721_s25 + $0x10] sm:$0xf]  ;;  %v4793_v8 = vld [vmem:[%s5721_s25 + $0x14] sm:$0xf0] }
  0xa9   :  { %475 = vmatpush.bf16.msra.mxu2 %v3621_v46  ;;  %v3656_v9 = vld [vmem:[%s5721_s25 + $0x90] sm:$0xf]  ;;  %v3669_v10 = vor.u32 %v4810_v2, %v3666_v3  ;;  %v4809_v11 = vld [vmem:[%s5721_s25 + $0x94] sm:$0xf0]  ;;  %v4792_v12 = vld [vmem:[%s5721_s25 + $0x14] sm:$0xf]  ;;  %v3593_v16 = vor.u32 %v4793_v8, %v3592_v7 }
  0xaa   :  { %488 = vmatpush.bf16.msra.mxu3 %v3685_v50  ;;  %v3594_v13 = vld [vmem:[%s5721_s25 + $0x18] sm:$0xf0]  ;;  %v4808_v14 = vld [vmem:[%s5721_s25 + $0x94] sm:$0xf]  ;;  %v3584_v17 = vld [vmem:[%s5721_s25] sm:$0xf]  ;;  %v3657_v18 = vor.u32 %v4809_v11, %v3656_v9 }
  0xab   :  { %450 = vmatpush.bf16.msra.mxu0 %v3609_v56  ;;  %v3658_v15 = vld [vmem:[%s5721_s25 + $0x98] sm:$0xf0]  ;;  %v3597_v19 = vor.u32 %v4792_v12, %v3594_v13  ;;  %v4791_v20 = vld [vmem:[%s5721_s25 + $0x4] sm:$0xf0]  ;;  %v3648_v21 = vld [vmem:[%s5721_s25 + $0x80] sm:$0xf] }
  0xac   :  { %463 = vmatpush.bf16.msra.mxu1 %v3673_v57  ;;  %v4807_v22 = vld [vmem:[%s5721_s25 + $0x84] sm:$0xf0]  ;;  %v3661_v23 = vor.u32 %v4808_v14, %v3658_v15  ;;  %v4790_v24 = vld [vmem:[%s5721_s25 + $0x4] sm:$0xf]  ;;  %v3586_v25 = vld [vmem:[%s5721_s25 + $0x8] sm:$0xf0]  ;;  %v3585_v30 = vor.u32 %v4791_v20, %v3584_v17 }
  0xad   :  { %476 = vmatpush.bf16.msra.mxu2 %v3613_v58  ;;  %v4806_v26 = vld [vmem:[%s5721_s25 + $0x84] sm:$0xf]  ;;  %v3650_v27 = vld [vmem:[%s5721_s25 + $0x88] sm:$0xf0]  ;;  %v3768_v28 = vld [vmem:[#allocation2 + $0x70] sm:$0xf]  ;;  %v3649_v34 = vor.u32 %v4807_v22, %v3648_v21  ;;  %v3589_v35 = vor.u32 %v4790_v24, %v3586_v25 }
  0xae   :  { %489 = vmatpush.bf16.msra.mxu3 %v3677_v62  ;;  %v4837_v29 = vld [vmem:[#allocation2 + $0x74] sm:$0xf0]  ;;  %v244_v31 = vld [vmem:[%s5696_s5] sm:$0xff]  ;;  %v4836_v32 = vld [vmem:[#allocation2 + $0x74] sm:$0xf]  ;;  %v3653_v37 = vor.u32 %v4806_v26, %v3650_v27  ;;  %vm922_vm4 = vcmask 785408  }
  0xaf   :  { %451 = vmatpush.bf16.msra.mxu0 %v3601_v4  ;;  %v3770_v33 = vld [vmem:[#allocation2 + $0x78] sm:$0xf0]  ;;  %v245_v36 = vld [vmem:[%s5696_s5 + $0x8] sm:$0xff]  ;;  %v3769_v38 = vor.u32 %v4837_v29, %v3768_v28  ;;  %v3760_v39 = vld [vmem:[#allocation2 + $0x60] sm:$0xf]  ;;  %v246_v42 = vpack.c.bf16 %v244_v31, %v244_v31  ;;  %vm925_vm5 = vcmask 130048  }
  0xb0   :  { %464 = vmatpush.bf16.msra.mxu1 %v3665_v5  ;;  %v3832_v40 = vld [vmem:[#allocation2 + $0xf0] sm:$0xf]  ;;  %v4853_v41 = vld [vmem:[#allocation2 + $0xf4] sm:$0xf0]  ;;  %v3773_v43 = vor.u32 %v4836_v32, %v3770_v33  ;;  %v4835_v44 = vld [vmem:[#allocation2 + $0x64] sm:$0xf0]  ;;  %v247_v47 = vpack.c.bf16 %v245_v36, %v245_v36 }
  0xb1   :  { %477 = vmatpush.bf16.msra.mxu2 %v3605_v6  ;;  %v4852_v45 = vld [vmem:[#allocation2 + $0xf4] sm:$0xf]  ;;  %v3834_v46 = vld [vmem:[#allocation2 + $0xf8] sm:$0xf0]  ;;  %v4834_v48 = vld [vmem:[#allocation2 + $0x64] sm:$0xf]  ;;  %v3833_v50 = vor.u32 %v4853_v41, %v3832_v40  ;;  %v3761_v51 = vor.u32 %v4835_v44, %v3760_v39 }
  0xb2   :  { %490 = vmatpush.bf16.msra.mxu3 %v3669_v10  ;;  %v3762_v49 = vld [vmem:[#allocation2 + $0x68] sm:$0xf0]  ;;  %v3837_v52 = vor.u32 %v4852_v45, %v3834_v46  ;;  %v3752_v53 = vld [vmem:[#allocation2 + $0x50] sm:$0xf]  ;;  %v3824_v54 = vld [vmem:[#allocation2 + $0xe0] sm:$0xf] }
  0xb3   :  { %452 = vmatpush.bf16.msra.mxu0 %v3593_v16  ;;  %v4851_v55 = vld [vmem:[#allocation2 + $0xe4] sm:$0xf0]  ;;  %v3765_v56 = vor.u32 %v4834_v48, %v3762_v49  ;;  %v4833_v57 = vld [vmem:[#allocation2 + $0x54] sm:$0xf0]  ;;  %v4850_v58 = vld [vmem:[#allocation2 + $0xe4] sm:$0xf] }
  0xb4   :  { %465 = vmatpush.bf16.msra.mxu1 %v3657_v18  ;;  %v3826_v59 = vld [vmem:[#allocation2 + $0xe8] sm:$0xf0]  ;;  %v4832_v60 = vld [vmem:[#allocation2 + $0x54] sm:$0xf]  ;;  %v3754_v61 = vld [vmem:[#allocation2 + $0x58] sm:$0xf0]  ;;  %v3825_v62 = vor.u32 %v4851_v55, %v3824_v54  ;;  %v3753_v63 = vor.u32 %v4833_v57, %v3752_v53 }
  0xb5   :  { %478 = vmatpush.bf16.msra.mxu2 %v3597_v19  ;;  %v3829_v0 = vor.u32 %v4850_v58, %v3826_v59  ;;  %v3744_v1 = vld [vmem:[#allocation2 + $0x40] sm:$0xf]  ;;  %v3816_v2 = vld [vmem:[#allocation2 + $0xd0] sm:$0xf]  ;;  %v4849_v3 = vld [vmem:[#allocation2 + $0xd4] sm:$0xf0]  ;;  %v3757_v4 = vor.u32 %v4832_v60, %v3754_v61 }
  0xb6   :  { %491 = vmatpush.bf16.msra.mxu3 %v3661_v23  ;;  %v4831_v5 = vld [vmem:[#allocation2 + $0x44] sm:$0xf0]  ;;  %v4848_v6 = vld [vmem:[#allocation2 + $0xd4] sm:$0xf]  ;;  %v3818_v7 = vld [vmem:[#allocation2 + $0xd8] sm:$0xf0]  ;;  %v3817_v10 = vor.u32 %v4849_v3, %v3816_v2 }
  0xb7   :  { %453 = vmatpush.bf16.msra.mxu0 %v3585_v30  ;;  %v4830_v8 = vld [vmem:[#allocation2 + $0x44] sm:$0xf]  ;;  %v3746_v9 = vld [vmem:[#allocation2 + $0x48] sm:$0xf0]  ;;  %v3745_v11 = vor.u32 %v4831_v5, %v3744_v1  ;;  %v3821_v12 = vor.u32 %v4848_v6, %v3818_v7  ;;  %v3736_v13 = vld [vmem:[#allocation2 + $0x30] sm:$0xf] }
  0xb8   :  { %466 = vmatpush.bf16.msra.mxu1 %v3649_v34  ;;  %v3808_v14 = vld [vmem:[#allocation2 + $0xc0] sm:$0xf]  ;;  %v4847_v15 = vld [vmem:[#allocation2 + $0xc4] sm:$0xf0]  ;;  %v3749_v16 = vor.u32 %v4830_v8, %v3746_v9  ;;  %v4829_v17 = vld [vmem:[#allocation2 + $0x34] sm:$0xf0] }
  0xb9   :  { %479 = vmatpush.bf16.msra.mxu2 %v3589_v35  ;;  %v4846_v18 = vld [vmem:[#allocation2 + $0xc4] sm:$0xf]  ;;  %v3810_v19 = vld [vmem:[#allocation2 + $0xc8] sm:$0xf0]  ;;  %v4828_v20 = vld [vmem:[#allocation2 + $0x34] sm:$0xf]  ;;  %v3809_v22 = vor.u32 %v4847_v15, %v3808_v14  ;;  %v3737_v23 = vor.u32 %v4829_v17, %v3736_v13 }
  0xba   :  { %492 = vmatpush.bf16.msra.mxu3 %v3653_v37  ;;  %454 = vmatmul.bf16.vlgmr.msra.gmra.mxu0 %v246_v42  ;;  %v3738_v21 = vld [vmem:[#allocation2 + $0x38] sm:$0xf0]  ;;  %v3813_v24 = vor.u32 %v4846_v18, %v3810_v19  ;;  %v3728_v26 = vld [vmem:[#allocation2 + $0x20] sm:$0xf]  ;;  %v4827_v27 = vld [vmem:[#allocation2 + $0x24] sm:$0xf0] }
  0xbb   :  { %704 = vmatpush.bf16.msrb.mxu0 %v3769_v38  ;;  %467 = vmatmul.bf16.vlgmr.msra.gmra.mxu1 %v247_v47  ;;  %v3741_v25 = vor.u32 %v4828_v20, %v3738_v21  ;;  %v4826_v28 = vld [vmem:[#allocation2 + $0x24] sm:$0xf]  ;;  %v3730_v29 = vld [vmem:[#allocation2 + $0x28] sm:$0xf0]  ;;  %v3729_v30 = vor.u32 %v4827_v27, %v3728_v26  ;;  %v3800_v32 = vld [vmem:[#allocation2 + $0xb0] sm:$0xf] }
  0xbc   :  { %480 = vmatmul.bf16.vlgmr.msra.gmra.mxu2 %v246_v42  ;;  %717 = vmatpush.bf16.msrb.mxu1 %v3833_v50  ;;  %v3733_v31 = vor.u32 %v4826_v28, %v3730_v29  ;;  %v4845_v33 = vld [vmem:[#allocation2 + $0xb4] sm:$0xf0]  ;;  %v4844_v34 = vld [vmem:[#allocation2 + $0xb4] sm:$0xf]  ;;  %v3802_v36 = vld [vmem:[#allocation2 + $0xb8] sm:$0xf0] }
  0xbd   :  { %730 = vmatpush.bf16.msrb.mxu2 %v3773_v43  ;;  %493 = vmatmul.bf16.vlgmr.msra.gmra.mxu3 %v247_v47  ;;  %v3801_v35 = vor.u32 %v4845_v33, %v3800_v32  ;;  %v3805_v37 = vor.u32 %v4844_v34, %v3802_v36  ;;  %v3720_v38 = vld [vmem:[#allocation2 + $0x10] sm:$0xf]  ;;  %v4825_v39 = vld [vmem:[#allocation2 + $0x14] sm:$0xf0]  ;;  %v4824_v40 = vld [vmem:[#allocation2 + $0x14] sm:$0xf] }
  0xbe   :  { %743 = vmatpush.bf16.msrb.mxu3 %v3837_v52  ;;  %v3721_v41 = vor.u32 %v4825_v39, %v3720_v38  ;;  %v3722_v42 = vld [vmem:[#allocation2 + $0x18] sm:$0xf0]  ;;  %v3792_v44 = vld [vmem:[#allocation2 + $0xa0] sm:$0xf]  ;;  %v4843_v45 = vld [vmem:[#allocation2 + $0xa4] sm:$0xf0] }
  0xbf   :  { %705 = vmatpush.bf16.msrb.mxu0 %v3761_v51  ;;  %v3725_v43 = vor.u32 %v4824_v40, %v3722_v42  ;;  %v4842_v46 = vld [vmem:[#allocation2 + $0xa4] sm:$0xf]  ;;  %v3793_v47 = vor.u32 %v4843_v45, %v3792_v44  ;;  %v3794_v48 = vld [vmem:[#allocation2 + $0xa8] sm:$0xf0]  ;;  %v3712_v50 = vld [vmem:[#allocation2] sm:$0xf] }
  0xc0   :  { %718 = vmatpush.bf16.msrb.mxu1 %v3825_v62  ;;  %v3797_v49 = vor.u32 %v4842_v46, %v3794_v48  ;;  %v4823_v51 = vld [vmem:[#allocation2 + $0x4] sm:$0xf0]  ;;  %v4822_v52 = vld [vmem:[#allocation2 + $0x4] sm:$0xf]  ;;  %v3714_v54 = vld [vmem:[#allocation2 + $0x8] sm:$0xf0] }
  0xc1   :  { %731 = vmatpush.bf16.msrb.mxu2 %v3765_v56  ;;  %v3713_v53 = vor.u32 %v4823_v51, %v3712_v50  ;;  %v3717_v55 = vor.u32 %v4822_v52, %v3714_v54  ;;  %v3784_v56 = vld [vmem:[#allocation2 + $0x90] sm:$0xf]  ;;  %v4841_v57 = vld [vmem:[#allocation2 + $0x94] sm:$0xf0]  ;;  %v4840_v58 = vld [vmem:[#allocation2 + $0x94] sm:$0xf] }
  0xc2   :  { %744 = vmatpush.bf16.msrb.mxu3 %v3829_v0  ;;  %v3785_v59 = vor.u32 %v4841_v57, %v3784_v56  ;;  %v3786_v60 = vld [vmem:[#allocation2 + $0x98] sm:$0xf0]  ;;  %v3776_v62 = vld [vmem:[#allocation2 + $0x80] sm:$0xf]  ;;  %v4838_v0 = vld [vmem:[#allocation2 + $0x84] sm:$0xf] }
  0xc3   :  { %706 = vmatpush.bf16.msrb.mxu0 %v3753_v63  ;;  %v3789_v61 = vor.u32 %v4840_v58, %v3786_v60  ;;  %v4839_v63 = vld [vmem:[#allocation2 + $0x84] sm:$0xf0]  ;;  %v3778_v2 = vld [vmem:[#allocation2 + $0x88] sm:$0xf0]  ;;  %v4869_v5 = vld [vmem:[%s5741_s14 + $0x78] sm:$0xff]  ;;  %s5664_s25 = smov 80  }
  0xc4   :  { %719 = vmatpush.bf16.msrb.mxu1 %v3817_v10  ;;  %v3777_v1 = vor.u32 %v4839_v63, %v3776_v62  ;;  %v3781_v3 = vor.u32 %v4838_v0, %v3778_v2  ;;  %v4860_v6 = vld [vmem:[%s5741_s14 + $0x30] sm:$0xff]  ;;  %v4859_v8 = vld [vmem:[%s5741_s14 + $0x28] sm:$0xff]  ;;  %v280_v10 = vld [vmem:[%s5726_s29] sm:$0x3]  ;;  %s5665_s29 = smov 112   ;;  %vm936_vm6 = vcmask 261120  }
  0xc5   :  { %732 = vmatpush.bf16.msrb.mxu2 %v3757_v4  ;;  %v4861_v4 = vld [vmem:[%s5741_s14 + $0x38] sm:$0xff]  ;;  %v4868_v7 = vld [vmem:[%s5741_s14 + $0x70] sm:$0xff]  ;;  %v4867_v9 = vld [vmem:[%s5741_s14 + $0x68] sm:$0xff]  ;;  %v283_v18 = vperm.slane %v280_v10, 1  ;;  %vm1012_vm7 = vcmask 392192   ;;  %s6352_s30 = sld [smem:[#allocation44_spill]] }
  0xc6   :  { %745 = vmatpush.bf16.msrb.mxu3 %v3821_v12  ;;  %v282_v12 = vperm.slane %v280_v10, 0  ;;  %v4857_v13 = vld [vmem:[%s5741_s14 + $0x18] sm:$0xff]  ;;  %v4866_v33 = vld [vmem:[%s5741_s14 + $0x60] sm:$0xff]  ;;  %v4856_v34 = vld [vmem:[%s5741_s14 + $0x10] sm:$0xff]  ;;  %s6354_s7 = sld [smem:[#allocation43_spill]]  ;;  %vm1466_vm14 = vcmask 64512  }
  0xc7   :  { %707 = vmatpush.bf16.msrb.mxu0 %v3745_v11  ;;  %v4858_v11 = vld [vmem:[%s5741_s14 + $0x20] sm:$0xff]  ;;  %v4855_v36 = vld [vmem:[%s5741_s14 + $0x8] sm:$0xff]  ;;  %s6355_s10 = sld [smem:[#allocation47_spill]]  ;;  %s5668_s1 = smov 32  }
  0xc8   :  { %720 = vmatpush.bf16.msrb.mxu1 %v3809_v22  ;;  %v4854_v38 = vld [vmem:[%s5741_s14] sm:$0xff]  ;;  %v4863_v39 = vld [vmem:[%s5741_s14 + $0x48] sm:$0xff]  ;;  %s6356_s15 = sld [smem:[#allocation50_spill]]  ;;  %s5669_s22 = smov 96  }
  0xc9   :  { %733 = vmatpush.bf16.msrb.mxu2 %v3749_v16  ;;  %v4862_v40 = vld [vmem:[%s5741_s14 + $0x40] sm:$0xff]  ;;  %s6357_s6 = sld [smem:[#allocation45_spill]]  ;;  %s5670_s20 = smov 48  }
  0xca   :  { %746 = vmatpush.bf16.msrb.mxu3 %v3813_v24  ;;  %v5175_v63 = vld [vmem:[%s5746_s19] ss:$0 sm:$0xff]  ;;  %s6350_s19 = sld [smem:[#allocation39_spill]]  ;;  %s5671_s11 = smov 126  }
  0xcb   :  { %708 = vmatpush.bf16.msrb.mxu0 %v3737_v23  ;;  %s6358_s18 = sld [smem:[#allocation48_spill]] }
  0xcc   :  { %721 = vmatpush.bf16.msrb.mxu1 %v3801_v35  ;;  %v4865_v35 = vld [vmem:[%s5741_s14 + $0x58] sm:$0xff]  ;;  %s6359_s16 = sld [smem:[#allocation41_spill]] }
  0xcd   :  { %734 = vmatpush.bf16.msrb.mxu2 %v3741_v25  ;;  %s6360_s23 = sld [smem:[#allocation38_spill]] }
  0xce   :  { %747 = vmatpush.bf16.msrb.mxu3 %v3805_v37  ;;  %v4864_v37 = vld [vmem:[%s5741_s14 + $0x50] sm:$0xff]  ;;  %s6349_s14 = sld [smem:[#allocation40_spill]] }
  0xcf   :  { %709 = vmatpush.bf16.msrb.mxu0 %v3729_v30  ;;  %s6361_s26 = sld [smem:[#allocation49_spill]] }
  0xd0   :  { %722 = vmatpush.bf16.msrb.mxu1 %v3793_v47  ;;  %s6362_s21 = sld [smem:[#allocation51_spill]] }
  0xd1   :  { %735 = vmatpush.bf16.msrb.mxu2 %v3733_v31  ;;  %s6364_s28 = sld [smem:[#allocation53_spill]] }
  0xd2   :  { %748 = vmatpush.bf16.msrb.mxu3 %v3797_v49 }
  0xd3   :  { %710 = vmatpush.bf16.msrb.mxu0 %v3721_v41  ;;  %v538_v41 = vld [vmem:[%s5736_s8] sm:$0x3]  ;;  %s5666_s8 = smov 64  }
  0xd4   :  { %723 = vmatpush.bf16.msrb.mxu1 %v3785_v59  ;;  %v541_v48 = vperm.slane %v538_v41, 1 }
  0xd5   :  { %736 = vmatpush.bf16.msrb.mxu2 %v3725_v43  ;;  %v540_v43 = vperm.slane %v538_v41, 0  ;;  %v4907_v41 = vld [vmem:[#allocation6 + $0xf4] sm:$0xf0] }
  0xd6   :  { %749 = vmatpush.bf16.msrb.mxu3 %v3789_v61 }
  0xd7   :  { %711 = vmatpush.bf16.msrb.mxu0 %v3713_v53 }
  0xd8   :  { %724 = vmatpush.bf16.msrb.mxu1 %v3777_v1 }
  0xd9   :  { %737 = vmatpush.bf16.msrb.mxu2 %v3717_v55 }
  0xda   :  { %750 = vmatpush.bf16.msrb.mxu3 %v3781_v3 }
  0xdb   :  { %896 = vmatpush.bf16.msra.mxu0 %v4861_v4 }
  0xdc   :  { %909 = vmatpush.bf16.msra.mxu1 %v4869_v5 }
  0xdf   :  { %897 = vmatpush.bf16.msra.mxu0 %v4860_v6 }
  0xe0   :  { %910 = vmatpush.bf16.msra.mxu1 %v4868_v7 }
  0xe3   :  { %898 = vmatpush.bf16.msra.mxu0 %v4859_v8 }
  0xe4   :  { %911 = vmatpush.bf16.msra.mxu1 %v4867_v9 }
  0xe7   :  { %899 = vmatpush.bf16.msra.mxu0 %v4858_v11  ;;  %v3920_v11 = vld [vmem:[%s5751_s24 + $0x20] sm:$0xf] }
  0xe8   :  { %912 = vmatpush.bf16.msra.mxu1 %v4866_v33  ;;  %v4870_v33 = vld [vmem:[%s5751_s24 + $0x4] sm:$0xf] }
  0xeb   :  { %900 = vmatpush.bf16.msra.mxu0 %v4857_v13  ;;  %v4874_v13 = vld [vmem:[%s5751_s24 + $0x24] sm:$0xf] }
  0xec   :  { %913 = vmatpush.bf16.msra.mxu1 %v4865_v35  ;;  %v3906_v35 = vld [vmem:[%s5751_s24 + $0x8] sm:$0xf0] }
  0xef   :  { %901 = vmatpush.bf16.msra.mxu0 %v4856_v34 }
  0xf0   :  { %914 = vmatpush.bf16.msra.mxu1 %v4864_v37  ;;  %v3986_v37 = vld [vmem:[#allocation6 + $0x70] sm:$0xf] }
  0xf3   :  { %902 = vmatpush.bf16.msra.mxu0 %v4855_v36  ;;  %v3909_v36 = vor.u32 %v4870_v33, %v3906_v35  ;;  %v4899_v33 = vld [vmem:[#allocation6 + $0xb4] sm:$0xf0]  ;;  %v3956_v35 = vld [vmem:[#allocation6 + $0x38] sm:$0xf0] }
  0xf4   :  { %915 = vmatpush.bf16.msra.mxu1 %v4863_v39  ;;  %v4050_v39 = vld [vmem:[#allocation6 + $0xf0] sm:$0xf] }
  0xf7   :  { %903 = vmatpush.bf16.msra.mxu0 %v4854_v38  ;;  %v4891_v38 = vld [vmem:[#allocation6 + $0x74] sm:$0xf0] }
  0xf8   :  { %916 = vmatpush.bf16.msra.mxu1 %v4862_v40  ;;  %v3987_v40 = vor.u32 %v4891_v38, %v3986_v37  ;;  %v4898_v38 = vld [vmem:[#allocation6 + $0xb4] sm:$0xf] }
 0x137   :  { %v455_v14 = vpop.f32.mrf.mxu0 }
 0x138   :  { %v456_v15 = vadd.f32 %v455_v14, %v282_v12  ;;  %v468_v16 = vpop.f32.mrf.mxu1  ;;  %v4875_v12 = vld [vmem:[%s5751_s24 + $0x24] sm:$0xf0] }
 0x139   :  { %v3921_v14 = vor.u32 %v4875_v12, %v3920_v11 }
 0x13a   :  { %v469_v17 = vadd.f32 %v468_v16, %v456_v15  ;;  %v3922_v15 = vld [vmem:[%s5751_s24 + $0x28] sm:$0xf0]  ;;  %v3912_v16 = vld [vmem:[%s5751_s24 + $0x10] sm:$0xf] }
 0x13b   :  { %1021 = vmatpush.bf16.msra.mxu2 %v3921_v14  ;;  %v4036_v14 = vld [vmem:[#allocation6 + $0xd8] sm:$0xf0] }
 0x13c   :  { %vm498_vm0 = vcmp.gt.f32.partialorder %v469_v17, 0.0  ;;  %v500_v19 = vmul.f32 0.01, %v469_v17 }
 0x13e   :  { %v502_v21 = vsel %vm498_vm0, %v469_v17, %v500_v19  ;;  %v4873_v17 = vld [vmem:[%s5751_s24 + $0x14] sm:$0xf0]  ;;  %v4872_v19 = vld [vmem:[%s5751_s24 + $0x14] sm:$0xf] }
 0x13f   :  { %v481_v20 = vpop.f32.mrf.mxu2  ;;  %v457_v24 = vpop.f32.mrf.mxu0  ;;  %v504_v25 = vpack.c.bf16 %v502_v21, %v502_v21  ;;  %v3913_v21 = vor.u32 %v4873_v17, %v3912_v16  ;;  %v4885_v17 = vld [vmem:[#allocation6 + $0x44] sm:$0xf0] }
 0x140   :  { %v482_v22 = vadd.f32 %v481_v20, %v283_v18  ;;  %v494_v23 = vpop.f32.mrf.mxu3  ;;  %v470_v26 = vpop.f32.mrf.mxu1  ;;  %v3925_v18 = vor.u32 %v4874_v13, %v3922_v15  ;;  %v3914_v20 = vld [vmem:[%s5751_s24 + $0x18] sm:$0xf0]  ;;  %v4902_v13 = vld [vmem:[#allocation6 + $0xd4] sm:$0xf]  ;;  %v3962_v15 = vld [vmem:[#allocation6 + $0x40] sm:$0xf] }
 0x141   :  { %712 = vmatmul.bf16.vlgmr.msrb.gmra.mxu0 %v504_v25  ;;  %738 = vmatmul.bf16.vlgmr.msrb.gmra.mxu2 %v504_v25  ;;  %v942_v26 = vld [vmem:[%s6350_s19] sm:$0xff]  ;;  %v4039_v16 = vor.u32 %v4902_v13, %v4036_v14  ;;  %v3996_v13 = vld [vmem:[#allocation6 + $0x88] sm:$0xf0]  ;;  %s5677_s19 = smov 121  }
 0x142   :  { %v495_v27 = vadd.f32 %v494_v23, %v482_v22  ;;  %1034 = vmatpush.bf16.msra.mxu3 %v3925_v18  ;;  %v3917_v22 = vor.u32 %v4872_v19, %v3914_v20  ;;  %1022 = vmatpush.bf16.msra.mxu2 %v3913_v21  ;;  %v952_v23 = vld [vmem:[%s6349_s14] sm:$0xff]  ;;  %v4901_v19 = vld [vmem:[#allocation6 + $0xc4] sm:$0xf0]  ;;  %v3963_v20 = vor.u32 %v4885_v17, %v3962_v15  ;;  %s5676_s14 = smov 124  }
 0x143   :  { %v4026_v18 = vld [vmem:[#allocation6 + $0xc0] sm:$0xf] }
 0x144   :  { %vm499_vm1 = vcmp.gt.f32.partialorder %v495_v27, 0.0  ;;  %v501_v28 = vmul.f32 0.01, %v495_v27  ;;  %v4027_v21 = vor.u32 %v4901_v19, %v4026_v18 }
 0x146   :  { %v503_v29 = vsel %vm499_vm1, %v495_v27, %v501_v28  ;;  %1035 = vmatpush.bf16.msra.mxu3 %v3917_v22  ;;  %v4884_v22 = vld [vmem:[#allocation6 + $0x44] sm:$0xf] }
 0x147   :  { %v483_v30 = vpop.f32.mrf.mxu2  ;;  %v505_v31 = vpack.c.bf16 %v503_v29, %v503_v29 }
 0x148   :  { %v496_v32 = vpop.f32.mrf.mxu3 }
 0x149   :  { %725 = vmatmul.bf16.vlgmr.msrb.gmra.mxu1 %v505_v31  ;;  %751 = vmatmul.bf16.vlgmr.msrb.gmra.mxu3 %v505_v31  ;;  %v3904_v31 = vld [vmem:[%s5751_s24] sm:$0xf]  ;;  %v4871_v32 = vld [vmem:[%s5751_s24 + $0x4] sm:$0xf0]  ;;  %s6351_s24 = sld [smem:[#allocation46_spill]] }
 0x14a   :  { %v3905_v34 = vor.u32 %v4871_v32, %v3904_v31  ;;  %1036 = vmatpush.bf16.msra.mxu3 %v3909_v36  ;;  %v4018_v31 = vld [vmem:[#allocation6 + $0xb0] sm:$0xf] }
 0x14b   :  { %v4019_v36 = vor.u32 %v4899_v33, %v4018_v31  ;;  %v4915_v31 = vld [vmem:[%s6352_s30 + $0x38] sm:$0xff]  ;;  %v4922_v33 = vld [vmem:[%s6352_s30 + $0x70] sm:$0xff] }
 0x14c   :  { %1023 = vmatpush.bf16.msra.mxu2 %v3905_v34  ;;  %v4882_v34 = vld [vmem:[#allocation6 + $0x34] sm:$0xf] }
 0x14d   :  { %v3959_v37 = vor.u32 %v4882_v34, %v3956_v35  ;;  %v4914_v34 = vld [vmem:[%s6352_s30 + $0x30] sm:$0xff] }
 0x14f   :  { %v4130_v15 = vld [vmem:[%s6351_s24 + $0x10] sm:$0xf]  ;;  %v4926_v17 = vld [vmem:[%s6351_s24 + $0x14] sm:$0xf]  ;;  %v4132_v19 = vld [vmem:[%s6351_s24 + $0x18] sm:$0xf0] }
 0x150   :  { %1248 = vmatpush.bf16.msrb.mxu2 %v3987_v40  ;;  %v3946_v40 = vld [vmem:[#allocation6 + $0x20] sm:$0xf] }
 0x1be   :  { %v713_v42 = vpop.f32.mrf.mxu0 }
 0x1bf   :  { %v714_v44 = vadd.f32 %v713_v42, %v540_v43  ;;  %v4890_v42 = vld [vmem:[#allocation6 + $0x74] sm:$0xf]  ;;  %v3988_v43 = vld [vmem:[#allocation6 + $0x78] sm:$0xf0] }
 0x1c4   :  { %v739_v45 = vpop.f32.mrf.mxu2 }
 0x1c5   :  { %v740_v52 = vadd.f32 %v739_v45, %v541_v48  ;;  %v3991_v45 = vor.u32 %v4890_v42, %v3988_v43  ;;  %v3978_v48 = vld [vmem:[#allocation6 + $0x60] sm:$0xf]  ;;  %v4881_v42 = vld [vmem:[#allocation6 + $0x24] sm:$0xf0] }
 0x1c6   :  { %v726_v46 = vpop.f32.mrf.mxu1  ;;  %v715_v49 = vpop.f32.mrf.mxu0  ;;  %v4010_v43 = vld [vmem:[#allocation6 + $0xa0] sm:$0xf] }
 0x1c7   :  { %v727_v47 = vadd.f32 %v726_v46, %v714_v44  ;;  %v4051_v44 = vor.u32 %v4907_v41, %v4050_v39  ;;  %v4906_v46 = vld [vmem:[#allocation6 + $0xf4] sm:$0xf]  ;;  %1274 = vmatpush.bf16.msrb.mxu0 %v3991_v45  ;;  %v4020_v39 = vld [vmem:[#allocation6 + $0xb8] sm:$0xf0]  ;;  %v3947_v45 = vor.u32 %v4881_v42, %v3946_v40 }
 0x1c8   :  { %v4023_v41 = vor.u32 %v4898_v38, %v4020_v39  ;;  %v4913_v38 = vld [vmem:[%s6352_s30 + $0x28] sm:$0xff] }
 0x1c9   :  { %vm756_vm2 = vcmp.gt.f32.partialorder %v727_v47, 0.0  ;;  %v758_v50 = vmul.f32 0.01, %v727_v47  ;;  %1261 = vmatpush.bf16.msrb.mxu3 %v4051_v44  ;;  %v4897_v44 = vld [vmem:[#allocation6 + $0xa4] sm:$0xf0] }
 0x1cb   :  { %v760_v51 = vsel %vm756_vm2, %v727_v47, %v758_v50  ;;  %v4052_v47 = vld [vmem:[#allocation6 + $0xf8] sm:$0xf0]  ;;  %v4889_v50 = vld [vmem:[#allocation6 + $0x64] sm:$0xf0] }
 0x1cc   :  { %v762_v53 = vpack.c.bf16 %v760_v51, %v760_v51  ;;  %v752_v54 = vpop.f32.mrf.mxu3  ;;  %v741_v56 = vpop.f32.mrf.mxu2  ;;  %v4055_v49 = vor.u32 %v4906_v46, %v4052_v47  ;;  %v4042_v51 = vld [vmem:[#allocation6 + $0xe0] sm:$0xf]  ;;  %v4011_v46 = vor.u32 %v4897_v44, %v4010_v43  ;;  %v4880_v47 = vld [vmem:[#allocation6 + $0x24] sm:$0xf] }
 0x1cd   :  { %v753_v55 = vadd.f32 %v752_v54, %v740_v52  ;;  %v4905_v52 = vld [vmem:[#allocation6 + $0xe4] sm:$0xf0]  ;;  %v3980_v56 = vld [vmem:[#allocation6 + $0x68] sm:$0xf0]  ;;  %v4920_v43 = vld [vmem:[%s6352_s30 + $0x60] sm:$0xff] }
 0x1ce   :  { %v728_v57 = vpop.f32.mrf.mxu1  ;;  %904 = vmatmul.bf16.vlgmr.msra.gmra.mxu0 %v762_v53  ;;  %v3979_v53 = vor.u32 %v4889_v50, %v3978_v48  ;;  %v4043_v54 = vor.u32 %v4905_v52, %v4042_v51  ;;  %1287 = vmatpush.bf16.msrb.mxu1 %v4055_v49  ;;  %v3948_v48 = vld [vmem:[#allocation6 + $0x28] sm:$0xf0]  ;;  %v4896_v49 = vld [vmem:[#allocation6 + $0xa4] sm:$0xf] }
 0x1cf   :  { %vm757_vm3 = vcmp.gt.f32.partialorder %v753_v55, 0.0  ;;  %v759_v58 = vmul.f32 0.01, %v753_v55  ;;  %v4904_v57 = vld [vmem:[#allocation6 + $0xe4] sm:$0xf]  ;;  %v3951_v50 = vor.u32 %v4880_v47, %v3948_v48 }
 0x1d0   :  { %1249 = vmatpush.bf16.msrb.mxu2 %v3979_v53  ;;  %1262 = vmatpush.bf16.msrb.mxu3 %v4043_v54  ;;  %v4012_v51 = vld [vmem:[#allocation6 + $0xa8] sm:$0xf0]  ;;  %v3938_v53 = vld [vmem:[#allocation6 + $0x10] sm:$0xf]  ;;  %v4879_v54 = vld [vmem:[#allocation6 + $0x14] sm:$0xf0] }
 0x1d1   :  { %v761_v59 = vsel %vm757_vm3, %v753_v55, %v759_v58  ;;  %v4888_v55 = vld [vmem:[#allocation6 + $0x64] sm:$0xf]  ;;  %v4015_v52 = vor.u32 %v4896_v49, %v4012_v51  ;;  %v4260_v47 = vld [vmem:[#allocation8 + $0xf0] sm:$0xf]  ;;  %v4959_v48 = vld [vmem:[#allocation8 + $0xf4] sm:$0xf0] }
 0x1d2   :  { %v763_v60 = vpack.c.bf16 %v761_v59, %v761_v59  ;;  %v3983_v58 = vor.u32 %v4888_v55, %v3980_v56  ;;  %v4044_v59 = vld [vmem:[#allocation6 + $0xe8] sm:$0xf0]  ;;  %v4002_v55 = vld [vmem:[#allocation6 + $0x90] sm:$0xf]  ;;  %v3939_v56 = vor.u32 %v4879_v54, %v3938_v53  ;;  %v4912_v44 = vld [vmem:[%s6352_s30 + $0x20] sm:$0xff]  ;;  %vm2126_vm3 = vcmask 7168  }
 0x1d4   :  { %v754_v61 = vpop.f32.mrf.mxu3  ;;  %917 = vmatmul.bf16.vlgmr.msra.gmra.mxu1 %v763_v60  ;;  %v4047_v60 = vor.u32 %v4904_v57, %v4044_v59  ;;  %1275 = vmatpush.bf16.msrb.mxu0 %v3983_v58  ;;  %v4895_v57 = vld [vmem:[#allocation6 + $0x94] sm:$0xf0]  ;;  %v4878_v58 = vld [vmem:[#allocation6 + $0x14] sm:$0xf] }
 0x1d5   :  { %v4003_v59 = vor.u32 %v4895_v57, %v4002_v55  ;;  %v4919_v55 = vld [vmem:[%s6352_s30 + $0x58] sm:$0xff] }
 0x1d6   :  { %1288 = vmatpush.bf16.msrb.mxu1 %v4047_v60  ;;  %v3940_v60 = vld [vmem:[#allocation6 + $0x18] sm:$0xf0] }
 0x1da   :  { %1289 = vmatpush.bf16.msrb.mxu1 %v4039_v16  ;;  %v4927_v16 = vld [vmem:[%s6351_s24 + $0x14] sm:$0xf0] }
 0x1db   :  { %v4131_v18 = vor.u32 %v4927_v16, %v4130_v15  ;;  %v4908_v16 = vld [vmem:[%s6352_s30] sm:$0xff] }
 0x24b   :  { %v905_v62 = vpop.f32.mrf.mxu0 }
 0x24c   :  { %v906_v0 = vadd.f32 %v5175_v63, %v905_v62 }
 0x251   :  { %v918_v1 = vpop.f32.mrf.mxu1 }
 0x252   :  { %v6028_v2 = vadd.f32 %v918_v1, %v906_v0 }
 0x253   :  { %v907_v3 = vpop.f32.mrf.mxu0 }
 0x254   :  { %923 = vst.msk [vmem:[%s5841_s4] sm:$0xff] %vm922_vm4, %v6028_v2  ;;  %5177 = vtanh.f32 %v6028_v2  ;;  %v3970_v3 = vld [vmem:[#allocation6 + $0x50] sm:$0xf]  ;;  %s6353_s4 = sld [smem:[#allocation42_spill]] }
 0x255   :  { %926 = vst.msk [vmem:[#allocation14] sm:$0xff] %vm925_vm5, %v6028_v2 }
 0x259   :  { %v920_v4 = vpop.f32.mrf.mxu1 }
 0x25a   :  { %v6035_v5 = vpop.eup %5177  ;;  %v4887_v4 = vld [vmem:[#allocation6 + $0x54] sm:$0xf0] }
 0x25b   :  { %928 = vrot.lane.b32.xlu2 %v6035_v5, %s5664_s25  ;;  %v943_v6 = vmul.f32 0.5, %v6035_v5 }
 0x25d   :  { %v944_v7 = vmul.f32 1.442695, %v943_v6  ;;  %v4034_v6 = vld [vmem:[#allocation6 + $0xd0] sm:$0xf] }
 0x25f   :  { %5179 = vpow2.f32 %v944_v7  ;;  %v3971_v7 = vor.u32 %v4887_v4, %v3970_v3  ;;  %v4877_v3 = vld [vmem:[#allocation6 + $0x4] sm:$0xf0]  ;;  %v3994_v4 = vld [vmem:[#allocation6 + $0x80] sm:$0xf] }
 0x261   :  { %1250 = vmatpush.bf16.msrb.mxu2 %v3971_v7  ;;  %v4893_v7 = vld [vmem:[#allocation6 + $0x84] sm:$0xf0] }
 0x263   :  { %933 = vrot.lane.b32.xlu2 %v6028_v2, %s5665_s29 }
 0x265   :  { %v5180_v8 = vpop.eup %5179  ;;  %1251 = vmatpush.bf16.msrb.mxu2 %v3963_v20  ;;  %v4122_v20 = vld [vmem:[%s6351_s24] sm:$0xf] }
 0x266   :  { %953 = vrot.lane.b32.xlu0 %v5180_v8, %s5666_s8 }
 0x26e   :  { %947 = vrot.lane.b32.xlu0 %v5180_v8, %s5664_s25  ;;  %v4903_v8 = vld [vmem:[#allocation6 + $0xd4] sm:$0xf0] }
 0x26f   :  { %v4035_v11 = vor.u32 %v4903_v8, %v4034_v6  ;;  %v4876_v8 = vld [vmem:[#allocation6 + $0x4] sm:$0xf] }
 0x271   :  { %1263 = vmatpush.bf16.msrb.mxu3 %v4035_v11 }
 0x275   :  { %1264 = vmatpush.bf16.msrb.mxu3 %v4027_v21  ;;  %v4925_v21 = vld [vmem:[%s6351_s24 + $0x4] sm:$0xf0] }
 0x276   :  { %938 = vrot.lane.b32.xlu0 %v6035_v5, %s5666_s8 }
 0x279   :  { %1265 = vmatpush.bf16.msrb.mxu3 %v4019_v36 }
 0x27d   :  { %1266 = vmatpush.bf16.msrb.mxu3 %v4011_v46  ;;  %v4943_v46 = vld [vmem:[#allocation8 + $0x74] sm:$0xf0] }
 0x281   :  { %1267 = vmatpush.bf16.msrb.mxu3 %v4003_v59  ;;  %v4188_v59 = vld [vmem:[#allocation8 + $0x60] sm:$0xf] }
 0x2b5   :  { %v929_v9 = vpop.permute.xlu2 %928 }
 0x2b6   :  { %931 = vst.msk [vmem:[#allocation15] sm:$0xff] %vm925_vm5, %v929_v9  ;;  %v4886_v9 = vld [vmem:[#allocation6 + $0x54] sm:$0xf] }
 0x2bd   :  { %v934_v10 = vpop.permute.xlu2 %933 }
 0x2be   :  { %937 = vst.msk [vmem:[#allocation17] sm:$0xff] %vm936_vm6, %v934_v10  ;;  %v3972_v10 = vld [vmem:[#allocation6 + $0x58] sm:$0xf0] }
 0x2bf   :  { %v3975_v12 = vor.u32 %v4886_v9, %v3972_v10  ;;  %v3932_v9 = vld [vmem:[#allocation6 + $0x8] sm:$0xf0]  ;;  %v3995_v10 = vor.u32 %v4893_v7, %v3994_v4  ;;  %v4918_v4 = vld [vmem:[%s6352_s30 + $0x50] sm:$0xff] }
 0x2c0   :  { %v3935_v11 = vor.u32 %v4876_v8, %v3932_v9  ;;  %v4917_v7 = vld [vmem:[%s6352_s30 + $0x48] sm:$0xff]  ;;  %v4958_v9 = vld [vmem:[#allocation8 + $0xf4] sm:$0xf] }
 0x2c1   :  { %1276 = vmatpush.bf16.msrb.mxu0 %v3975_v12  ;;  %v4892_v12 = vld [vmem:[#allocation6 + $0x84] sm:$0xf]  ;;  %1268 = vmatpush.bf16.msrb.mxu3 %v3995_v10  ;;  %v4909_v8 = vld [vmem:[%s6352_s30 + $0x8] sm:$0xff]  ;;  %v4262_v10 = vld [vmem:[#allocation8 + $0xf8] sm:$0xf0] }
 0x2c2   :  { %v3999_v14 = vor.u32 %v4892_v12, %v3996_v13  ;;  %v4265_v12 = vor.u32 %v4958_v9, %v4262_v10  ;;  %v4956_v13 = vld [vmem:[#allocation8 + $0xe4] sm:$0xf]  ;;  %v4934_v10 = vld [vmem:[#allocation8 + $0x34] sm:$0xf] }
 0x2d8   :  { %v954_v24 = vpop.permute.xlu0 %953 }
 0x2d9   :  { %v956_v25 = vmul.f32 %v954_v24, %v952_v23  ;;  %v3964_v23 = vld [vmem:[#allocation6 + $0x48] sm:$0xf0]  ;;  %v4900_v24 = vld [vmem:[#allocation6 + $0xc4] sm:$0xf] }
 0x2db   :  { %958 = vrot.lane.b32.xlu1 %v956_v25, %s5663_s3  ;;  %v3967_v25 = vor.u32 %v4884_v22, %v3964_v23  ;;  %v4135_v22 = vor.u32 %v4926_v17, %v4132_v19  ;;  %v4924_v23 = vld [vmem:[%s6351_s24 + $0x4] sm:$0xf]  ;;  %v4180_v17 = vld [vmem:[#allocation8 + $0x50] sm:$0xf] }
 0x2dd   :  { %1277 = vmatpush.bf16.msrb.mxu0 %v3967_v25  ;;  %v4123_v25 = vor.u32 %v4925_v21, %v4122_v20  ;;  %v4244_v20 = vld [vmem:[#allocation8 + $0xd0] sm:$0xf]  ;;  %v4955_v21 = vld [vmem:[#allocation8 + $0xd4] sm:$0xf0] }
 0x2e0   :  { %v948_v27 = vpop.permute.xlu0 %947 }
 0x2e1   :  { %v950_v28 = vmul.f32 %v948_v27, %v942_v26  ;;  %v4028_v26 = vld [vmem:[#allocation6 + $0xc8] sm:$0xf0]  ;;  %1278 = vmatpush.bf16.msrb.mxu0 %v3959_v37 }
 0x2e2   :  { %v4031_v27 = vor.u32 %v4900_v24, %v4028_v26  ;;  %v4124_v24 = vld [vmem:[%s6351_s24 + $0x8] sm:$0xf0]  ;;  %s6365_s24 = sld [smem:[#allocation55_spill]] }
 0x2e3   :  { %v6060_v29 = vadd.f32 %v950_v28, %v6028_v2  ;;  %v3954_v28 = vld [vmem:[#allocation6 + $0x30] sm:$0xf]  ;;  %v4127_v26 = vor.u32 %v4924_v23, %v4124_v24  ;;  %v4921_v37 = vld [vmem:[%s6352_s30 + $0x68] sm:$0xff]  ;;  %v4245_v23 = vor.u32 %v4955_v21, %v4244_v20  ;;  %v4198_v24 = vld [vmem:[#allocation8 + $0x78] sm:$0xf0] }
 0x2e4   :  { %1290 = vmatpush.bf16.msrb.mxu1 %v4031_v27  ;;  %v4945_v20 = vld [vmem:[#allocation8 + $0x84] sm:$0xf0]  ;;  %v4932_v21 = vld [vmem:[#allocation8 + $0x24] sm:$0xf] }
 0x2e5   :  { %962 = vst.msk [vmem:[#allocation20] sm:$0xff] %vm925_vm5, %v6060_v29  ;;  %1279 = vmatpush.bf16.msrb.mxu0 %v3951_v50 }
 0x2e8   :  { %v939_v30 = vpop.permute.xlu0 %938  ;;  %1291 = vmatpush.bf16.msrb.mxu1 %v4023_v41 }
 0x2e9   :  { %941 = vst.msk [vmem:[#allocation18] sm:$0xff] %vm936_vm6, %v939_v30  ;;  %v4883_v30 = vld [vmem:[#allocation6 + $0x34] sm:$0xf0] }
 0x2ea   :  { %v3955_v32 = vor.u32 %v4883_v30, %v3954_v28  ;;  %v4923_v30 = vld [vmem:[%s6352_s30 + $0x78] sm:$0xff] }
 0x2ec   :  { %1252 = vmatpush.bf16.msrb.mxu2 %v3955_v32  ;;  %1292 = vmatpush.bf16.msrb.mxu1 %v4015_v52  ;;  %v976_v32 = vld [vmem:[%s6353_s4] sm:$0x3]  ;;  %s5678_s4 = smov [#allocation15]  }
 0x2ed   :  { %v978_v35 = vperm.slane %v976_v32, 0  ;;  %v979_v36 = vperm.slane %v976_v32, 1  ;;  %v4937_v32 = vld [vmem:[#allocation8 + $0x44] sm:$0xf0] }
 0x2f0   :  { %1253 = vmatpush.bf16.msrb.mxu2 %v3947_v45  ;;  %v4196_v45 = vld [vmem:[#allocation8 + $0x70] sm:$0xf] }
 0x2f1   :  { %v4197_v57 = vor.u32 %v4943_v46, %v4196_v45  ;;  %v4951_v46 = vld [vmem:[#allocation8 + $0xb4] sm:$0xf0] }
 0x2f4   :  { %1254 = vmatpush.bf16.msrb.mxu2 %v3939_v56  ;;  %v4911_v56 = vld [vmem:[%s6352_s30 + $0x18] sm:$0xff] }
 0x34d   :  { %v959_v61 = vpop.permute.xlu1 %958 }
 0x34e   :  { %v961_v62 = vadd.f32 %v959_v61, %v6028_v2  ;;  %v4894_v61 = vld [vmem:[#allocation6 + $0x94] sm:$0xf] }
 0x350   :  { %v968_v63 = vsel %vm925_vm5, %v6060_v29, %v961_v62  ;;  %v1494_v0 = vpack.c.bf16 %v961_v62, %v961_v62 }
 0x351   :  { %v969_v1 = vpack.c.bf16 %v968_v63, %v968_v63  ;;  %v3943_v63 = vor.u32 %v4878_v58, %v3940_v60  ;;  %v4261_v58 = vor.u32 %v4959_v48, %v4260_v47  ;;  %v4941_v60 = vld [vmem:[#allocation8 + $0x64] sm:$0xf0]  ;;  %v4938_v47 = vld [vmem:[#allocation8 + $0x54] sm:$0xf]  ;;  %v4182_v48 = vld [vmem:[#allocation8 + $0x58] sm:$0xf0] }
 0x352   :  { %1506 = vrot.lane.b32.xlu1 %v1494_v0, %s5665_s29 }
 0x353   :  { %3926 = vmatmul.msk.bf16.vlgmr.msra.gmra.mxu2 %vm1012_vm7, %v969_v1  ;;  %3927 = vmatmul.msk.bf16.vlgmr.msra.gmra.mxu3 %vm1012_vm7, %v969_v1  ;;  %v3930_v1 = vld [vmem:[#allocation6] sm:$0xf] }
 0x354   :  { %1280 = vmatpush.bf16.msrb.mxu0 %v3943_v63  ;;  %v3931_v6 = vor.u32 %v4877_v3, %v3930_v1  ;;  %1453 = vmatpush.bf16.msra.mxu3 %v4923_v30  ;;  %v4189_v1 = vor.u32 %v4941_v60, %v4188_v59  ;;  %v4936_v59 = vld [vmem:[#allocation8 + $0x44] sm:$0xf]  ;;  %v4174_v60 = vld [vmem:[#allocation8 + $0x48] sm:$0xf0] }
 0x356   :  { %1255 = vmatpush.bf16.msrb.mxu2 %v3931_v6  ;;  %v4910_v6 = vld [vmem:[%s6352_s30 + $0x10] sm:$0xff] }
 0x358   :  { %1281 = vmatpush.bf16.msrb.mxu0 %v3935_v11  ;;  %1454 = vmatpush.bf16.msra.mxu3 %v4922_v33  ;;  %v4916_v11 = vld [vmem:[%s6352_s30 + $0x40] sm:$0xff]  ;;  %s3400_s30 = sshll.u32 %s6365_s24, 4  ;;  %s3401_s30 = int_to_ptr.hbm [resolvable:$true] %s3400_s30 }
 0x35a   :  { %964 = vrot.lane.b32.xlu1 %v961_v62, %s5665_s29  ;;  %v4004_v62 = vld [vmem:[#allocation6 + $0x98] sm:$0xf0]  ;;  %1440 = vmatpush.bf16.msra.mxu2 %v4915_v31  ;;  %v4172_v31 = vld [vmem:[#allocation8 + $0x40] sm:$0xf]  ;;  %s5674_s29 = smov 122  }
 0x35b   :  { %v4007_v0 = vor.u32 %v4894_v61, %v4004_v62  ;;  %v4252_v61 = vld [vmem:[#allocation8 + $0xe0] sm:$0xf]  ;;  %v4957_v62 = vld [vmem:[#allocation8 + $0xe4] sm:$0xf0]  ;;  %v4173_v33 = vor.u32 %v4937_v32, %v4172_v31  ;;  %v4150_v31 = vld [vmem:[#allocation8 + $0x18] sm:$0xf0] }
 0x35c   :  { %1537 = vmatpush.bf16.msra.mxu0 %v4131_v18  ;;  %1455 = vmatpush.bf16.msra.mxu3 %v4921_v37  ;;  %v4253_v3 = vor.u32 %v4957_v62, %v4252_v61  ;;  %v4939_v18 = vld [vmem:[#allocation8 + $0x54] sm:$0xf0]  ;;  %v4177_v62 = vor.u32 %v4936_v59, %v4174_v60 }
 0x35d   :  { %1293 = vmatpush.bf16.msrb.mxu1 %v4007_v0  ;;  %v4181_v19 = vor.u32 %v4939_v18, %v4180_v17  ;;  %v4929_v17 = vld [vmem:[#allocation8 + $0x4] sm:$0xf0]  ;;  %v4204_v18 = vld [vmem:[#allocation8 + $0x80] sm:$0xf] }
 0x35e   :  { %1441 = vmatpush.bf16.msra.mxu2 %v4914_v34  ;;  %v4953_v34 = vld [vmem:[#allocation8 + $0xc4] sm:$0xf0] }
 0x360   :  { %1538 = vmatpush.bf16.msra.mxu0 %v4123_v25  ;;  %1456 = vmatpush.bf16.msra.mxu3 %v4920_v43  ;;  %v4954_v25 = vld [vmem:[#allocation8 + $0xd4] sm:$0xf]  ;;  %v4935_v43 = vld [vmem:[#allocation8 + $0x34] sm:$0xf0] }
 0x361   :  { %1294 = vmatpush.bf16.msrb.mxu1 %v3999_v14  ;;  %v4254_v14 = vld [vmem:[#allocation8 + $0xe8] sm:$0xf0] }
 0x362   :  { %1442 = vmatpush.bf16.msra.mxu2 %v4913_v38  ;;  %v4257_v15 = vor.u32 %v4956_v13, %v4254_v14  ;;  %v4214_v14 = vld [vmem:[#allocation8 + $0x98] sm:$0xf0] }
 0x364   :  { %1457 = vmatpush.bf16.msra.mxu3 %v4919_v55  ;;  %v4933_v55 = vld [vmem:[#allocation8 + $0x24] sm:$0xf0] }
 0x365   :  { %1550 = vmatpush.bf16.msra.mxu1 %v4135_v22  ;;  %v4942_v22 = vld [vmem:[#allocation8 + $0x74] sm:$0xf] }
 0x366   :  { %1443 = vmatpush.bf16.msra.mxu2 %v4912_v44  ;;  %v4228_v44 = vld [vmem:[#allocation8 + $0xb0] sm:$0xf] }
 0x368   :  { %1458 = vmatpush.bf16.msra.mxu3 %v4918_v4  ;;  %v4931_v4 = vld [vmem:[#allocation8 + $0x14] sm:$0xf0] }
 0x369   :  { %1551 = vmatpush.bf16.msra.mxu1 %v4127_v26  ;;  %v4246_v26 = vld [vmem:[#allocation8 + $0xd8] sm:$0xf0] }
 0x36a   :  { %1444 = vmatpush.bf16.msra.mxu2 %v4911_v56  ;;  %v4249_v30 = vor.u32 %v4954_v25, %v4246_v26  ;;  %v4220_v56 = vld [vmem:[#allocation8 + $0xa0] sm:$0xf]  ;;  %v4944_v25 = vld [vmem:[#allocation8 + $0x84] sm:$0xf]  ;;  %v4206_v26 = vld [vmem:[#allocation8 + $0x88] sm:$0xf0] }
 0x36c   :  { %1459 = vmatpush.bf16.msra.mxu3 %v4917_v7  ;;  %v4212_v7 = vld [vmem:[#allocation8 + $0x90] sm:$0xf] }
 0x36e   :  { %1445 = vmatpush.bf16.msra.mxu2 %v4910_v6 }
 0x370   :  { %1460 = vmatpush.bf16.msra.mxu3 %v4916_v11  ;;  %v4166_v11 = vld [vmem:[#allocation8 + $0x38] sm:$0xf0] }
 0x371   :  { %v4169_v13 = vor.u32 %v4934_v10, %v4166_v11 }
 0x372   :  { %1446 = vmatpush.bf16.msra.mxu2 %v4909_v8  ;;  %v4947_v8 = vld [vmem:[#allocation8 + $0x94] sm:$0xf0] }
 0x373   :  { %v4213_v9 = vor.u32 %v4947_v8, %v4212_v7 }
 0x376   :  { %1447 = vmatpush.bf16.msra.mxu2 %v4908_v16  ;;  %v4140_v16 = vld [vmem:[#allocation8] sm:$0xf] }
 0x3c4   :  { %v6082_v27 = vpop.permute.xlu1 %1506 }
 0x3cc   :  { %v965_v28 = vpop.permute.xlu1 %964 }
 0x3cd   :  { %967 = vst.msk [vmem:[#allocation21] sm:$0xff] %vm936_vm6, %v965_v28  ;;  %v4201_v28 = vor.u32 %v4942_v22, %v4198_v24  ;;  %v4158_v22 = vld [vmem:[#allocation8 + $0x28] sm:$0xf0] }
 0x3ce   :  { %v4161_v24 = vor.u32 %v4932_v21, %v4158_v22 }
 0x3d6   :  { %v1025_v39 = vpop.f32.mrf.mxu2  ;;  %v1038_v40 = vpop.f32.mrf.mxu3 }
 0x3d7   :  { %v1026_v41 = vadd.f32 %v1025_v39, %v978_v35  ;;  %v1039_v42 = vadd.f32 %v1038_v40, %v979_v36  ;;  %v4940_v35 = vld [vmem:[#allocation8 + $0x64] sm:$0xf]  ;;  %v4190_v36 = vld [vmem:[#allocation8 + $0x68] sm:$0xf0] }
 0x3d8   :  { %v4193_v38 = vor.u32 %v4940_v35, %v4190_v36  ;;  %v4952_v39 = vld [vmem:[#allocation8 + $0xc4] sm:$0xf]  ;;  %v4238_v40 = vld [vmem:[#allocation8 + $0xc8] sm:$0xf0] }
 0x3d9   :  { %vm1042_vm8 = vcmp.gt.f32.partialorder %v1026_v41, 0.0  ;;  %v1044_v49 = vmul.f32 0.01, %v1026_v41  ;;  %vm1043_vm9 = vcmp.gt.f32.partialorder %v1039_v42, 0.0  ;;  %v1045_v50 = vmul.f32 0.01, %v1039_v42 }
 0x3db   :  { %v1046_v51 = vsel %vm1042_vm8, %v1026_v41, %v1044_v49  ;;  %v1047_v52 = vsel %vm1043_vm9, %v1039_v42, %v1045_v50  ;;  %v4241_v41 = vor.u32 %v4952_v39, %v4238_v40  ;;  %v4164_v42 = vld [vmem:[#allocation8 + $0x30] sm:$0xf]  ;;  %v4229_v49 = vor.u32 %v4951_v46, %v4228_v44 }
 0x3dc   :  { %v1048_v53 = vpack.c.bf16 %v1046_v51, %v1046_v51  ;;  %v1049_v54 = vpack.c.bf16 %v1047_v52, %v1047_v52  ;;  %v4165_v45 = vor.u32 %v4935_v43, %v4164_v42  ;;  %v4185_v50 = vor.u32 %v4938_v47, %v4182_v48  ;;  %v4950_v51 = vld [vmem:[#allocation8 + $0xb4] sm:$0xf]  ;;  %v4230_v52 = vld [vmem:[#allocation8 + $0xb8] sm:$0xf0]  ;;  %v4316_v42 = vld [vmem:[#allocation9 + $0x60] sm:$0xf] }
 0x3dd   :  { %v4973_v43 = vld [vmem:[#allocation9 + $0x64] sm:$0xf0]  ;;  %v4308_v48 = vld [vmem:[#allocation9 + $0x50] sm:$0xf] }
 0x3de   :  { %v1027_v63 = vpop.f32.mrf.mxu2  ;;  %v1040_v0 = vpop.f32.mrf.mxu3  ;;  %1256 = vmatmul.bf16.vlgmr.msrb.gmra.mxu2 %v1048_v53  ;;  %1269 = vmatmul.bf16.vlgmr.msrb.gmra.mxu3 %v1049_v54  ;;  %v4317_v46 = vor.u32 %v4973_v43, %v4316_v42  ;;  %v4966_v42 = vld [vmem:[#allocation9 + $0x34] sm:$0xf] }
 0x3df   :  { %1282 = vmatmul.bf16.vlgmr.msrb.gmra.mxu0 %v1048_v53  ;;  %1295 = vmatmul.bf16.vlgmr.msrb.gmra.mxu1 %v1049_v54  ;;  %v4233_v53 = vor.u32 %v4950_v51, %v4230_v52  ;;  %v4156_v54 = vld [vmem:[#allocation8 + $0x20] sm:$0xf]  ;;  %v4948_v63 = vld [vmem:[#allocation8 + $0xa4] sm:$0xf]  ;;  %v4222_v0 = vld [vmem:[#allocation8 + $0xa8] sm:$0xf0] }
 0x3e0   :  { %1763 = vmatpush.bf16.msrb.mxu0 %v4197_v57  ;;  %1776 = vmatpush.bf16.msrb.mxu1 %v4261_v58  ;;  %v4157_v57 = vor.u32 %v4933_v55, %v4156_v54  ;;  %v4949_v58 = vld [vmem:[#allocation8 + $0xa4] sm:$0xf0] }
 0x3e1   :  { %1802 = vmatpush.bf16.msrb.mxu3 %v4265_v12  ;;  %1789 = vmatpush.bf16.msrb.mxu2 %v4201_v28  ;;  %v4221_v61 = vor.u32 %v4949_v58, %v4220_v56  ;;  %v4946_v12 = vld [vmem:[#allocation8 + $0x94] sm:$0xf]  ;;  %v4209_v28 = vor.u32 %v4944_v25, %v4206_v26  ;;  %v4300_v56 = vld [vmem:[#allocation9 + $0x40] sm:$0xf] }
 0x3e4   :  { %1764 = vmatpush.bf16.msrb.mxu0 %v4189_v1  ;;  %1777 = vmatpush.bf16.msrb.mxu1 %v4253_v3  ;;  %v4225_v1 = vor.u32 %v4948_v63, %v4222_v0  ;;  %v4148_v3 = vld [vmem:[#allocation8 + $0x10] sm:$0xf]  ;;  %v4326_v63 = vld [vmem:[#allocation9 + $0x78] sm:$0xf0] }
 0x3e5   :  { %1803 = vmatpush.bf16.msrb.mxu3 %v4257_v15  ;;  %1790 = vmatpush.bf16.msrb.mxu2 %v4193_v38  ;;  %v4149_v6 = vor.u32 %v4931_v4, %v4148_v3  ;;  %v4217_v15 = vor.u32 %v4946_v12, %v4214_v14  ;;  %v4975_v38 = vld [vmem:[#allocation9 + $0x74] sm:$0xf0]  ;;  %v4972_v12 = vld [vmem:[#allocation9 + $0x64] sm:$0xf] }
 0x3e8   :  { %1765 = vmatpush.bf16.msrb.mxu0 %v4181_v19  ;;  %1778 = vmatpush.bf16.msrb.mxu1 %v4245_v23  ;;  %v4141_v19 = vor.u32 %v4929_v17, %v4140_v16  ;;  %v4205_v23 = vor.u32 %v4945_v20, %v4204_v18  ;;  %v4310_v20 = vld [vmem:[#allocation9 + $0x58] sm:$0xf0] }
 0x3e9   :  { %1804 = vmatpush.bf16.msrb.mxu3 %v4249_v30  ;;  %1791 = vmatpush.bf16.msrb.mxu2 %v4185_v50  ;;  %v4930_v30 = vld [vmem:[#allocation8 + $0x14] sm:$0xf] }
 0x3ea   :  { %v4153_v32 = vor.u32 %v4930_v30, %v4150_v31  ;;  %v4968_v30 = vld [vmem:[#allocation9 + $0x44] sm:$0xf]  ;;  %v4302_v31 = vld [vmem:[#allocation9 + $0x48] sm:$0xf0] }
 0x3ec   :  { %1766 = vmatpush.bf16.msrb.mxu0 %v4173_v33  ;;  %v4928_v33 = vld [vmem:[#allocation8 + $0x4] sm:$0xf] }
 0x3ed   :  { %1805 = vmatpush.bf16.msrb.mxu3 %v4241_v41  ;;  %1792 = vmatpush.bf16.msrb.mxu2 %v4177_v62  ;;  %v4974_v62 = vld [vmem:[#allocation9 + $0x74] sm:$0xf] }
 0x3ef   :  { %4136 = vmatmul.msk.bf16.vlgmr.msra.gmra.mxu0 %vm936_vm6, %v6082_v27  ;;  %4137 = vmatmul.msk.bf16.vlgmr.msra.gmra.mxu1 %vm936_vm6, %v6082_v27  ;;  %v4236_v27 = vld [vmem:[#allocation8 + $0xc0] sm:$0xf] }
 0x3f0   :  { %v4237_v37 = vor.u32 %v4953_v34, %v4236_v27  ;;  %1767 = vmatpush.bf16.msrb.mxu0 %v4165_v45  ;;  %v1082_v27 = vld [vmem:[%s6354_s7] sm:$0x3]  ;;  %v4142_v34 = vld [vmem:[#allocation8 + $0x8] sm:$0xf0]  ;;  %s3398_s7 = sshll.u32 %s5678_s4, 4  ;;  %s3399_s7 = int_to_ptr.vmem [resolvable:$true] %s3398_s7 }
 0x3f1   :  { %1806 = vmatpush.bf16.msrb.mxu3 %v4233_v53  ;;  %1793 = vmatpush.bf16.msrb.mxu2 %v4169_v13  ;;  %v4145_v35 = vor.u32 %v4928_v33, %v4142_v34  ;;  %v1085_v36 = vperm.slane %v1082_v27, 1  ;;  %v1084_v45 = vperm.slane %v1082_v27, 0  ;;  %v4318_v13 = vld [vmem:[#allocation9 + $0x68] sm:$0xf0]  ;;  %v4305_v33 = vor.u32 %v4968_v30, %v4302_v31  ;;  %v4388_v34 = vld [vmem:[#allocation9 + $0xf0] sm:$0xf] }
 0x3f2   :  { %1779 = vmatpush.bf16.msrb.mxu1 %v4237_v37  ;;  %v4324_v37 = vld [vmem:[#allocation9 + $0x70] sm:$0xf]  ;;  %v4321_v16 = vor.u32 %v4972_v12, %v4318_v13  ;;  %v4366_v12 = vld [vmem:[#allocation9 + $0xc8] sm:$0xf0]  ;;  %v4980_v30 = vld [vmem:[#allocation9 + $0xa4] sm:$0xf] }
 0x3f3   :  { %v4325_v41 = vor.u32 %v4975_v38, %v4324_v37  ;;  %v4390_v38 = vld [vmem:[#allocation9 + $0xf8] sm:$0xf0] }
 0x3f4   :  { %1768 = vmatpush.bf16.msrb.mxu0 %v4157_v57  ;;  %v4969_v57 = vld [vmem:[#allocation9 + $0x44] sm:$0xf0] }
 0x3f5   :  { %1807 = vmatpush.bf16.msrb.mxu3 %v4225_v1  ;;  %1794 = vmatpush.bf16.msrb.mxu2 %v4161_v24  ;;  %v1499_v1 = vld [vmem:[%s6355_s10] sm:$0x3]  ;;  %v4301_v3 = vor.u32 %v4969_v57, %v4300_v56  ;;  %v4286_v56 = vld [vmem:[#allocation9 + $0x28] sm:$0xf0]  ;;  %s5379_s10 = sshra.s32 %s3401_s30, 4  ;;  %s5380_s10 = int_to_ptr.hbm [resolvable:$true] %s5379_s10 }
 0x3f6   :  { %1780 = vmatpush.bf16.msrb.mxu1 %v4229_v49  ;;  %v4971_v49 = vld [vmem:[#allocation9 + $0x54] sm:$0xf0]  ;;  %v1501_v10 = vperm.slane %v1499_v1, 0  ;;  %v1502_v11 = vperm.slane %v1499_v1, 1  ;;  %p5384_p3 = scmp.lt.s32.totalorder %s5380_s10, %s6365_s24 }
 0x3f7   :  { %v4309_v54 = vor.u32 %v4971_v49, %v4308_v48  ;;  %v4988_v49 = vld [vmem:[#allocation9 + $0xe4] sm:$0xf]  ;;  %v4963_v1 = vld [vmem:[#allocation9 + $0x14] sm:$0xf0] }
 0x3f8   :  { %1769 = vmatpush.bf16.msrb.mxu0 %v4149_v6  ;;  %v4329_v6 = vor.u32 %v4974_v62, %v4326_v63  ;;  %v4374_v62 = vld [vmem:[#allocation9 + $0xd8] sm:$0xf0] }
 0x3f9   :  { %1808 = vmatpush.bf16.msrb.mxu3 %v4217_v15  ;;  %1795 = vmatpush.bf16.msrb.mxu2 %v4153_v32 }
 0x3fa   :  { %1781 = vmatpush.bf16.msrb.mxu1 %v4221_v61 }
 0x3fc   :  { %1770 = vmatpush.bf16.msrb.mxu0 %v4141_v19  ;;  %v4970_v19 = vld [vmem:[#allocation9 + $0x54] sm:$0xf] }
 0x3fd   :  { %1809 = vmatpush.bf16.msrb.mxu3 %v4209_v28  ;;  %1796 = vmatpush.bf16.msrb.mxu2 %v4145_v35  ;;  %v4313_v25 = vor.u32 %v4970_v19, %v4310_v20  ;;  %v4991_v35 = vld [vmem:[#allocation9 + $0xf4] sm:$0xf0]  ;;  %v4356_v20 = vld [vmem:[#allocation9 + $0xb0] sm:$0xf] }
 0x3fe   :  { %1782 = vmatpush.bf16.msrb.mxu1 %v4213_v9  ;;  %v4389_v37 = vor.u32 %v4991_v35, %v4388_v34  ;;  %v4979_v34 = vld [vmem:[#allocation9 + $0x94] sm:$0xf0]  ;;  %v4978_v35 = vld [vmem:[#allocation9 + $0x94] sm:$0xf] }
 0x400   :  { %2021 = vmatpush.bf16.msra.mxu0 %v4325_v41  ;;  %v4967_v41 = vld [vmem:[#allocation9 + $0x34] sm:$0xf0] }
 0x402   :  { %1783 = vmatpush.bf16.msrb.mxu1 %v4205_v23 }
 0x404   :  { %2022 = vmatpush.bf16.msra.mxu0 %v4317_v46  ;;  %v4989_v46 = vld [vmem:[#allocation9 + $0xe4] sm:$0xf0] }
 0x406   :  { %2034 = vmatpush.bf16.msra.mxu1 %v4389_v37  ;;  %v4342_v37 = vld [vmem:[#allocation9 + $0x98] sm:$0xf0] }
 0x408   :  { %2023 = vmatpush.bf16.msra.mxu0 %v4309_v54  ;;  %v4964_v54 = vld [vmem:[#allocation9 + $0x24] sm:$0xf] }
 0x409   :  { %v4289_v57 = vor.u32 %v4964_v54, %v4286_v56 }
 0x40c   :  { %2024 = vmatpush.bf16.msra.mxu0 %v4301_v3  ;;  %v4962_v3 = vld [vmem:[#allocation9 + $0x14] sm:$0xf] }
 0x45c   :  { %v1283_v39 = vpop.f32.mrf.mxu0  ;;  %v1296_v40 = vpop.f32.mrf.mxu1 }
 0x45d   :  { %v1284_v44 = vadd.f32 %v1283_v39, %v1085_v36  ;;  %v4990_v36 = vld [vmem:[#allocation9 + $0xf4] sm:$0xf] }
 0x45e   :  { %v4393_v39 = vor.u32 %v4990_v36, %v4390_v38  ;;  %v4345_v38 = vor.u32 %v4978_v35, %v4342_v37 }
 0x45f   :  { %v1297_v47 = vadd.f32 %v1296_v40, %v1284_v44  ;;  %v4292_v40 = vld [vmem:[#allocation9 + $0x30] sm:$0xf]  ;;  %v4294_v44 = vld [vmem:[#allocation9 + $0x38] sm:$0xf0] }
 0x460   :  { %v4293_v43 = vor.u32 %v4967_v41, %v4292_v40  ;;  %v4977_v40 = vld [vmem:[#allocation9 + $0x84] sm:$0xf0]  ;;  %v4976_v41 = vld [vmem:[#allocation9 + $0x84] sm:$0xf] }
 0x461   :  { %vm1301_vm10 = vcmp.gt.f32.partialorder %v1297_v47, 0.0  ;;  %v1303_v50 = vmul.f32 0.01, %v1297_v47  ;;  %v1257_v51 = vpop.f32.mrf.mxu2  ;;  %v1270_v52 = vpop.f32.mrf.mxu3 }
 0x462   :  { %v1258_v53 = vadd.f32 %v1257_v51, %v1084_v45  ;;  %v4380_v45 = vld [vmem:[#allocation9 + $0xe0] sm:$0xf]  ;;  %2025 = vmatpush.bf16.msra.mxu0 %v4293_v43  ;;  %v4334_v43 = vld [vmem:[#allocation9 + $0x88] sm:$0xf0] }
 0x463   :  { %v1305_v55 = vsel %vm1301_vm10, %v1297_v47, %v1303_v50  ;;  %v4297_v47 = vor.u32 %v4966_v42, %v4294_v44  ;;  %v4381_v48 = vor.u32 %v4989_v46, %v4380_v45  ;;  %v4382_v50 = vld [vmem:[#allocation9 + $0xe8] sm:$0xf0]  ;;  %v4337_v44 = vor.u32 %v4976_v41, %v4334_v43  ;;  %v4397_v45 = vld [vmem:[%s6356_s15] sm:$0xf]  ;;  %v4993_v46 = vld [vmem:[%s6356_s15 + $0x4] sm:$0xf0] }
 0x464   :  { %v1307_v58 = vpack.c.bf16 %v1305_v55, %v1305_v55  ;;  %v1271_v59 = vadd.f32 %v1270_v52, %v1258_v53  ;;  %v1285_v60 = vpop.f32.mrf.mxu0  ;;  %v1298_v61 = vpop.f32.mrf.mxu1  ;;  %v4385_v51 = vor.u32 %v4988_v49, %v4382_v50  ;;  %v4284_v52 = vld [vmem:[#allocation9 + $0x20] sm:$0xf]  ;;  %v4965_v53 = vld [vmem:[#allocation9 + $0x24] sm:$0xf0]  ;;  %v4399_v49 = vld [vmem:[%s6356_s15 + $0x8] sm:$0xf0] }
 0x465   :  { %2035 = vmatpush.bf16.msra.mxu1 %v4381_v48  ;;  %v4285_v55 = vor.u32 %v4965_v53, %v4284_v52  ;;  %v4986_v61 = vld [vmem:[#allocation9 + $0xd4] sm:$0xf]  ;;  %v4992_v48 = vld [vmem:[%s6356_s15 + $0x4] sm:$0xf]  ;;  %v5176_v52 = vld [vmem:[%s6357_s6] ss:$0 sm:$0xff] }
 0x466   :  { %vm1300_vm11 = vcmp.gt.f32.partialorder %v1271_v59, 0.0  ;;  %v1302_v0 = vmul.f32 0.01, %v1271_v59  ;;  %1461 = vmatmul.bf16.vlgmr.msra.gmra.mxu3 %v1307_v58  ;;  %v4372_v58 = vld [vmem:[#allocation9 + $0xd0] sm:$0xf]  ;;  %v4377_v63 = vor.u32 %v4986_v61, %v4374_v62  ;;  %s5381_s15 = scalar_lea.hbm %s5380_s10, 8 }
 0x467   :  { %2060 = vmatpush.bf16.msra.mxu3 %v4393_v39  ;;  %2026 = vmatpush.bf16.msra.mxu0 %v4285_v55  ;;  %v4332_v39 = vld [vmem:[#allocation9 + $0x80] sm:$0xf]  ;;  %p5382_p2 = scmp.ne.s32.totalorder %s5380_s10, %s5381_s15  ;;  %s5383_s6 = scalar_lea.hbm %s6365_s24, 8 }
 0x468   :  { %v1304_v4 = vsel %vm1300_vm11, %v1271_v59, %v1302_v0  ;;  %v4987_v59 = vld [vmem:[#allocation9 + $0xd4] sm:$0xf0]  ;;  %v4276_v0 = vld [vmem:[#allocation9 + $0x10] sm:$0xf]  ;;  %v4333_v42 = vor.u32 %v4977_v40, %v4332_v39  ;;  %v1597_v53 = vld [vmem:[%s6358_s18] sm:$0x3]  ;;  %p5385_p4 = scmp.lt.s32.totalorder %s5383_s6, %s5381_s15 }
 0x469   :  { %v1306_v7 = vpack.c.bf16 %v1304_v4, %v1304_v4  ;;  %v1259_v8 = vpop.f32.mrf.mxu2  ;;  %v1272_v9 = vpop.f32.mrf.mxu3  ;;  %v4373_v60 = vor.u32 %v4987_v59, %v4372_v58  ;;  %v4277_v4 = vor.u32 %v4963_v1, %v4276_v0  ;;  %v1599_v55 = vperm.slane %v1597_v53, 0  ;;  %v5009_v39 = vld [vmem:[#allocation11 + $0x74] sm:$0xf0]  ;;  %v5008_v40 = vld [vmem:[#allocation11 + $0x74] sm:$0xf] }
 0x46a   :  { %v4364_v8 = vld [vmem:[#allocation9 + $0xc0] sm:$0xf]  ;;  %v4985_v9 = vld [vmem:[#allocation9 + $0xc4] sm:$0xf0]  ;;  %p5386_p5 = por %p5385_p4, %p5384_p3 }
 0x46b   :  { %1448 = vmatmul.bf16.vlgmr.msra.gmra.mxu2 %v1306_v7  ;;  %2061 = vmatpush.bf16.msra.mxu3 %v4385_v51  ;;  %v4402_v51 = vor.u32 %v4992_v48, %v4399_v49  ;;  %v4455_v43 = vld [vmem:[#allocation11 + $0x60] sm:$0xf] }
 0x46c   :  { %v1540_v14 = vpop.f32.mrf.mxu0  ;;  %v1553_v15 = vpop.f32.mrf.mxu1  ;;  %2047 = vmatpush.bf16.msra.mxu2 %v4329_v6  ;;  %2036 = vmatpush.bf16.msra.mxu1 %v4373_v60  ;;  %v4278_v6 = vld [vmem:[#allocation9 + $0x18] sm:$0xf0]  ;;  %p5387_p6 = pnand %p5386_p5, %p5382_p2 }
 0x46d   :  { %v1541_v17 = vadd.f32 %v1540_v14, %v1501_v10  ;;  %v1554_v18 = vadd.f32 %v1553_v15, %v1502_v11  ;;  %v4281_v7 = vor.u32 %v4962_v3, %v4278_v6  ;;  %2027 = vmatpush.bf16.msra.mxu0 %v4277_v4  ;;  %v4365_v10 = vor.u32 %v4985_v9, %v4364_v8  ;;  %v4984_v11 = vld [vmem:[#allocation9 + $0xc4] sm:$0xf]  ;;  %v4268_v14 = vld [vmem:[#allocation9] sm:$0xf]  ;;  %v4961_v15 = vld [vmem:[#allocation9 + $0x4] sm:$0xf0] }
 0x46e   :  { %v4369_v13 = vor.u32 %v4984_v11, %v4366_v12 }
 0x46f   :  { %vm1557_vm12 = vcmp.gt.f32.partialorder %v1541_v17, 0.0  ;;  %v1559_v21 = vmul.f32 0.01, %v1541_v17  ;;  %vm1558_vm13 = vcmp.gt.f32.partialorder %v1554_v18, 0.0  ;;  %v1560_v22 = vmul.f32 0.01, %v1554_v18  ;;  %2062 = vmatpush.bf16.msra.mxu3 %v4377_v63 }
 0x470   :  { %2048 = vmatpush.bf16.msra.mxu2 %v4321_v16  ;;  %v4960_v16 = vld [vmem:[#allocation9 + $0x4] sm:$0xf]  ;;  %2037 = vmatpush.bf16.msra.mxu1 %v4365_v10 }
 0x471   :  { %v1561_v23 = vsel %vm1557_vm12, %v1541_v17, %v1559_v21  ;;  %v1562_v24 = vsel %vm1558_vm13, %v1554_v18, %v1560_v22  ;;  %v4269_v17 = vor.u32 %v4961_v15, %v4268_v14  ;;  %v4270_v18 = vld [vmem:[#allocation9 + $0x8] sm:$0xf0]  ;;  %v4983_v21 = vld [vmem:[#allocation9 + $0xb4] sm:$0xf0]  ;;  %v4982_v22 = vld [vmem:[#allocation9 + $0xb4] sm:$0xf] }
 0x472   :  { %v1563_v26 = vpack.c.bf16 %v1561_v23, %v1561_v23  ;;  %v1564_v28 = vpack.c.bf16 %v1562_v24, %v1562_v24  ;;  %v4273_v19 = vor.u32 %v4960_v16, %v4270_v18  ;;  %v4357_v23 = vor.u32 %v4983_v21, %v4356_v20  ;;  %v4358_v24 = vld [vmem:[#allocation9 + $0xb8] sm:$0xf0] }
 0x473   :  { %2063 = vmatpush.bf16.msra.mxu3 %v4369_v13  ;;  %2028 = vmatpush.bf16.msra.mxu0 %v4269_v17  ;;  %v1600_v13 = vperm.slane %v1597_v53, 1  ;;  %v5004_v53 = vld [vmem:[#allocation11 + $0x54] sm:$0xf] }
 0x474   :  { %v1542_v32 = vpop.f32.mrf.mxu0  ;;  %v1555_v27 = vpop.f32.mrf.mxu1  ;;  %1771 = vmatmul.bf16.vlgmr.msrb.gmra.mxu0 %v1563_v26  ;;  %1784 = vmatmul.bf16.vlgmr.msrb.gmra.mxu1 %v1564_v28 }
 0x475   :  { %2049 = vmatpush.bf16.msra.mxu2 %v4313_v25  ;;  %v4361_v25 = vor.u32 %v4982_v22, %v4358_v24  ;;  %2038 = vmatpush.bf16.msra.mxu1 %v4357_v23  ;;  %v4350_v32 = vld [vmem:[#allocation9 + $0xa8] sm:$0xf0]  ;;  %v2146_v22 = vpack.c.bf16 %v6060_v29, %v6060_v29  ;;  %v2075_v23 = vld [vmem:[%s6360_s23] sm:$0x3] }
 0x476   :  { %1810 = vmatmul.bf16.vlgmr.msrb.gmra.mxu3 %v1564_v28  ;;  %v4981_v28 = vld [vmem:[#allocation9 + $0xa4] sm:$0xf0]  ;;  %v4353_v27 = vor.u32 %v4980_v30, %v4350_v32  ;;  %v4394_v24 = vadd.f32 2.0, %v2075_v23 }
 0x477   :  { %2064 = vmatpush.bf16.msra.mxu3 %v4361_v25 }
 0x478   :  { %v2078_v25 = vand.u32 2147483647, %v4394_v24 }
 0x479   :  { %2050 = vmatpush.bf16.msra.mxu2 %v4305_v33  ;;  %v4340_v33 = vld [vmem:[#allocation9 + $0x90] sm:$0xf] }
 0x47a   :  { %v4341_v36 = vor.u32 %v4979_v34, %v4340_v33 }
 0x47b   :  { %1797 = vmatmul.bf16.vlgmr.msrb.gmra.mxu2 %v1563_v26  ;;  %v4348_v26 = vld [vmem:[#allocation9 + $0xa0] sm:$0xf]  ;;  %2065 = vmatpush.bf16.msra.mxu3 %v4353_v27  ;;  %v2077_v27 = vmax.f32 %v4394_v24, 0.0  ;;  %v4999_v24 = vld [vmem:[#allocation11 + $0x24] sm:$0xf0] }
 0x47c   :  { %v4349_v31 = vor.u32 %v4981_v28, %v4348_v26  ;;  %v2079_v26 = vsub.f32 0.0, %v2078_v25  ;;  %v4998_v25 = vld [vmem:[#allocation11 + $0x24] sm:$0xf] }
 0x47d   :  { %2051 = vmatpush.bf16.msra.mxu2 %v4297_v47  ;;  %v4398_v47 = vor.u32 %v4993_v46, %v4397_v45  ;;  %v5006_v46 = vld [vmem:[#allocation11 + $0x64] sm:$0xf] }
 0x47e   :  { %2039 = vmatpush.bf16.msra.mxu1 %v4349_v31  ;;  %v2080_v28 = vmul.f32 1.442695, %v2079_v26  ;;  %v4425_v26 = vld [vmem:[#allocation11 + $0x28] sm:$0xf0] }
 0x47f   :  { %2066 = vmatpush.bf16.msra.mxu3 %v4345_v38  ;;  %2175 = vmatpush.bf16.msrb.mxu0 %v4398_v47  ;;  %v4463_v38 = vld [vmem:[#allocation11 + $0x70] sm:$0xf]  ;;  %v4457_v47 = vld [vmem:[#allocation11 + $0x68] sm:$0xf0] }
 0x480   :  { %5181 = vpow2.f32 %v2080_v28  ;;  %v4464_v41 = vor.u32 %v5009_v39, %v4463_v38  ;;  %v4415_v38 = vld [vmem:[#allocation11 + $0x10] sm:$0xf] }
 0x481   :  { %2052 = vmatpush.bf16.msra.mxu2 %v4289_v57  ;;  %v1479_v57 = vld [vmem:[%s6359_s16] sm:$0xff] }
 0x482   :  { %2040 = vmatpush.bf16.msra.mxu1 %v4341_v36 }
 0x483   :  { %2067 = vmatpush.bf16.msra.mxu3 %v4337_v44  ;;  %v5007_v44 = vld [vmem:[#allocation11 + $0x64] sm:$0xf0] }
 0x484   :  { %v4456_v49 = vor.u32 %v5007_v44, %v4455_v43  ;;  %v4417_v43 = vld [vmem:[#allocation11 + $0x18] sm:$0xf0]  ;;  %v4503_v44 = vld [vmem:[#allocation11 + $0xc0] sm:$0xf] }
 0x485   :  { %2053 = vmatpush.bf16.msra.mxu2 %v4281_v7 }
 0x486   :  { %2041 = vmatpush.bf16.msra.mxu1 %v4333_v42  ;;  %v5182_v30 = vpop.eup %5181  ;;  %v4465_v42 = vld [vmem:[#allocation11 + $0x78] sm:$0xf0] }
 0x487   :  { %v2082_v31 = vadd.f32 1.0, %v5182_v30  ;;  %v4468_v45 = vor.u32 %v5008_v40, %v4465_v42  ;;  %v4428_v30 = vor.u32 %v4998_v25, %v4425_v26  ;;  %v4997_v40 = vld [vmem:[#allocation11 + $0x14] sm:$0xf0]  ;;  %v4471_v25 = vld [vmem:[#allocation11 + $0x80] sm:$0xf] }
 0x488   :  { %v4416_v42 = vor.u32 %v4997_v40, %v4415_v38  ;;  %v5011_v26 = vld [vmem:[#allocation11 + $0x84] sm:$0xf0] }
 0x489   :  { %2054 = vmatpush.bf16.msra.mxu2 %v4273_v19  ;;  %5183 = vlog2.f32 %v2082_v31  ;;  %v4511_v31 = vld [vmem:[#allocation11 + $0xd0] sm:$0xf] }
 0x48a   :  { %2188 = vmatpush.bf16.msrb.mxu1 %v4402_v51  ;;  %v4447_v51 = vld [vmem:[#allocation11 + $0x50] sm:$0xf] }
 0x48d   :  { %2400 = vmatpush.bf16.msrb.mxu2 %v4464_v41  ;;  %v4996_v41 = vld [vmem:[#allocation11 + $0x14] sm:$0xf] }
 0x48f   :  { %v5184_v32 = vpop.eup %5183 }
 0x490   :  { %v2084_v33 = vmul.f32 0.6931472, %v5184_v32  ;;  %v5021_v32 = vld [vmem:[#allocation11 + $0xd4] sm:$0xf0] }
 0x491   :  { %2401 = vmatpush.bf16.msrb.mxu2 %v4456_v49  ;;  %v5018_v49 = vld [vmem:[#allocation11 + $0xc4] sm:$0xf] }
 0x492   :  { %v2085_v34 = vadd.f32 %v2084_v33, %v2077_v27  ;;  %v4512_v27 = vor.u32 %v5021_v32, %v4511_v31  ;;  %v5020_v33 = vld [vmem:[#allocation11 + $0xd4] sm:$0xf]  ;;  %v4472_v31 = vor.u32 %v5011_v26, %v4471_v25  ;;  %v4473_v32 = vld [vmem:[#allocation11 + $0x88] sm:$0xf0] }
 0x493   :  { %v4777_v26 = vld [vmem:[#allocation12 + $0x1f0] sm:$0xf0] }
 0x494   :  { %v6129_v35 = vadd.f32 -2.0, %v2085_v34  ;;  %v4513_v34 = vld [vmem:[#allocation11 + $0xd8] sm:$0xf0] }
 0x496   :  { %v2087_v29 = vsub.f32 2.0, %v6129_v35  ;;  %v5015_v35 = vld [vmem:[#allocation11 + $0xa4] sm:$0xf0] }
 0x498   :  { %v2089_v36 = vand.u32 2147483647, %v2087_v29 }
 0x49a   :  { %v2090_v37 = vsub.f32 0.0, %v2089_v36 }
 0x49c   :  { %v2091_v48 = vmul.f32 1.442695, %v2090_v37  ;;  %v4516_v37 = vor.u32 %v5020_v33, %v4513_v34  ;;  %v1855_v33 = vld [vmem:[%s6361_s26] sm:$0x3] }
 0x49e   :  { %5185 = vpow2.f32 %v2091_v48 }
 0x4e9   :  { %v1462_v50 = vpop.f32.mrf.mxu3 }
 0x4ee   :  { %v1449_v54 = vpop.f32.mrf.mxu2 }
 0x4ef   :  { %v1450_v56 = vadd.f32 %v5176_v52, %v1449_v54  ;;  %v5005_v52 = vld [vmem:[#allocation11 + $0x54] sm:$0xf0] }
 0x4f0   :  { %v4448_v54 = vor.u32 %v5005_v52, %v4447_v51 }
 0x4f1   :  { %v6115_v58 = vadd.f32 %v1462_v50, %v1450_v56  ;;  %v1464_v59 = vpop.f32.mrf.mxu3  ;;  %v1772_v60 = vpop.f32.mrf.mxu0  ;;  %v4460_v50 = vor.u32 %v5006_v46, %v4457_v47  ;;  %v4420_v47 = vor.u32 %v4996_v41, %v4417_v43  ;;  %v1858_v43 = vperm.slane %v1855_v33, 1 }
 0x4f2   :  { %v1773_v61 = vadd.f32 %v1772_v60, %v1599_v55  ;;  %v1785_v62 = vpop.f32.mrf.mxu1  ;;  %v4449_v55 = vld [vmem:[#allocation11 + $0x58] sm:$0xf0]  ;;  %v5003_v59 = vld [vmem:[#allocation11 + $0x44] sm:$0xf0]  ;;  %v5002_v60 = vld [vmem:[#allocation11 + $0x44] sm:$0xf]  ;;  %2402 = vmatpush.bf16.msrb.mxu2 %v4448_v54 }
 0x4f3   :  { %v1467_v63 = vsel %vm1466_vm14, %v6115_v58, -inf  ;;  %v1480_v0 = vadd.f32 %v1479_v57, %v6115_v58  ;;  %v4452_v56 = vor.u32 %v5004_v53, %v4449_v55  ;;  %v4439_v57 = vld [vmem:[#allocation11 + $0x40] sm:$0xf]  ;;  %v4995_v55 = vld [vmem:[#allocation11 + $0x4] sm:$0xf0] }
 0x4f4   :  { %v1786_v1 = vadd.f32 %v1785_v62, %v1773_v61  ;;  %1468 = vmax.xlane.f32.xlu2 %v1467_v63  ;;  %v4440_v61 = vor.u32 %v5003_v59, %v4439_v57  ;;  %v4441_v62 = vld [vmem:[#allocation11 + $0x48] sm:$0xf0]  ;;  %v5186_v63 = vpop.eup %5185  ;;  %v4407_v54 = vld [vmem:[#allocation11] sm:$0xf]  ;;  %v2088_v57 = vmax.f32 %v2087_v29, 0.0 }
 0x4f5   :  { %v6120_v3 = vmul.f32 10.0, %v1480_v0  ;;  %v4444_v0 = vor.u32 %v5002_v60, %v4441_v62  ;;  %v4408_v59 = vor.u32 %v4995_v55, %v4407_v54  ;;  %v4409_v60 = vld [vmem:[#allocation11 + $0x8] sm:$0xf0]  ;;  %v4495_v62 = vld [vmem:[#allocation11 + $0xb0] sm:$0xf] }
 0x4f6   :  { %vm1815_vm15 = vcmp.gt.f32.partialorder %v1786_v1, 0.0  ;;  %v1817_v4 = vmul.f32 0.01, %v1786_v1  ;;  %v1451_v6 = vpop.f32.mrf.mxu2  ;;  %2403 = vmatpush.bf16.msrb.mxu2 %v4440_v61  ;;  %v5014_v29 = vld [vmem:[#allocation11 + $0xa4] sm:$0xf] }
 0x4f7   :  { %v1482_v7 = vsel %vm1466_vm14, %v6120_v3, -inf  ;;  %v5024_v6 = vld [vmem:[#allocation11 + $0xf4] sm:$0xf] }
 0x4f8   :  { %v1819_v8 = vsel %vm1815_vm15, %v1786_v1, %v1817_v4  ;;  %1483 = vmax.xlane.f32.xlu1 %v1482_v7  ;;  %v4527_v1 = vld [vmem:[#allocation11 + $0xf0] sm:$0xf]  ;;  %v5025_v4 = vld [vmem:[#allocation11 + $0xf4] sm:$0xf0] }
 0x4f9   :  { %v1821_v9 = vpack.c.bf16 %v1819_v8, %v1819_v8  ;;  %v1774_v10 = vpop.f32.mrf.mxu0  ;;  %v1811_v11 = vpop.f32.mrf.mxu3  ;;  %v4528_v7 = vor.u32 %v5025_v4, %v4527_v1  ;;  %v4529_v8 = vld [vmem:[#allocation11 + $0xf8] sm:$0xf0] }
 0x4fa   :  { %v1787_v12 = vpop.f32.mrf.mxu1  ;;  %v4532_v10 = vor.u32 %v5024_v6, %v4529_v8 }
 0x4fb   :  { %2029 = vmatmul.bf16.vlgmr.msra.gmra.mxu0 %v1821_v9  ;;  %2055 = vmatmul.bf16.vlgmr.msra.gmra.mxu2 %v1821_v9  ;;  %v2093_v9 = vadd.f32 1.0, %v5186_v63  ;;  %v5001_v12 = vld [vmem:[#allocation11 + $0x34] sm:$0xf0] }
 0x4fc   :  { %2426 = vmatpush.bf16.msra.mxu0 %v4468_v45  ;;  %2413 = vmatpush.bf16.msrb.mxu3 %v4528_v7  ;;  %v5019_v45 = vld [vmem:[#allocation11 + $0xc4] sm:$0xf0]  ;;  %v5017_v63 = vld [vmem:[#allocation11 + $0xb4] sm:$0xf0]  ;;  %v4497_v7 = vld [vmem:[#allocation11 + $0xb8] sm:$0xf0] }
 0x4fd   :  { %5187 = vlog2.f32 %v2093_v9  ;;  %v4504_v48 = vor.u32 %v5019_v45, %v4503_v44  ;;  %v4496_v6 = vor.u32 %v5017_v63, %v4495_v62 }
 0x4fe   :  { %v1798_v14 = vpop.f32.mrf.mxu2 }
 0x4ff   :  { %v1799_v15 = vadd.f32 %v1798_v14, %v1600_v13  ;;  %v5000_v13 = vld [vmem:[#allocation11 + $0x34] sm:$0xf] }
 0x500   :  { %2427 = vmatpush.bf16.msra.mxu0 %v4460_v50  ;;  %v4505_v50 = vld [vmem:[#allocation11 + $0xc8] sm:$0xf0] }
 0x501   :  { %v1812_v16 = vadd.f32 %v1811_v11, %v1799_v15  ;;  %v1813_v17 = vpop.f32.mrf.mxu3  ;;  %v4431_v11 = vld [vmem:[#allocation11 + $0x30] sm:$0xf]  ;;  %v4433_v15 = vld [vmem:[#allocation11 + $0x38] sm:$0xf0]  ;;  %v4508_v53 = vor.u32 %v5018_v49, %v4505_v50 }
 0x502   :  { %v4432_v14 = vor.u32 %v5001_v12, %v4431_v11  ;;  %v5023_v17 = vld [vmem:[#allocation11 + $0xe4] sm:$0xf0]  ;;  %v4489_v12 = vld [vmem:[#allocation11 + $0xa8] sm:$0xf0] }
 0x503   :  { %vm1816_vm0 = vcmp.gt.f32.partialorder %v1812_v16, 0.0  ;;  %v1818_v18 = vmul.f32 0.01, %v1812_v16  ;;  %v5188_v51 = vpop.eup %5187 }
 0x504   :  { %2428 = vmatpush.bf16.msra.mxu0 %v4452_v56  ;;  %2404 = vmatpush.bf16.msrb.mxu2 %v4432_v14  ;;  %v2095_v4 = vmul.f32 0.6931472, %v5188_v51  ;;  %v4492_v14 = vor.u32 %v5014_v29, %v4489_v12 }
 0x505   :  { %v1820_v19 = vsel %vm1816_vm0, %v1812_v16, %v1818_v18  ;;  %v4519_v16 = vld [vmem:[#allocation11 + $0xe0] sm:$0xf]  ;;  %v4436_v18 = vor.u32 %v5000_v13, %v4433_v15  ;;  %v4479_v15 = vld [vmem:[#allocation11 + $0x90] sm:$0xf] }
 0x506   :  { %v1822_v20 = vpack.c.bf16 %v1820_v19, %v1820_v19  ;;  %v1800_v21 = vpop.f32.mrf.mxu2  ;;  %v4520_v19 = vor.u32 %v5023_v17, %v4519_v16  ;;  %v5013_v16 = vld [vmem:[#allocation11 + $0x94] sm:$0xf0]  ;;  %v5012_v17 = vld [vmem:[#allocation11 + $0x94] sm:$0xf] }
 0x507   :  { %v4521_v21 = vld [vmem:[#allocation11 + $0xe8] sm:$0xf0] }
 0x508   :  { %2042 = vmatmul.bf16.vlgmr.msra.gmra.mxu1 %v1822_v20  ;;  %2068 = vmatmul.bf16.vlgmr.msra.gmra.mxu3 %v1822_v20  ;;  %v5022_v20 = vld [vmem:[#allocation11 + $0xe4] sm:$0xf] }
 0x509   :  { %2429 = vmatpush.bf16.msra.mxu0 %v4444_v0  ;;  %2439 = vmatpush.bf16.msra.mxu1 %v4532_v10  ;;  %v4524_v23 = vor.u32 %v5022_v20, %v4521_v21  ;;  %v5016_v0 = vld [vmem:[#allocation11 + $0xb4] sm:$0xf]  ;;  %v2096_v10 = vadd.f32 %v2095_v4, %v2088_v57  ;;  %v4480_v20 = vor.u32 %v5013_v16, %v4479_v15  ;;  %v4481_v21 = vld [vmem:[#allocation11 + $0x98] sm:$0xf0] }
 0x50a   :  { %2414 = vmatpush.bf16.msrb.mxu3 %v4520_v19  ;;  %v4500_v8 = vor.u32 %v5016_v0, %v4497_v7 }
 0x50b   :  { %4403 = vmatmul.msk.bf16.vlgmr.msrb.gmra.mxu0 %vm925_vm5, %v2146_v22  ;;  %v6144_v19 = vsub.f32 2.0, %v2096_v10 }
 0x50d   :  { %2430 = vmatpush.bf16.msra.mxu0 %v4436_v18  ;;  %2440 = vmatpush.bf16.msra.mxu1 %v4524_v23  ;;  %v4484_v23 = vor.u32 %v5012_v17, %v4481_v21  ;;  %v2115_v0 = vperm.slane %v6144_v19, 0 }
 0x50e   :  { %2415 = vmatpush.bf16.msrb.mxu3 %v4512_v27 }
 0x511   :  { %2431 = vmatpush.bf16.msra.mxu0 %v4428_v30  ;;  %2441 = vmatpush.bf16.msra.mxu1 %v4516_v37  ;;  %v2098_v30 = vmul.f32 -2.0, %v6144_v19  ;;  %v1857_v37 = vperm.slane %v1855_v33, 0  ;;  %v4647_v33 = vld [vmem:[#allocation12 + $0xe0] sm:$0xf] }
 0x512   :  { %2416 = vmatpush.bf16.msrb.mxu3 %v4504_v48 }
 0x515   :  { %2432 = vmatpush.bf16.msra.mxu0 %v4420_v47  ;;  %2442 = vmatpush.bf16.msra.mxu1 %v4508_v53  ;;  %v5221_v47 = vld [vmem:[%s5696_s5] sm:$0xff] }
 0x516   :  { %2417 = vmatpush.bf16.msrb.mxu3 %v4496_v6 }
 0x518   :  { %4404 = vmatmul.msk.bf16.vlgmr.msrb.gmra.mxu1 %vm925_vm5, %v2146_v22  ;;  %v4423_v22 = vld [vmem:[#allocation11 + $0x20] sm:$0xf] }
 0x519   :  { %v4424_v28 = vor.u32 %v4999_v24, %v4423_v22  ;;  %2443 = vmatpush.bf16.msra.mxu1 %v4500_v8 }
 0x51b   :  { %2405 = vmatpush.bf16.msrb.mxu2 %v4424_v28  ;;  %v5010_v28 = vld [vmem:[#allocation11 + $0x84] sm:$0xf] }
 0x51c   :  { %v4476_v27 = vor.u32 %v5010_v28, %v4473_v32  ;;  %v4759_v28 = vld [vmem:[#allocation12 + $0x1c0] sm:$0xf]  ;;  %v5082_v32 = vld [vmem:[#allocation12 + $0x1c4] sm:$0xf] }
 0x51d   :  { %2444 = vmatpush.bf16.msra.mxu1 %v4492_v14 }
 0x51f   :  { %2406 = vmatpush.bf16.msrb.mxu2 %v4416_v42 }
 0x521   :  { %2445 = vmatpush.bf16.msra.mxu1 %v4484_v23  ;;  %v4775_v23 = vld [vmem:[#allocation12 + $0x1e0] sm:$0xf] }
 0x523   :  { %2407 = vmatpush.bf16.msrb.mxu2 %v4408_v59 }
 0x525   :  { %2446 = vmatpush.bf16.msra.mxu1 %v4476_v27  ;;  %v4761_v27 = vld [vmem:[#allocation12 + $0x1d0] sm:$0xf0] }
 0x567   :  { %v1469_v36 = vpop.xlane.xlu2 %1468 }
 0x568   :  { %v1470_v39 = vsub.f32 %v6115_v58, %v1469_v36  ;;  %v4994_v58 = vld [vmem:[#allocation11 + $0x4] sm:$0xf]  ;;  %v2099_v36 = vmul.f32 1.442695, %v2098_v30  ;;  %v5084_v30 = vld [vmem:[#allocation12 + $0x1cc] sm:$0xf0] }
 0x569   :  { %v4412_v61 = vor.u32 %v4994_v58, %v4409_v60 }
 0x56a   :  { %v1471_v46 = vmul.f32 1.442695, %v1470_v39  ;;  %v2149_v39 = vld [vmem:[%s6362_s21] sm:$0x3] }
 0x56b   :  { %v1484_v52 = vpop.xlane.xlu1 %1483  ;;  %2433 = vmatpush.bf16.msra.mxu0 %v4412_v61  ;;  %v2151_v42 = vperm.slane %v2149_v39, 0  ;;  %v5222_v61 = vld [vmem:[%s5696_s5 + $0x8] sm:$0xff]  ;;  %v2152_v8 = vperm.slane %v2149_v39, 1  ;;  %v4764_v39 = vor.u32 %v5082_v32, %v4761_v27  ;;  %v4679_v32 = vld [vmem:[#allocation12 + $0x120] sm:$0xf]  ;;  %s6363_s5 = sld [smem:[#allocation52_spill]] }
 0x56c   :  { %5189 = vpow2.f32 %v1471_v46  ;;  %v1485_v56 = vsub.f32 %v6120_v3, %v1484_v52  ;;  %v4487_v3 = vld [vmem:[#allocation11 + $0xa0] sm:$0xf]  ;;  %v5064_v27 = vld [vmem:[#allocation12 + $0x12c] sm:$0xf0] }
 0x56d   :  { %v4488_v11 = vor.u32 %v5015_v35, %v4487_v3  ;;  %v2116_v3 = vperm.slane %v6144_v19, 1  ;;  %v5086_v19 = vld [vmem:[#allocation12 + $0x1e4] sm:$0xf] }
 0x56e   :  { %v1486_v1 = vmul.f32 1.442695, %v1485_v56 }
 0x56f   :  { %2418 = vmatpush.bf16.msrb.mxu3 %v4488_v11 }
 0x570   :  { %5191 = vpow2.f32 %v1486_v1 }
 0x571   :  { %5193 = vpow2.f32 %v2099_v36  ;;  %v5056_v36 = vld [vmem:[#allocation12 + $0xec] sm:$0xf0] }
 0x572   :  { %v6138_v9 = vpop.eup %5189 }
 0x573   :  { %v1473_v13 = vsel %vm1466_vm14, %v6138_v9, 0.0  ;;  %2419 = vmatpush.bf16.msrb.mxu3 %v4480_v20 }
 0x574   :  { %1474 = vadd.xlane.f32.xlu0 %v1473_v13 }
 0x576   :  { %v6142_v18 = vpop.eup %5191 }
 0x577   :  { %v1488_v22 = vsel %vm1466_vm14, %v6142_v18, 0.0  ;;  %2420 = vmatpush.bf16.msrb.mxu3 %v4472_v31  ;;  %v5194_v46 = vpop.eup %5193  ;;  %v4780_v31 = vor.u32 %v5086_v19, %v4777_v26  ;;  %v4583_v19 = vld [vmem:[#allocation12 + $0x60] sm:$0xf]  ;;  %v5038_v26 = vld [vmem:[#allocation12 + $0x64] sm:$0xf] }
 0x578   :  { %v2030_v24 = vpop.f32.mrf.mxu0  ;;  %1489 = vadd.xlane.f32.xlu2 %v1488_v22  ;;  %v2108_v53 = vperm.slane %v5194_v46, 0  ;;  %v2109_v4 = vperm.slane %v5194_v46, 1  ;;  %v4631_v46 = vld [vmem:[#allocation12 + $0xc0] sm:$0xf] }
 0x579   :  { %v2031_v40 = vadd.f32 %v2030_v24, %v1857_v37  ;;  %v5088_v24 = vld [vmem:[#allocation12 + $0x1ec] sm:$0xf0]  ;;  %v5054_v37 = vld [vmem:[#allocation12 + $0xe4] sm:$0xf]  ;;  %2893 = vmatpush.bf16.msrb.mxu1 %v4780_v31 }
 0x57a   :  { %v4776_v25 = vor.u32 %v5088_v24, %v4775_v23 }
 0x57c   :  { %2867 = vmatpush.bf16.msra.mxu3 %v4776_v25  ;;  %v5040_v25 = vld [vmem:[#allocation12 + $0x6c] sm:$0xf0] }
 0x57d   :  { %2894 = vmatpush.bf16.msrb.mxu1 %v4764_v39 }
 0x57e   :  { %v2056_v34 = vpop.f32.mrf.mxu2 }
 0x57f   :  { %v2057_v51 = vadd.f32 %v2056_v34, %v1858_v43  ;;  %v4760_v34 = vor.u32 %v5084_v30, %v4759_v28  ;;  %v5080_v43 = vld [vmem:[#allocation12 + $0x1ac] sm:$0xf0]  ;;  %v4584_v28 = vor.u32 %v5040_v25, %v4583_v19  ;;  %v4585_v30 = vld [vmem:[#allocation12 + $0x70] sm:$0xf0]  ;;  %v4753_v19 = vld [vmem:[#allocation12 + $0x1b8] sm:$0xf0] }
 0x580   :  { %v2032_v38 = vpop.f32.mrf.mxu0  ;;  %v4588_v31 = vor.u32 %v5038_v26, %v4585_v30  ;;  %v4639_v26 = vld [vmem:[#allocation12 + $0xc8] sm:$0xf]  ;;  %v5051_v30 = vld [vmem:[#allocation12 + $0xcc] sm:$0xf] }
 0x581   :  { %v4649_v38 = vld [vmem:[#allocation12 + $0xf0] sm:$0xf0]  ;;  %2868 = vmatpush.bf16.msra.mxu3 %v4760_v34 }
 0x585   :  { %v2043_v41 = vpop.f32.mrf.mxu1 }
 0x586   :  { %v2044_v44 = vadd.f32 %v2043_v41, %v2031_v40  ;;  %v2058_v45 = vpop.f32.mrf.mxu2  ;;  %v4648_v40 = vor.u32 %v5056_v36, %v4647_v33  ;;  %v4652_v41 = vor.u32 %v5054_v37, %v4649_v38  ;;  %v5062_v33 = vld [vmem:[#allocation12 + $0x124] sm:$0xf]  ;;  %v4680_v36 = vor.u32 %v5064_v27, %v4679_v32  ;;  %v4681_v37 = vld [vmem:[#allocation12 + $0x130] sm:$0xf0]  ;;  %v4641_v32 = vld [vmem:[#allocation12 + $0xd8] sm:$0xf0] }
 0x587   :  { %v4745_v45 = vld [vmem:[#allocation12 + $0x1b0] sm:$0xf0]  ;;  %v4684_v39 = vor.u32 %v5062_v33, %v4681_v37  ;;  %v4644_v27 = vor.u32 %v5051_v30, %v4641_v32  ;;  %v4735_v33 = vld [vmem:[#allocation12 + $0x188] sm:$0xf]  ;;  %v5031_v30 = vld [vmem:[#allocation12 + $0x2c] sm:$0xf] }
 0x588   :  { %2073 = vst [vmem:[#allocation26] sm:$0xff] %v2044_v44  ;;  %v2101_v48 = vsub.f32 %v2044_v44, %v5221_v47  ;;  %v2177_v49 = vpop.f32.mrf.mxu0  ;;  %v5078_v44 = vld [vmem:[#allocation12 + $0x1a4] sm:$0xf]  ;;  %v5052_v47 = vld [vmem:[#allocation12 + $0xcc] sm:$0xf0]  ;;  %2854 = vmatpush.bf16.msra.mxu2 %v4648_v40  ;;  %2880 = vmatpush.bf16.msrb.mxu0 %v4652_v41 }
 0x589   :  { %v2178_v50 = vadd.f32 %v2177_v49, %v2151_v42  ;;  %v4743_v42 = vld [vmem:[#allocation12 + $0x1a0] sm:$0xf]  ;;  %v5050_v49 = vld [vmem:[#allocation12 + $0xc4] sm:$0xf]  ;;  %v5036_v41 = vld [vmem:[#allocation12 + $0x4c] sm:$0xf0] }
 0x58a   :  { %v2103_v52 = vmul.f32 %v2101_v48, %v2101_v48  ;;  %v4632_v48 = vor.u32 %v5052_v47, %v4631_v46  ;;  %v4567_v40 = vld [vmem:[#allocation12 + $0x40] sm:$0xf]  ;;  %v5060_v47 = vld [vmem:[#allocation12 + $0x10c] sm:$0xf0] }
 0x58b   :  { %vm2194_vm1 = vcmp.gt.f32.partialorder %v2178_v50, 0.0  ;;  %v2196_v54 = vmul.f32 0.01, %v2178_v50  ;;  %v2069_v55 = vpop.f32.mrf.mxu3  ;;  %v4663_v46 = vld [vmem:[#allocation12 + $0x100] sm:$0xf] }
 0x58c   :  { %v2105_v58 = vmul.f32 0.5, %v2103_v52  ;;  %v2070_v56 = vadd.f32 %v2069_v55, %v2057_v51  ;;  %v4744_v51 = vor.u32 %v5080_v43, %v4743_v42  ;;  %v4748_v55 = vor.u32 %v5078_v44, %v4745_v45  ;;  %2855 = vmatpush.bf16.msra.mxu2 %v4632_v48  ;;  %v5034_v42 = vld [vmem:[#allocation12 + $0x44] sm:$0xf]  ;;  %v4569_v44 = vld [vmem:[#allocation12 + $0x50] sm:$0xf0] }
 0x58d   :  { %v2198_v57 = vsel %vm2194_vm1, %v2178_v50, %v2196_v54  ;;  %v2045_v59 = vpop.f32.mrf.mxu1  ;;  %v4633_v50 = vld [vmem:[#allocation12 + $0xd0] sm:$0xf0]  ;;  %v5076_v54 = vld [vmem:[#allocation12 + $0x18c] sm:$0xf0]  ;;  %v4568_v43 = vor.u32 %v5036_v41, %v4567_v40  ;;  %v4572_v45 = vor.u32 %v5034_v42, %v4569_v44  ;;  %v4623_v41 = vld [vmem:[#allocation12 + $0xa8] sm:$0xf] }
 0x58e   :  { %v2200_v60 = vpack.c.bf16 %v2198_v57, %v2198_v57  ;;  %2074 = vst [vmem:[#allocation26 + $0x8] sm:$0xff] %v2070_v56  ;;  %v2102_v62 = vsub.f32 %v2070_v56, %v5222_v61  ;;  %v2112_v63 = vmul.f32 %v2108_v53, %v2105_v58  ;;  %v4636_v52 = vor.u32 %v5050_v49, %v4633_v50  ;;  %v4727_v53 = vld [vmem:[#allocation12 + $0x180] sm:$0xf]  ;;  %v5048_v56 = vld [vmem:[#allocation12 + $0xac] sm:$0xf0] }
 0x58f   :  { %v4615_v58 = vld [vmem:[#allocation12 + $0xa0] sm:$0xf]  ;;  %v5046_v57 = vld [vmem:[#allocation12 + $0xa4] sm:$0xf]  ;;  %v4617_v61 = vld [vmem:[#allocation12 + $0xb0] sm:$0xf0]  ;;  %2869 = vmatpush.bf16.msra.mxu3 %v4744_v51  ;;  %2895 = vmatpush.bf16.msrb.mxu1 %v4748_v55  ;;  %v4664_v49 = vor.u32 %v5060_v47, %v4663_v46 }
 0x590   :  { %v2104_v1 = vmul.f32 %v2102_v62, %v2102_v62  ;;  %v2179_v6 = vpop.f32.mrf.mxu0  ;;  %2408 = vmatmul.bf16.vlgmr.msrb.gmra.mxu2 %v2200_v60  ;;  %2434 = vmatmul.bf16.vlgmr.msra.gmra.mxu0 %v2200_v60  ;;  %v2119_v29 = vadd.f32 %v2115_v0, %v2112_v63  ;;  %v5074_v59 = vld [vmem:[#allocation12 + $0x184] sm:$0xf]  ;;  %v4729_v60 = vld [vmem:[#allocation12 + $0x190] sm:$0xf0]  ;;  %v4616_v62 = vor.u32 %v5048_v56, %v4615_v58  ;;  %v4599_v0 = vld [vmem:[#allocation12 + $0x80] sm:$0xf] }
 0x591   :  { %2881 = vmatpush.bf16.msrb.mxu0 %v4636_v52  ;;  %v4620_v63 = vor.u32 %v5046_v57, %v4617_v61  ;;  %v5042_v6 = vld [vmem:[#allocation12 + $0x84] sm:$0xf]  ;;  %v4665_v50 = vld [vmem:[#allocation12 + $0x110] sm:$0xf0]  ;;  %v4783_v51 = vld [vmem:[#allocation12 + $0x1e8] sm:$0xf] }
 0x592   :  { %v2106_v7 = vmul.f32 0.5, %v2104_v1  ;;  %v2121_v14 = vadd.f32 0.9189385, %v2119_v29  ;;  %v4728_v1 = vor.u32 %v5076_v54, %v4727_v53  ;;  %v5070_v29 = vld [vmem:[#allocation12 + $0x164] sm:$0xf]  ;;  %2856 = vmatpush.bf16.msra.mxu2 %v4616_v62 }
 0x593   :  { %v2071_v35 = vpop.f32.mrf.mxu3  ;;  %v5089_v54 = vld [vmem:[#allocation12 + $0x1f4] sm:$0xf0]  ;;  %v5087_v55 = vld [vmem:[#allocation12 + $0x1ec] sm:$0xf]  ;;  %v4785_v58 = vld [vmem:[#allocation12 + $0x1f8] sm:$0xf0] }
 0x594   :  { %v2113_v10 = vmul.f32 %v2109_v4, %v2106_v7  ;;  %v5044_v4 = vld [vmem:[#allocation12 + $0x8c] sm:$0xf0]  ;;  %v4601_v7 = vld [vmem:[#allocation12 + $0x90] sm:$0xf0]  ;;  %2870 = vmatpush.bf16.msra.mxu3 %v4728_v1  ;;  %v4784_v56 = vor.u32 %v5089_v54, %v4783_v51  ;;  %v4788_v57 = vor.u32 %v5087_v55, %v4785_v58  ;;  %v5030_v61 = vld [vmem:[#allocation12 + $0x24] sm:$0xf] }
 0x595   :  { %v2190_v11 = vpop.f32.mrf.mxu1  ;;  %v5072_v35 = vld [vmem:[#allocation12 + $0x16c] sm:$0xf0]  ;;  %2882 = vmatpush.bf16.msrb.mxu0 %v4620_v63  ;;  %v4553_v63 = vld [vmem:[#allocation12 + $0x30] sm:$0xf0]  ;;  %v5085_v1 = vld [vmem:[#allocation12 + $0x1d4] sm:$0xf0] }
 0x596   :  { %v2191_v12 = vadd.f32 %v2190_v11, %v2152_v8  ;;  %v2120_v13 = vadd.f32 %v2116_v3, %v2113_v10  ;;  %v4732_v8 = vor.u32 %v5074_v59, %v4729_v60  ;;  %v4711_v3 = vld [vmem:[#allocation12 + $0x160] sm:$0xf]  ;;  %v4713_v10 = vld [vmem:[#allocation12 + $0x170] sm:$0xf0]  ;;  %v4600_v11 = vor.u32 %v5044_v4, %v4599_v0  ;;  %v5032_v60 = vld [vmem:[#allocation12 + $0x2c] sm:$0xf0] }
 0x597   :  { %v4551_v59 = vld [vmem:[#allocation12 + $0x20] sm:$0xf]  ;;  %v4767_v0 = vld [vmem:[#allocation12 + $0x1c8] sm:$0xf]  ;;  %v5083_v4 = vld [vmem:[#allocation12 + $0x1cc] sm:$0xf] }
 0x598   :  { %vm2195_vm2 = vcmp.gt.f32.partialorder %v2191_v12, 0.0  ;;  %v2197_v15 = vmul.f32 0.01, %v2191_v12  ;;  %v2122_v16 = vadd.f32 0.9189385, %v2120_v13  ;;  %v4712_v13 = vor.u32 %v5072_v35, %v4711_v3  ;;  %2896 = vmatpush.bf16.msrb.mxu1 %v4732_v8  ;;  %2857 = vmatpush.bf16.msra.mxu2 %v4600_v11 }
 0x599   :  { %v4552_v62 = vor.u32 %v5032_v60, %v4551_v59  ;;  %v4535_v3 = vld [vmem:[#allocation12] sm:$0xf]  ;;  %v5028_v35 = vld [vmem:[#allocation12 + $0xc] sm:$0xf0]  ;;  %v4537_v11 = vld [vmem:[#allocation12 + $0x10] sm:$0xf0] }
 0x59a   :  { %v2199_v17 = vsel %vm2195_vm2, %v2191_v12, %v2197_v15  ;;  %v2123_v20 = vadd.f32 %v2122_v16, %v2121_v14  ;;  %v4604_v12 = vor.u32 %v5042_v6, %v4601_v7  ;;  %v4716_v14 = vor.u32 %v5070_v29, %v4713_v10  ;;  %v4695_v15 = vld [vmem:[#allocation12 + $0x140] sm:$0xf]  ;;  %v5068_v16 = vld [vmem:[#allocation12 + $0x14c] sm:$0xf0]  ;;  %2871 = vmatpush.bf16.msra.mxu3 %v4712_v13  ;;  %v4769_v6 = vld [vmem:[#allocation12 + $0x1d8] sm:$0xf0] }
 0x59b   :  { %v2201_v21 = vpack.c.bf16 %v2199_v17, %v2199_v17  ;;  %v5066_v17 = vld [vmem:[#allocation12 + $0x144] sm:$0xf]  ;;  %v4768_v7 = vor.u32 %v5085_v1, %v4767_v0  ;;  %v4772_v8 = vor.u32 %v5083_v4, %v4769_v6  ;;  %v4536_v10 = vor.u32 %v5028_v35, %v4535_v3  ;;  %v5057_v13 = vld [vmem:[#allocation12 + $0xf4] sm:$0xf0]  ;;  %v4719_v47 = vld [vmem:[#allocation12 + $0x168] sm:$0xf] }
 0x59c   :  { %2124 = vadd.xlane.f32.xlu2 %v2123_v20  ;;  %v4697_v20 = vld [vmem:[#allocation12 + $0x150] sm:$0xf0]  ;;  %2883 = vmatpush.bf16.msrb.mxu0 %v4604_v12  ;;  %v5026_v29 = vld [vmem:[#allocation12 + $0x4] sm:$0xf]  ;;  %v4655_v12 = vld [vmem:[#allocation12 + $0xe8] sm:$0xf] }
 0x59d   :  { %v2192_v22 = vpop.f32.mrf.mxu1  ;;  %2421 = vmatmul.bf16.vlgmr.msrb.gmra.mxu3 %v2201_v21  ;;  %2447 = vmatmul.bf16.vlgmr.msra.gmra.mxu1 %v2201_v21  ;;  %v4700_v23 = vor.u32 %v5066_v17, %v4697_v20  ;;  %v4657_v17 = vld [vmem:[#allocation12 + $0xf8] sm:$0xf0]  ;;  %v5049_v42 = vld [vmem:[#allocation12 + $0xb4] sm:$0xf0]  ;;  %v5043_v54 = vld [vmem:[#allocation12 + $0x8c] sm:$0xf] }
 0x59e   :  { %v4696_v22 = vor.u32 %v5068_v16, %v4695_v15  ;;  %2897 = vmatpush.bf16.msrb.mxu1 %v4716_v14  ;;  %2858 = vmatpush.bf16.msra.mxu2 %v4584_v28  ;;  %v4540_v14 = vor.u32 %v5026_v29, %v4537_v11  ;;  %v4656_v15 = vor.u32 %v5057_v13, %v4655_v12  ;;  %v5055_v16 = vld [vmem:[#allocation12 + $0xec] sm:$0xf]  ;;  %v5053_v28 = vld [vmem:[#allocation12 + $0xd4] sm:$0xf0]  ;;  %v4609_v58 = vld [vmem:[#allocation12 + $0x98] sm:$0xf0] }
 0x59f   :  { %v4660_v20 = vor.u32 %v5055_v16, %v4657_v17  ;;  %v4624_v44 = vor.u32 %v5049_v42, %v4623_v41  ;;  %v5069_v59 = vld [vmem:[#allocation12 + $0x154] sm:$0xf0]  ;;  %v5067_v60 = vld [vmem:[#allocation12 + $0x14c] sm:$0xf]  ;;  %v4591_v0 = vld [vmem:[#allocation12 + $0x68] sm:$0xf] }
 0x5a0   :  { %2872 = vmatpush.bf16.msra.mxu3 %v4696_v22  ;;  %2884 = vmatpush.bf16.msrb.mxu0 %v4588_v31  ;;  %v5081_v22 = vld [vmem:[#allocation12 + $0x1b4] sm:$0xf0]  ;;  %v4640_v31 = vor.u32 %v5053_v28, %v4639_v26  ;;  %v5039_v1 = vld [vmem:[#allocation12 + $0x6c] sm:$0xf]  ;;  %v4593_v6 = vld [vmem:[#allocation12 + $0x78] sm:$0xf0] }
 0x5a1   :  { %v4596_v3 = vor.u32 %v5039_v1, %v4593_v6  ;;  %v5063_v29 = vld [vmem:[#allocation12 + $0x12c] sm:$0xf]  ;;  %v4575_v11 = vld [vmem:[#allocation12 + $0x48] sm:$0xf]  ;;  %v5037_v13 = vld [vmem:[#allocation12 + $0x54] sm:$0xf0] }
 0x5a2   :  { %2898 = vmatpush.bf16.msrb.mxu1 %v4700_v23  ;;  %2859 = vmatpush.bf16.msra.mxu2 %v4568_v43  ;;  %v5079_v23 = vld [vmem:[#allocation12 + $0x1ac] sm:$0xf]  ;;  %v4576_v16 = vor.u32 %v5037_v13, %v4575_v11  ;;  %v4671_v17 = vld [vmem:[#allocation12 + $0x108] sm:$0xf]  ;;  %v4545_v42 = vld [vmem:[#allocation12 + $0x18] sm:$0xf0] }
 0x5a3   :  { %v4756_v25 = vor.u32 %v5079_v23, %v4753_v19  ;;  %v5047_v43 = vld [vmem:[#allocation12 + $0xac] sm:$0xf]  ;;  %v4559_v19 = vld [vmem:[#allocation12 + $0x28] sm:$0xf]  ;;  %v2524_v13 = vld [vmem:[%s6364_s28] sm:$0xf] }
 0x5a4   :  { %2873 = vmatpush.bf16.msra.mxu3 %v4680_v36  ;;  %2885 = vmatpush.bf16.msrb.mxu0 %v4572_v45  ;;  %v5075_v36 = vld [vmem:[#allocation12 + $0x18c] sm:$0xf]  ;;  %v4625_v45 = vld [vmem:[#allocation12 + $0xb8] sm:$0xf0] }
 0x5a5   :  { %v4628_v46 = vor.u32 %v5047_v43, %v4625_v45 }
 0x5a6   :  { %2899 = vmatpush.bf16.msrb.mxu1 %v4684_v39  ;;  %2860 = vmatpush.bf16.msra.mxu2 %v4552_v62  ;;  %v4737_v39 = vld [vmem:[#allocation12 + $0x198] sm:$0xf0] }
 0x5a7   :  { %v4740_v40 = vor.u32 %v5075_v36, %v4737_v39  ;;  %v4705_v62 = vld [vmem:[#allocation12 + $0x158] sm:$0xf0]  ;;  %v5029_v39 = vld [vmem:[#allocation12 + $0x14] sm:$0xf0] }
 0x5a8   :  { %2874 = vmatpush.bf16.msra.mxu3 %v4664_v49  ;;  %v5071_v49 = vld [vmem:[#allocation12 + $0x16c] sm:$0xf] }
 0x5aa   :  { %2861 = vmatpush.bf16.msra.mxu2 %v4536_v10  ;;  %v4689_v10 = vld [vmem:[#allocation12 + $0x138] sm:$0xf0] }
 0x5ab   :  { %v4692_v12 = vor.u32 %v5063_v29, %v4689_v10 }
 0x5ac   :  { %2919 = vmatpush.bf16.msrb.mxu3 %v4784_v56  ;;  %v4612_v56 = vor.u32 %v5043_v54, %v4609_v58 }
 0x5ae   :  { %2906 = vmatpush.bf16.msrb.mxu2 %v4656_v15  ;;  %v4577_v15 = vld [vmem:[#allocation12 + $0x58] sm:$0xf0] }
 0x5b0   :  { %2920 = vmatpush.bf16.msrb.mxu3 %v4768_v7  ;;  %v4687_v7 = vld [vmem:[#allocation12 + $0x128] sm:$0xf] }
 0x5b2   :  { %2907 = vmatpush.bf16.msrb.mxu2 %v4640_v31  ;;  %v4561_v31 = vld [vmem:[#allocation12 + $0x38] sm:$0xf0] }
 0x5b3   :  { %v4564_v36 = vor.u32 %v5031_v30, %v4561_v31 }
 0x5b6   :  { %2908 = vmatpush.bf16.msrb.mxu2 %v4624_v44 }
 0x5e7   :  { %v1475_v21 = vpop.xlane.xlu0 %1474 }
 0x5e8   :  { %5195 = vrcp.f32 %v1475_v21  ;;  %v4751_v21 = vld [vmem:[#allocation12 + $0x1a8] sm:$0xf] }
 0x5eb   :  { %v1490_v24 = vpop.xlane.xlu2 %1489 }
 0x5ec   :  { %5197 = vrcp.f32 %v1490_v24  ;;  %v4752_v24 = vor.u32 %v5081_v22, %v4751_v21  ;;  %v5059_v21 = vld [vmem:[#allocation12 + $0x10c] sm:$0xf] }
 0x5ee   :  { %v5196_v34 = vpop.eup %5195  ;;  %2921 = vmatpush.bf16.msrb.mxu3 %v4752_v24  ;;  %v4673_v24 = vld [vmem:[#allocation12 + $0x118] sm:$0xf0] }
 0x5ef   :  { %v6156_v38 = vmul.f32 %v5196_v34, %v6138_v9  ;;  %v5058_v9 = vld [vmem:[#allocation12 + $0x104] sm:$0xf]  ;;  %v5077_v34 = vld [vmem:[#allocation12 + $0x194] sm:$0xf0]  ;;  %v4676_v28 = vor.u32 %v5059_v21, %v4673_v24 }
 0x5f0   :  { %v4668_v53 = vor.u32 %v5058_v9, %v4665_v50  ;;  %v4736_v37 = vor.u32 %v5077_v34, %v4735_v33  ;;  %v4721_v50 = vld [vmem:[#allocation12 + $0x178] sm:$0xf0]  ;;  %v2234_v34 = vld [vmem:[%s6363_s5] sm:$0x3] }
 0x5f1   :  { %1478 = vst.msk [vmem:[#allocation23] sm:$0xff] %vm1466_vm14, %v6156_v38  ;;  %v4724_v51 = vor.u32 %v5071_v49, %v4721_v50  ;;  %v2237_v44 = vperm.slane %v2234_v34, 1  ;;  %v2236_v49 = vperm.slane %v2234_v34, 0 }
 0x5f2   :  { %v5198_v48 = vpop.eup %5197  ;;  %2900 = vmatpush.bf16.msrb.mxu1 %v4668_v53  ;;  %2922 = vmatpush.bf16.msrb.mxu3 %v4736_v37  ;;  %v5045_v53 = vld [vmem:[#allocation12 + $0x94] sm:$0xf0]  ;;  %v4543_v37 = vld [vmem:[#allocation12 + $0x8] sm:$0xf] }
 0x5f3   :  { %v1492_v52 = vmul.f32 %v5198_v48, %v6142_v18  ;;  %v4556_v18 = vor.u32 %v5030_v61, %v4553_v63  ;;  %v5073_v48 = vld [vmem:[#allocation12 + $0x174] sm:$0xf0]  ;;  %v4708_v63 = vor.u32 %v5067_v60, %v4705_v62  ;;  %v4544_v43 = vor.u32 %v5029_v39, %v4543_v37 }
 0x5f4   :  { %v4720_v9 = vor.u32 %v5073_v48, %v4719_v47  ;;  %v5667_v62 = vmov 8.0  }
 0x5f5   :  { %1493 = vst.msk [vmem:[#allocation24] sm:$0xff] %vm1466_vm14, %v1492_v52  ;;  %2886 = vmatpush.bf16.msrb.mxu0 %v4556_v18  ;;  %v4607_v52 = vld [vmem:[#allocation12 + $0x88] sm:$0xf]  ;;  %v5041_v18 = vld [vmem:[#allocation12 + $0x74] sm:$0xf0]  ;;  %5199 = vrcp.f32 %v5667_v62 }
 0x5f6   :  { %2945 = vmatpush.bf16.msra.mxu1 %v4788_v57  ;;  %v4608_v55 = vor.u32 %v5045_v53, %v4607_v52  ;;  %2923 = vmatpush.bf16.msrb.mxu3 %v4720_v9  ;;  %v4703_v57 = vld [vmem:[#allocation12 + $0x148] sm:$0xf]  ;;  %v4592_v4 = vor.u32 %v5041_v18, %v4591_v0 }
 0x5f7   :  { %v4704_v61 = vor.u32 %v5069_v59, %v4703_v57 }
 0x5f8   :  { %2909 = vmatpush.bf16.msrb.mxu2 %v4608_v55 }
 0x5f9   :  { %2887 = vmatpush.bf16.msrb.mxu0 %v4540_v14  ;;  %v5035_v14 = vld [vmem:[#allocation12 + $0x4c] sm:$0xf] }
 0x5fa   :  { %2946 = vmatpush.bf16.msra.mxu1 %v4772_v8  ;;  %v5065_v8 = vld [vmem:[#allocation12 + $0x134] sm:$0xf0]  ;;  %2924 = vmatpush.bf16.msrb.mxu3 %v4704_v61  ;;  %v4580_v23 = vor.u32 %v5035_v14, %v4577_v15  ;;  %v2527_v14 = vperm.slane %v2524_v13, 1 }
 0x5fb   :  { %v4688_v35 = vor.u32 %v5065_v8, %v4687_v7 }
 0x5fc   :  { %2910 = vmatpush.bf16.msrb.mxu2 %v4592_v4 }
 0x5fd   :  { %2932 = vmatpush.bf16.msra.mxu0 %v4660_v20  ;;  %v5061_v20 = vld [vmem:[#allocation12 + $0x114] sm:$0xf0] }
 0x5fe   :  { %2947 = vmatpush.bf16.msra.mxu1 %v4756_v25  ;;  %v5033_v25 = vld [vmem:[#allocation12 + $0x34] sm:$0xf0]  ;;  %2925 = vmatpush.bf16.msrb.mxu3 %v4688_v35  ;;  %v4672_v26 = vor.u32 %v5061_v20, %v4671_v17 }
 0x5ff   :  { %v4560_v33 = vor.u32 %v5033_v25, %v4559_v19 }
 0x600   :  { %2911 = vmatpush.bf16.msrb.mxu2 %v4576_v16 }
 0x601   :  { %2933 = vmatpush.bf16.msra.mxu0 %v4644_v27 }
 0x602   :  { %2948 = vmatpush.bf16.msra.mxu1 %v4740_v40  ;;  %2926 = vmatpush.bf16.msrb.mxu3 %v4672_v26  ;;  %v5027_v40 = vld [vmem:[#allocation12 + $0xc] sm:$0xf] }
 0x604   :  { %2912 = vmatpush.bf16.msrb.mxu2 %v4560_v33 }
 0x605   :  { %2934 = vmatpush.bf16.msra.mxu0 %v4628_v46  ;;  %v4548_v46 = vor.u32 %v5027_v40, %v4545_v42  ;;  %v2528_v42 = vperm.slane %v2524_v13, 2 }
 0x606   :  { %2949 = vmatpush.bf16.msra.mxu1 %v4724_v51 }
 0x608   :  { %2913 = vmatpush.bf16.msrb.mxu2 %v4544_v43 }
 0x609   :  { %2935 = vmatpush.bf16.msra.mxu0 %v4612_v56 }
 0x60a   :  { %2950 = vmatpush.bf16.msra.mxu1 %v4708_v63  ;;  %v5200_v63 = vpop.eup %5199 }
 0x60b   :  { %v2138_v0 = vmul.f32 8.0, %v5200_v63  ;;  %vm2142_vm8 = vweird.f32 %v5200_v63 }
 0x60d   :  { %v2435_v22 = vpop.f32.mrf.mxu0  ;;  %2936 = vmatpush.bf16.msra.mxu0 %v4596_v3  ;;  %v2139_v4 = vsub.f32 1.0, %v2138_v0 }
 0x60e   :  { %2951 = vmatpush.bf16.msra.mxu1 %v4692_v12  ;;  %v2436_v47 = vadd.f32 %v2435_v22, %v2237_v44  ;;  %v2526_v22 = vperm.slane %v2524_v13, 0 }
 0x60f   :  { %v2125_v32 = vpop.xlane.xlu2 %2124  ;;  %v2140_v8 = vmul.f32 %v5200_v63, %v2139_v4 }
 0x610   :  { %v2127_v27 = vsel %vm2126_vm3, %v2125_v32, 0.0  ;;  %v2529_v32 = vperm.slane %v2524_v13, 3 }
 0x611   :  { %2128 = vadd.xlane.f32.xlu0 %v2127_v27  ;;  %2937 = vmatpush.bf16.msra.mxu0 %v4580_v23  ;;  %v2141_v29 = vadd.f32 %v5200_v63, %v2140_v8 }
 0x612   :  { %2952 = vmatpush.bf16.msra.mxu1 %v4676_v28 }
 0x613   :  { %v2409_v41 = vpop.f32.mrf.mxu2  ;;  %v6164_v11 = vsel %vm2142_vm8, %v5200_v63, %v2141_v29 }
 0x614   :  { %v2410_v52 = vadd.f32 %v2409_v41, %v2236_v49 }
 0x615   :  { %v2437_v45 = vpop.f32.mrf.mxu0  ;;  %2938 = vmatpush.bf16.msra.mxu0 %v4564_v36 }
 0x619   :  { %2939 = vmatpush.bf16.msra.mxu0 %v4548_v46 }
 0x61a   :  { %v2448_v48 = vpop.f32.mrf.mxu1 }
 0x61b   :  { %v2411_v9 = vpop.f32.mrf.mxu2  ;;  %v2449_v50 = vadd.f32 %v2448_v48, %v2436_v47 }
 0x61d   :  { %vm2453_vm4 = vcmp.gt.f32.partialorder %v2449_v50, 0.0  ;;  %v2455_v51 = vmul.f32 0.01, %v2449_v50 }
 0x61f   :  { %v2457_v53 = vsel %vm2453_vm4, %v2449_v50, %v2455_v51 }
 0x620   :  { %v2459_v54 = vpack.c.bf16 %v2457_v53, %v2457_v53  ;;  %v2422_v55 = vpop.f32.mrf.mxu3 }
 0x621   :  { %v2423_v58 = vadd.f32 %v2422_v55, %v2410_v52 }
 0x622   :  { %v2450_v56 = vpop.f32.mrf.mxu1  ;;  %2875 = vmatmul.bf16.vlgmr.msra.gmra.mxu3 %v2459_v54  ;;  %2901 = vmatmul.bf16.vlgmr.msrb.gmra.mxu1 %v2459_v54 }
 0x623   :  { %vm2452_vm7 = vcmp.gt.f32.partialorder %v2423_v58, 0.0  ;;  %v2454_v57 = vmul.f32 0.01, %v2423_v58 }
 0x625   :  { %v2456_v59 = vsel %vm2452_vm7, %v2423_v58, %v2454_v57 }
 0x626   :  { %v2458_v60 = vpack.c.bf16 %v2456_v59, %v2456_v59 }
 0x628   :  { %v2424_v61 = vpop.f32.mrf.mxu3  ;;  %2862 = vmatmul.bf16.vlgmr.msra.gmra.mxu2 %v2458_v60  ;;  %2888 = vmatmul.bf16.vlgmr.msrb.gmra.mxu0 %v2458_v60 }
 0x632   :  { %2927 = vmatmul.bf16.vlgmr.msrb.gmra.mxu3 %v2459_v54  ;;  %2953 = vmatmul.bf16.vlgmr.msra.gmra.mxu1 %v2459_v54 }
 0x638   :  { %2914 = vmatmul.bf16.vlgmr.msrb.gmra.mxu2 %v2458_v60  ;;  %2940 = vmatmul.bf16.vlgmr.msra.gmra.mxu0 %v2458_v60 }
 0x684   :  { %v2129_v18 = vpop.xlane.xlu0 %2128 }
 0x685   :  { %v2130_v1 = vrot.slane %v2129_v18, 4 }
 0x687   :  { %v2131_v6 = vadd.f32 %v2130_v1, %v2129_v18 }
 0x689   :  { %v2132_v7 = vrot.slane %v2131_v6, 2 }
 0x68b   :  { %v2133_v3 = vadd.f32 %v2132_v7, %v2131_v6 }
 0x68d   :  { %v2134_v35 = vrot.slane %v2133_v3, 1 }
 0x68f   :  { %v2135_v10 = vadd.f32 %v2134_v35, %v2133_v3 }
 0x691   :  { %5090 = vpush %v2135_v10 }
 0x692   :  { %5092 = vpush %v6164_v11 }
 0x69f   :  { %v2902_v12 = vpop.f32.mrf.mxu1 }
 0x6a5   :  { %v2876_v15 = vpop.f32.mrf.mxu3  ;;  %v2889_v16 = vpop.f32.mrf.mxu0 }
 0x6a6   :  { %v2890_v17 = vadd.f32 %v2889_v16, %v2527_v14 }
 0x6a7   :  { %v2904_v20 = vpop.f32.mrf.mxu1 }
 0x6a8   :  { %v2903_v21 = vadd.f32 %v2902_v12, %v2890_v17 }
 0x6aa   :  { %5201 = vtanh.f32 %v2903_v21  ;;  %3072 = vrot.lane.b32.xlu2 %v2903_v21, %s5664_s25  ;;  %3033 = vrot.lane.b32.xlu0 %v2903_v21, %s5663_s3 }
 0x6ab   :  { %v2863_v23 = vpop.f32.mrf.mxu2 }
 0x6ac   :  { %v2864_v24 = vadd.f32 %v2863_v23, %v2526_v22 }
 0x6ad   :  { %v2878_v19 = vpop.f32.mrf.mxu3  ;;  %v2891_v25 = vpop.f32.mrf.mxu0 }
 0x6ae   :  { %v2877_v26 = vadd.f32 %v2876_v15, %v2864_v24 }
 0x6af   :  { %v2954_v28 = vpop.f32.mrf.mxu1 }
 0x6b0   :  { %v5202_v30 = vpop.eup %5201  ;;  %5203 = vtanh.f32 %v2877_v26  ;;  %2962 = vrot.lane.b32.xlu1 %v2877_v26, %s5663_s3 }
 0x6b1   :  { %v3043_v31 = vsub.f32 0.0, %v5202_v30 }
 0x6b3   :  { %v2865_v27 = vpop.f32.mrf.mxu2  ;;  %v3044_v33 = vmul.f32 1.442695, %v3043_v31 }
 0x6b5   :  { %v2928_v34 = vpop.f32.mrf.mxu3  ;;  %v2941_v36 = vpop.f32.mrf.mxu0  ;;  %5205 = vpow2.f32 %v3044_v33 }
 0x6b6   :  { %v5204_v37 = vpop.eup %5203  ;;  %v2942_v39 = vadd.f32 %v2941_v36, %v2529_v32  ;;  %v2958_v36 = vmul.f32 1.442695, %v6035_v5 }
 0x6b7   :  { %v2956_v40 = vpop.f32.mrf.mxu1  ;;  %2982 = vrot.lane.b32.xlu0 %v5204_v37, %s5668_s1  ;;  %v2972_v51 = vsub.f32 0.0, %v5204_v37 }
 0x6b8   :  { %v2955_v41 = vadd.f32 %v2954_v28, %v2942_v39  ;;  %2997 = vrot.lane.b32.xlu1 %v2877_v26, %s5664_s25  ;;  %v3276_v26 = vmul.f32 %v6028_v2, %v6028_v2 }
 0x6b9   :  { %v2973_v53 = vmul.f32 1.442695, %v2972_v51 }
 0x6ba   :  { %5207 = vtanh.f32 %v2955_v41  ;;  %3183 = vrot.lane.b32.xlu2 %v2955_v41, %s5663_s3 }
 0x6bb   :  { %v2915_v43 = vpop.f32.mrf.mxu2  ;;  %v5206_v47 = vpop.eup %5205 }
 0x6bc   :  { %v2916_v44 = vadd.f32 %v2915_v43, %v2528_v42 }
 0x6bd   :  { %v2930_v45 = vpop.f32.mrf.mxu3  ;;  %v2943_v46 = vpop.f32.mrf.mxu0 }
 0x6be   :  { %v2929_v48 = vadd.f32 %v2928_v34, %v2916_v44 }
 0x6bf   :  { %3082 = vrot.lane.b32.xlu0 %v5206_v47, %s5669_s22 }
 0x6c0   :  { %v6175_v49 = vpop.eup %5207  ;;  %3108 = vrot.lane.b32.xlu1 %v2929_v48, %s5663_s3  ;;  %s5672_s3 = smov 125  }
 0x6c1   :  { %v3193_v9 = vsub.f32 0.0, %v6175_v49 }
 0x6c2   :  { %3047 = vrot.lane.b32.xlu2 %v5206_v47, %s5668_s1  ;;  %s5091_s12 = spop %5090 }
 0x6c3   :  { %s6180_s2 = spop %5092  ;;  %v2917_v50 = vpop.f32.mrf.mxu2  ;;  %v3194_v52 = vmul.f32 1.442695, %v3193_v9 }
 0x6c4   :  { %s6183_s0 = smul.f32 %s6180_s2, %s5091_s12 }
 0x6c5   :  { %5209 = vpow2.f32 %v3194_v52 }
 0x6c6   :  { %3369 = sst [smem:[#allocation27]] %s6183_s0  ;;  %5211 = vtanh.f32 %v2929_v48 }
 0x6c7   :  { %3053 = vrot.lane.b32.xlu0 %v5202_v30, %s5668_s1  ;;  %5213 = vpow2.f32 %v2973_v53 }
 0x6c8   :  { %3222 = vrot.lane.b32.xlu1 %v2955_v41, %s5664_s25 }
 0x6ca   :  { %3012 = vrot.lane.b32.xlu2 %v5204_v37, %s5669_s22 }
 0x6cb   :  { %v5210_v54 = vpop.eup %5209 }
 0x6cc   :  { %v5212_v55 = vpop.eup %5211 }
 0x6cd   :  { %v5214_v58 = vpop.eup %5213  ;;  %v3118_v56 = vsub.f32 0.0, %v5212_v55 }
 0x6cf   :  { %3087 = vrot.lane.b32.xlu0 %v5202_v30, %s5669_s22  ;;  %v3119_v57 = vmul.f32 1.442695, %v3118_v56 }
 0x6d0   :  { %3232 = vrot.lane.b32.xlu1 %v5210_v54, %s5669_s22 }
 0x6d1   :  { %5215 = vpow2.f32 %v3119_v57 }
 0x6d2   :  { %3007 = vrot.lane.b32.xlu2 %v5214_v58, %s5669_s22  ;;  %5217 = vpow2.f32 %v2958_v36 }
 0x6d7   :  { %3147 = vrot.lane.b32.xlu0 %v2929_v48, %s5664_s25  ;;  %v5216_v59 = vpop.eup %5215 }
 0x6d8   :  { %v6227_v40 = vpop.eup %5217 }
 0x6da   :  { %3128 = vrot.lane.b32.xlu2 %v5212_v55, %s5668_s1 }
 0x6df   :  { %2976 = vrot.lane.b32.xlu0 %v5214_v58, %s5668_s1 }
 0x6e2   :  { %3122 = vrot.lane.b32.xlu2 %v5216_v59, %s5668_s1 }
 0x6e7   :  { %3197 = vrot.lane.b32.xlu0 %v5210_v54, %s5668_s1 }
 0x6ea   :  { %3157 = vrot.lane.b32.xlu2 %v5216_v59, %s5669_s22 }
 0x704   :  { %v3073_v63 = vpop.permute.xlu2 %3072 }
 0x705   :  { %v3075_v18 = vsub.f32 %v6028_v2, %v3073_v63 }
 0x707   :  { %v3076_v6 = vmul.f32 %v3075_v18, %v3075_v18  ;;  %v3275_v18 = vadd.f32 1.0, %v6035_v5 }
 0x714   :  { %v3184_v29 = vpop.permute.xlu2 %3183 }
 0x715   :  { %v3186_v13 = vsub.f32 %v6028_v2, %v3184_v29 }
 0x717   :  { %v3187_v16 = vmul.f32 %v3186_v13, %v3186_v13 }
 0x71c   :  { %v3034_v60 = vpop.permute.xlu0 %3033  ;;  %v3048_v28 = vpop.permute.xlu2 %3047 }
 0x71d   :  { %v3036_v61 = vsub.f32 %v6028_v2, %v3034_v60 }
 0x71f   :  { %v3037_v62 = vmul.f32 %v3036_v61, %v3036_v61 }
 0x721   :  { %3039 = vrot.lane.b32.xlu0 %v3037_v62, %s5670_s20 }
 0x722   :  { %v2963_v0 = vpop.permute.xlu1 %2962 }
 0x723   :  { %v2965_v1 = vsub.f32 %v6028_v2, %v2963_v0 }
 0x724   :  { %v3013_v30 = vpop.permute.xlu2 %3012 }
 0x725   :  { %v2966_v4 = vmul.f32 %v2965_v1, %v2965_v1 }
 0x727   :  { %2968 = vrot.lane.b32.xlu2 %v2966_v4, %s5670_s20 }
 0x729   :  { %3078 = vrot.lane.b32.xlu0 %v3076_v6, %s5670_s20  ;;  %v2983_v7 = vpop.permute.xlu0 %2982 }
 0x72a   :  { %v2998_v8 = vpop.permute.xlu1 %2997 }
 0x72b   :  { %v3000_v3 = vsub.f32 %v6028_v2, %v2998_v8 }
 0x72c   :  { %v3008_v31 = vpop.permute.xlu2 %3007 }
 0x72d   :  { %v3001_v35 = vmul.f32 %v3000_v3, %v3000_v3 }
 0x731   :  { %3003 = vrot.lane.b32.xlu0 %v3001_v35, %s5670_s20  ;;  %v3083_v10 = vpop.permute.xlu0 %3082 }
 0x732   :  { %v3109_v12 = vpop.permute.xlu1 %3108 }
 0x733   :  { %v3111_v14 = vsub.f32 %v6028_v2, %v3109_v12 }
 0x734   :  { %v6222_v32 = vpop.permute.xlu2 %3128 }
 0x735   :  { %v3112_v15 = vmul.f32 %v3111_v14, %v3111_v14 }
 0x737   :  { %3114 = vrot.lane.b32.xlu2 %v3112_v15, %s5670_s20 }
 0x739   :  { %3189 = vrot.lane.b32.xlu0 %v3187_v16, %s5670_s20  ;;  %v3054_v17 = vpop.permute.xlu0 %3053 }
 0x73a   :  { %v3223_v20 = vpop.permute.xlu1 %3222 }
 0x73b   :  { %v3225_v21 = vsub.f32 %v6028_v2, %v3223_v20 }
 0x73c   :  { %v3123_v27 = vpop.permute.xlu2 %3122 }
 0x73d   :  { %v3226_v22 = vmul.f32 %v3225_v21, %v3225_v21 }
 0x73f   :  { %3228 = vrot.lane.b32.xlu2 %v3226_v22, %s5670_s20 }
 0x741   :  { %3162 = vrot.lane.b32.xlu0 %v5212_v55, %s5669_s22  ;;  %v3088_v23 = vpop.permute.xlu0 %3087 }
 0x742   :  { %v3233_v21 = vpop.permute.xlu1 %3232 }
 0x744   :  { %v6224_v33 = vpop.permute.xlu2 %3157 }
 0x747   :  { %3203 = vrot.lane.b32.xlu2 %v6175_v49, %s5668_s1 }
 0x749   :  { %3237 = vrot.lane.b32.xlu0 %v6175_v49, %s5669_s22  ;;  %v3148_v24 = vpop.permute.xlu0 %3147 }
 0x74a   :  { %v3150_v19 = vsub.f32 %v6028_v2, %v3148_v24 }
 0x74c   :  { %v3151_v25 = vmul.f32 %v3150_v19, %v3150_v19 }
 0x74e   :  { %3153 = vrot.lane.b32.xlu1 %v3151_v25, %s5670_s20 }
 0x74f   :  { %3278 = vrot.lane.b32.xlu2 %v3276_v26, %s5670_s20 }
 0x751   :  { %v2977_v34 = vpop.permute.xlu0 %2976 }
 0x759   :  { %v3198_v39 = vpop.permute.xlu0 %3197 }
 0x781   :  { %v2969_v37 = vpop.permute.xlu2 %2968 }
 0x782   :  { %v2971_v41 = vadd.f32 %v6227_v40, %v2969_v37 }
 0x784   :  { %v2979_v44 = vmul.f32 %v2977_v34, %v2971_v41 }
 0x786   :  { %v2980_v48 = vadd.f32 -1.0, %v2979_v44 }
 0x788   :  { %v2985_v52 = vadd.f32 %v2983_v7, %v2980_v48 }
 0x78a   :  { %v2986_v57 = vsub.f32 %v2985_v52, %v6035_v5 }
 0x78c   :  { %v2987_v63 = vmul.f32 0.5, %v2986_v57 }
 0x791   :  { %v3115_v2 = vpop.permute.xlu2 %3114 }
 0x793   :  { %v3040_v42 = vpop.permute.xlu0 %3039 }
 0x794   :  { %v3042_v43 = vadd.f32 %v6227_v40, %v3040_v42 }
 0x796   :  { %v3050_v45 = vmul.f32 %v3048_v28, %v3042_v43 }
 0x798   :  { %v3051_v46 = vadd.f32 -1.0, %v3050_v45 }
 0x799   :  { %v3229_v47 = vpop.permute.xlu2 %3228 }
 0x79a   :  { %v3056_v49 = vadd.f32 %v3054_v17, %v3051_v46  ;;  %v3231_v13 = vadd.f32 %v6227_v40, %v3229_v47  ;;  %v3117_v17 = vadd.f32 %v6227_v40, %v3115_v2 }
 0x79b   :  { %v3079_v9 = vpop.permute.xlu0 %3078 }
 0x79c   :  { %v3081_v50 = vadd.f32 %v6227_v40, %v3079_v9  ;;  %v3057_v51 = vsub.f32 %v3056_v49, %v6035_v5  ;;  %v3235_v22 = vmul.f32 %v3233_v21, %v3231_v13  ;;  %v3125_v19 = vmul.f32 %v3123_v27, %v3117_v17 }
 0x79e   :  { %v3085_v53 = vmul.f32 %v3083_v10, %v3081_v50  ;;  %v3058_v54 = vmul.f32 0.5, %v3057_v51  ;;  %v3236_v25 = vadd.f32 -1.0, %v3235_v22  ;;  %v3126_v28 = vadd.f32 -1.0, %v3125_v19 }
 0x7a0   :  { %v3086_v55 = vadd.f32 -1.0, %v3085_v53  ;;  %3060 = vrot.lane.b32.xlu2 %v3058_v54, %s5666_s8  ;;  %v3131_v34 = vadd.f32 %v6222_v32, %v3126_v28 }
 0x7a1   :  { %v3204_v58 = vpop.permute.xlu2 %3203 }
 0x7a2   :  { %v3090_v56 = vadd.f32 %v3088_v23, %v3086_v55  ;;  %v3132_v2 = vsub.f32 %v3131_v34, %v6035_v5 }
 0x7a3   :  { %v3004_v59 = vpop.permute.xlu0 %3003 }
 0x7a4   :  { %v3006_v60 = vadd.f32 %v6227_v40, %v3004_v59  ;;  %v3091_v61 = vsub.f32 %v3090_v56, %v6035_v5  ;;  %v3133_v43 = vmul.f32 0.5, %v3132_v2 }
 0x7a6   :  { %v3010_v62 = vmul.f32 %v3008_v31, %v3006_v60  ;;  %v3092_v0 = vmul.f32 0.5, %v3091_v61 }
 0x7a8   :  { %2989 = vrot.lane.b32.xlu2 %v2987_v63, %s5666_s8  ;;  %3094 = vrot.lane.b32.xlu0 %v3092_v0, %s5666_s8  ;;  %v3011_v4 = vadd.f32 -1.0, %v3010_v62  ;;  %v3310_v63 = vsel %vm1466_vm14, %v6156_v38, 0.0 }
 0x7a9   :  { %v3279_v1 = vpop.permute.xlu2 %3278 }
 0x7aa   :  { %v3281_v6 = vsub.f32 %v3275_v18, %v3279_v1  ;;  %v3015_v35 = vadd.f32 %v3013_v30, %v3011_v4  ;;  %v3311_v1 = vrot.slane %v3310_v63, 4 }
 0x7ab   :  { %v3190_v7 = vpop.permute.xlu0 %3189 }
 0x7ac   :  { %v3282_v8 = vsub.f32 %v3281_v6, %v6227_v40  ;;  %v3192_v3 = vadd.f32 %v6227_v40, %v3190_v7  ;;  %v3016_v15 = vsub.f32 %v3015_v35, %v6035_v5 }
 0x7ae   :  { %v3283_v29 = vmul.f32 -0.5, %v3282_v8  ;;  %v3200_v10 = vmul.f32 %v3198_v39, %v3192_v3  ;;  %v3017_v23 = vmul.f32 0.5, %v3016_v15  ;;  %v3312_v3 = vadd.f32 %v3311_v1, %v3310_v63 }
 0x7b0   :  { %v3201_v12 = vadd.f32 -1.0, %v3200_v10  ;;  %3285 = vrot.lane.b32.xlu1 %v3283_v29, %s5664_s25  ;;  %s5673_s25 = smov 123   ;;  %v3313_v35 = vrot.slane %v3312_v3, 2 }
 0x7b2   :  { %v3206_v14 = vadd.f32 %v3204_v58, %v3201_v12  ;;  %v3314_v10 = vadd.f32 %v3313_v35, %v3312_v3 }
 0x7b3   :  { %v3163_v16 = vpop.permute.xlu0 %3162 }
 0x7b4   :  { %v3207_v20 = vsub.f32 %v3206_v14, %v6035_v5  ;;  %v3315_v12 = vrot.slane %v3314_v10, 1 }
 0x7b6   :  { %v3208_v24 = vmul.f32 0.5, %v3207_v20  ;;  %v3316_v14 = vadd.f32 %v3315_v12, %v3314_v10 }
 0x7b8   :  { %3019 = vrot.lane.b32.xlu1 %v3017_v23, %s5666_s8  ;;  %3210 = vrot.lane.b32.xlu0 %v3208_v24, %s5666_s8  ;;  %v3341_v24 = vsel %vm1466_vm14, %v6156_v38, -inf }
 0x7bb   :  { %v3238_v26 = vpop.permute.xlu0 %3237 }
 0x7bc   :  { %v3240_v30 = vadd.f32 %v3238_v26, %v3236_v25 }
 0x7be   :  { %v3241_v31 = vsub.f32 %v3240_v30, %v6035_v5 }
 0x7c0   :  { %v3242_v36 = vmul.f32 0.5, %v3241_v31  ;;  %v3154_v37 = vpop.permute.xlu1 %3153 }
 0x7c1   :  { %v3156_v39 = vadd.f32 %v6227_v40, %v3154_v37 }
 0x7c2   :  { %3244 = vrot.lane.b32.xlu1 %v3242_v36, %s5666_s8 }
 0x7c3   :  { %v3160_v27 = vmul.f32 %v6224_v33, %v3156_v39 }
 0x7c5   :  { %v3161_v41 = vadd.f32 -1.0, %v3160_v27 }
 0x7c7   :  { %v3165_v42 = vadd.f32 %v3163_v16, %v3161_v41  ;;  %v3324_v16 = vmul.f32 %v3316_v14, %v6164_v11 }
 0x7c9   :  { %v3166_v44 = vsub.f32 %v3165_v42, %v6035_v5  ;;  %v3325_v17 = vadd.f32 1e-12, %v3324_v16 }
 0x7ca   :  { %3135 = vrot.lane.b32.xlu1 %v3133_v43, %s5666_s8 }
 0x7cb   :  { %v3167_v45 = vmul.f32 0.5, %v3166_v44  ;;  %5219 = vlog2.f32 %v3325_v17 }
 0x7cd   :  { %3169 = vrot.lane.b32.xlu2 %v3167_v45, %s5666_s8  ;;  %s5675_s8 = smov 127  }
 0x7d1   :  { %v5220_v21 = vpop.eup %5219 }
 0x7d2   :  { %v3327_v22 = vmul.f32 0.6931472, %v5220_v21 }
 0x7d4   :  { %v4789_v19 = vadd.f32 2.0794415, %v3327_v22 }
 0x7d6   :  { %v3329_v25 = vmul.f32 %v4789_v19, %v3324_v16 }
 0x7fa   :  { %v3061_v32 = vpop.permute.xlu2 %3060 }
 0x7fb   :  { %v3063_v46 = vsel %vm936_vm6, %v3061_v32, 0.0 }
 0x7fc   :  { %3064 = vadd.xlane.f32.xlu1 %v3063_v46 }
 0x802   :  { %v2990_v40 = vpop.permute.xlu2 %2989 }
 0x803   :  { %v2992_v47 = vsel %vm936_vm6, %v2990_v40, 0.0 }
 0x804   :  { %2993 = vadd.xlane.f32.xlu1 %v2992_v47 }
 0x81a   :  { %v3095_v33 = vpop.permute.xlu0 %3094 }
 0x81b   :  { %v3097_v48 = vsel %vm936_vm6, %v3095_v33, 0.0 }
 0x81c   :  { %3098 = vadd.xlane.f32.xlu2 %v3097_v48 }
 0x822   :  { %v3286_v49 = vpop.permute.xlu1 %3285 }
 0x823   :  { %v3288_v23 = vsel %vm925_vm5, %v3286_v49, 0.0 }
 0x827   :  { %v3170_v9 = vpop.permute.xlu2 %3169 }
 0x828   :  { %v3172_v5 = vsel %vm936_vm6, %v3170_v9, 0.0 }
 0x829   :  { %3173 = vadd.xlane.f32.xlu1 %v3172_v5 }
 0x82a   :  { %v3020_v50 = vpop.permute.xlu1 %3019  ;;  %v3211_v51 = vpop.permute.xlu0 %3210 }
 0x82b   :  { %v3022_v52 = vsel %vm936_vm6, %v3020_v50, 0.0  ;;  %v3213_v53 = vsel %vm936_vm6, %v3211_v51, 0.0 }
 0x82c   :  { %3023 = vadd.xlane.f32.xlu0 %v3022_v52  ;;  %3214 = vadd.xlane.f32.xlu2 %v3213_v53 }
 0x834   :  { %v3245_v54 = vpop.permute.xlu1 %3244 }
 0x835   :  { %v3247_v55 = vsel %vm936_vm6, %v3245_v54, 0.0 }
 0x836   :  { %3248 = vadd.xlane.f32.xlu0 %v3247_v55 }
 0x83c   :  { %v3136_v58 = vpop.permute.xlu1 %3135 }
 0x83d   :  { %v3138_v56 = vsel %vm936_vm6, %v3136_v58, 0.0  ;;  %vm3330_vm6 = vcmask 57344  }
 0x83e   :  { %3139 = vadd.xlane.f32.xlu0 %v3138_v56  ;;  %v3331_v26 = vsel %vm3330_vm6, %v3329_v25, 0.0 }
 0x86f   :  { %v3065_v57 = vpop.xlane.xlu1 %3064 }
 0x870   :  { %v3066_v59 = vmul.f32 %v3065_v57, %v6156_v38 }
 0x872   :  { %3068 = vrot.lane.b32.xlu0 %v3066_v59, %s5671_s11 }
 0x877   :  { %v2994_v62 = vpop.xlane.xlu1 %2993 }
 0x878   :  { %v2995_v28 = vmul.f32 %v2994_v62, %v6156_v38 }
 0x88f   :  { %v3099_v60 = vpop.xlane.xlu2 %3098 }
 0x890   :  { %v3100_v61 = vmul.f32 %v3099_v60, %v6156_v38 }
 0x892   :  { %3102 = vrot.lane.b32.xlu1 %v3100_v61, %s5672_s3 }
 0x89c   :  { %v3174_v0 = vpop.xlane.xlu1 %3173 }
 0x89d   :  { %v3175_v18 = vmul.f32 %v3174_v0, %v6156_v38 }
 0x89f   :  { %3177 = vrot.lane.b32.xlu0 %v3175_v18, %s5673_s25  ;;  %v3215_v4 = vpop.xlane.xlu2 %3214  ;;  %v3024_v6 = vpop.xlane.xlu0 %3023 }
 0x8a0   :  { %v3216_v7 = vmul.f32 %v3215_v4, %v6156_v38  ;;  %v3025_v8 = vmul.f32 %v3024_v6, %v6156_v38 }
 0x8a2   :  { %3218 = vrot.lane.b32.xlu1 %v3216_v7, %s5674_s29  ;;  %3027 = vrot.lane.b32.xlu2 %v3025_v8, %s5675_s8 }
 0x8a9   :  { %v3249_v29 = vpop.xlane.xlu0 %3248 }
 0x8aa   :  { %v3250_v20 = vmul.f32 %v3249_v29, %v6156_v38 }
 0x8b1   :  { %v3140_v13 = vpop.xlane.xlu0 %3139 }
 0x8b2   :  { %v3141_v15 = vmul.f32 %v3140_v13, %v6156_v38 }
 0x8b4   :  { %3143 = vrot.lane.b32.xlu2 %v3141_v15, %s5676_s14 }
 0x8bc   :  { %3252 = vrot.lane.b32.xlu2 %v3250_v20, %s5677_s19 }
 0x8c9   :  { %3289 = vadd.xlane.f32.xlu0 %v3288_v23 }
 0x8cc   :  { %3342 = vmax.xlane.f32.xlu1 %v3341_v24 }
 0x8d4   :  { %3332 = vadd.xlane.f32.xlu1 %v3331_v26 }
 0x8e4   :  { %v3069_v31 = vpop.permute.xlu0 %3068 }
 0x8fc   :  { %v3028_v11 = vpop.permute.xlu2 %3027 }
 0x8fd   :  { %v3030_v30 = vadd.f32 %v3028_v11, %v2995_v28 }
 0x8ff   :  { %v3071_v36 = vadd.f32 %v3069_v31, %v3030_v30 }
 0x904   :  { %v3103_v34 = vpop.permute.xlu1 %3102 }
 0x905   :  { %v3105_v37 = vadd.f32 %v3103_v34, %v3071_v36 }
 0x90e   :  { %v3144_v39 = vpop.permute.xlu2 %3143 }
 0x90f   :  { %v3146_v27 = vadd.f32 %v3144_v39, %v3105_v37 }
 0x911   :  { %v3178_v2 = vpop.permute.xlu0 %3177 }
 0x912   :  { %v3180_v41 = vadd.f32 %v3178_v2, %v3146_v27 }
 0x914   :  { %v3219_v42 = vpop.permute.xlu1 %3218 }
 0x915   :  { %v3221_v43 = vadd.f32 %v3219_v42, %v3180_v41 }
 0x916   :  { %v3253_v44 = vpop.permute.xlu2 %3252 }
 0x917   :  { %v3255_v45 = vadd.f32 %v3253_v44, %v3221_v43 }
 0x919   :  { %v3256_v32 = vsel %vm2126_vm3, %v3255_v45, 0.0 }
 0x91a   :  { %3257 = vadd.xlane.f32.xlu2 %v3256_v32 }
 0x93c   :  { %v3290_v46 = vpop.xlane.xlu0 %3289 }
 0x93d   :  { %v3291_v38 = vsel %vm2126_vm3, %v3290_v46, 0.0 }
 0x93e   :  { %3292 = vadd.xlane.f32.xlu0 %v3291_v38 }
 0x93f   :  { %v3343_v40 = vpop.xlane.xlu1 %3342 }
 0x940   :  { %v3344_v47 = vsel %vm2126_vm3, %v3343_v40, 0.0 }
 0x941   :  { %3345 = vadd.xlane.f32.xlu2 %v3344_v47 }
 0x942   :  { %5390 = shalt.err (!%p5387_p6)
}
 0x943   :  { %3403 = dma.vmem_to_hbm [thread:$0]  %s3399_s7, 128, %s3401_s30, [#allocation16]  }
 0x944   :  { %s6366_s18 = sld [smem:[#allocation57_spill]]  ;;  %s5679_s16 = smov [#allocation18]  }
 0x945   :  { %s3420_s23 = sshll.u32 %s5679_s16, 4  ;;  %s3421_s23 = int_to_ptr.vmem [resolvable:$true] %s3420_s23 }
 0x94a   :  { %s3422_s26 = sshll.u32 %s6366_s18, 4  ;;  %s5407_s28 = scalar_lea.hbm %s6366_s18, 8  ;;  %s3423_s26 = int_to_ptr.hbm [resolvable:$true] %s3422_s26 }
 0x94b   :  { %s5403_s21 = sshra.s32 %s3423_s26, 4  ;;  %s5404_s21 = int_to_ptr.hbm [resolvable:$true] %s5403_s21 }
 0x94c   :  { %s5405_s5 = scalar_lea.hbm %s5404_s21, 8  ;;  %p5408_p8 = scmp.lt.s32.totalorder %s5404_s21, %s6366_s18 }
 0x94d   :  { %p5406_p7 = scmp.ne.s32.totalorder %s5404_s21, %s5405_s5  ;;  %p5409_p9 = scmp.lt.s32.totalorder %s5407_s28, %s5405_s5 }
 0x94f   :  { %p5410_p10 = por %p5409_p9, %p5408_p8 }
 0x951   :  { %p5411_p11 = pnand %p5410_p10, %p5406_p7 }
 0x953   :  { %5414 = shalt.err (!%p5411_p11)
}
 0x954   :  { %3425 = dma.vmem_to_hbm [thread:$0]  %s3421_s23, 128, %s3423_s26, [#allocation19]  }
 0x955   :  { %s6367_s1 = sld [smem:[#allocation59_spill]]  ;;  %s5680_s12 = smov [#allocation21]  }
 0x956   :  { %s3442_s20 = sshll.u32 %s5680_s12, 4  ;;  %s3443_s20 = int_to_ptr.vmem [resolvable:$true] %s3442_s20 }
 0x95b   :  { %s3444_s22 = sshll.u32 %s6367_s1, 4  ;;  %s5431_s25 = scalar_lea.hbm %s6367_s1, 8  ;;  %s3445_s22 = int_to_ptr.hbm [resolvable:$true] %s3444_s22 }
 0x95c   :  { %s5427_s11 = sshra.s32 %s3445_s22, 4  ;;  %s5428_s11 = int_to_ptr.hbm [resolvable:$true] %s5427_s11 }
 0x95d   :  { %s5429_s3 = scalar_lea.hbm %s5428_s11, 8  ;;  %p5432_p13 = scmp.lt.s32.totalorder %s5428_s11, %s6367_s1 }
 0x95e   :  { %p5430_p12 = scmp.ne.s32.totalorder %s5428_s11, %s5429_s3  ;;  %p5433_p0 = scmp.lt.s32.totalorder %s5431_s25, %s5429_s3 }
 0x960   :  { %p5434_p1 = por %p5433_p0, %p5432_p13 }
 0x962   :  { %p5435_p2 = pnand %p5434_p1, %p5430_p12 }
 0x964   :  { %5438 = shalt.err (!%p5435_p2)
}
 0x965   :  { %3447 = dma.vmem_to_hbm [thread:$0]  %s3443_s20, 128, %s3445_s22, [#allocation22]  }
 0x966   :  { %s5681_s29 = smov [#allocation24]   ;;  %s3466_s14 = sshll.u32 %s5881_s17, 4  ;;  %s3467_s14 = int_to_ptr.hbm [resolvable:$true] %s3466_s14 }
 0x967   :  { %s3464_s8 = sshll.u32 %s5681_s29, 4  ;;  %s5451_s19 = sshra.s32 %s3467_s14, 4  ;;  %s3465_s8 = int_to_ptr.vmem [resolvable:$true] %s3464_s8  ;;  %s5452_s19 = int_to_ptr.hbm [resolvable:$true] %s5451_s19 }
 0x968   :  { %s5453_s24 = scalar_lea.hbm %s5452_s19, 8  ;;  %s5455_s30 = scalar_lea.hbm %s5881_s17, 8 }
 0x969   :  { %p5454_p3 = scmp.ne.s32.totalorder %s5452_s19, %s5453_s24  ;;  %p5456_p4 = scmp.lt.s32.totalorder %s5452_s19, %s5881_s17 }
 0x96a   :  { %p5457_p5 = scmp.lt.s32.totalorder %s5455_s30, %s5453_s24 }
 0x96c   :  { %p5458_p6 = por %p5457_p5, %p5456_p4 }
 0x96e   :  { %p5459_p7 = pnand %p5458_p6, %p5454_p3 }
 0x970   :  { %5462 = shalt.err (!%p5459_p7)
}
 0x971   :  { %3469 = dma.vmem_to_hbm [thread:$0]  %s3465_s8, 128, %s3467_s14, [#allocation25]  }
 0x972   :  { %s6368_s4 = sld [smem:[#allocation54_spill]]  ;;  %s5682_s10 = smov [#allocation14]  }
 0x973   :  { %s3387_s15 = sshll.u32 %s5682_s10, 4  ;;  %s3388_s15 = int_to_ptr.vmem [resolvable:$true] %s3387_s15 }
 0x978   :  { %s3389_s7 = sshll.u32 %s6368_s4, 4  ;;  %s5479_s16 = scalar_lea.hbm %s6368_s4, 8  ;;  %s3390_s7 = int_to_ptr.hbm [resolvable:$true] %s3389_s7 }
 0x979   :  { %s5475_s6 = sshra.s32 %s3390_s7, 4  ;;  %s5476_s6 = int_to_ptr.hbm [resolvable:$true] %s5475_s6 }
 0x97a   :  { %s5477_s18 = scalar_lea.hbm %s5476_s6, 8  ;;  %p5480_p9 = scmp.lt.s32.totalorder %s5476_s6, %s6368_s4 }
 0x97b   :  { %p5478_p8 = scmp.ne.s32.totalorder %s5476_s6, %s5477_s18  ;;  %p5481_p10 = scmp.lt.s32.totalorder %s5479_s16, %s5477_s18 }
 0x97d   :  { %p5482_p11 = por %p5481_p10, %p5480_p9 }
 0x97f   :  { %p5483_p12 = pnand %p5482_p11, %p5478_p8 }
 0x981   :  { %5486 = shalt.err (!%p5483_p12)
}
 0x982   :  { %3392 = dma.vmem_to_hbm [thread:$0]  %s3388_s15, 128, %s3390_s7, [#allocation4]  }
 0x983   :  { %s6369_s17 = sld [smem:[#allocation56_spill]]  ;;  %s5683_s23 = smov [#allocation17]  }
 0x984   :  { %s3409_s26 = sshll.u32 %s5683_s23, 4  ;;  %s3410_s26 = int_to_ptr.vmem [resolvable:$true] %s3409_s26 }
 0x989   :  { %s3411_s21 = sshll.u32 %s6369_s17, 4  ;;  %s5503_s1 = scalar_lea.hbm %s6369_s17, 8  ;;  %s3412_s21 = int_to_ptr.hbm [resolvable:$true] %s3411_s21 }
 0x98a   :  { %s5499_s5 = sshra.s32 %s3412_s21, 4  ;;  %s5500_s5 = int_to_ptr.hbm [resolvable:$true] %s5499_s5 }
 0x98b   :  { %s5501_s28 = scalar_lea.hbm %s5500_s5, 8  ;;  %p5504_p0 = scmp.lt.s32.totalorder %s5500_s5, %s6369_s17 }
 0x98c   :  { %p5502_p13 = scmp.ne.s32.totalorder %s5500_s5, %s5501_s28  ;;  %p5505_p1 = scmp.lt.s32.totalorder %s5503_s1, %s5501_s28 }
 0x98e   :  { %p5506_p2 = por %p5505_p1, %p5504_p0 }
 0x990   :  { %p5507_p3 = pnand %p5506_p2, %p5502_p13 }
 0x992   :  { %5510 = shalt.err (!%p5507_p3)
}
 0x993   :  { %3414 = dma.vmem_to_hbm [thread:$0]  %s3410_s26, 128, %s3412_s21, [#allocation16]   ;;  %v3258_v33 = vpop.xlane.xlu2 %3257 }
 0x994   :  { %s6370_s22 = sld [smem:[#allocation58_spill]]  ;;  %s5684_s20 = smov [#allocation20]   ;;  %v3259_v48 = vrot.slane %v3258_v33, 4 }
 0x995   :  { %s3431_s11 = sshll.u32 %s5684_s20, 4  ;;  %s3432_s11 = int_to_ptr.vmem [resolvable:$true] %s3431_s11 }
 0x99a   :  { %s3433_s12 = sshll.u32 %s6370_s22, 4  ;;  %s5527_s29 = scalar_lea.hbm %s6370_s22, 8  ;;  %s3434_s12 = int_to_ptr.hbm [resolvable:$true] %s3433_s12 }
 0x99b   :  { %s5523_s3 = sshra.s32 %s3434_s12, 4  ;;  %s5524_s3 = int_to_ptr.hbm [resolvable:$true] %s5523_s3 }
 0x99c   :  { %s5525_s25 = scalar_lea.hbm %s5524_s3, 8  ;;  %p5528_p5 = scmp.lt.s32.totalorder %s5524_s3, %s6370_s22 }
 0x99d   :  { %p5526_p4 = scmp.ne.s32.totalorder %s5524_s3, %s5525_s25  ;;  %p5529_p6 = scmp.lt.s32.totalorder %s5527_s29, %s5525_s25 }
 0x99f   :  { %p5530_p7 = por %p5529_p6, %p5528_p5 }
 0x9a1   :  { %p5531_p8 = pnand %p5530_p7, %p5526_p4 }
 0x9a3   :  { %5534 = shalt.err (!%p5531_p8)
}
 0x9a4   :  { %3436 = dma.vmem_to_hbm [thread:$0]  %s3432_s11, 128, %s3434_s12, [#allocation19]   ;;  %v3260_v49 = vadd.f32 %v3259_v48, %v3258_v33 }
 0x9a5   :  { %s5685_s8 = smov [#allocation23]   ;;  %s3455_s19 = sshll.u32 %s5876_s27, 4  ;;  %s3456_s19 = int_to_ptr.hbm [resolvable:$true] %s3455_s19 }
 0x9a6   :  { %s3453_s14 = sshll.u32 %s5685_s8, 4  ;;  %v3261_v9 = vrot.slane %v3260_v49, 2  ;;  %s5547_s24 = sshra.s32 %s3456_s19, 4  ;;  %s3454_s14 = int_to_ptr.vmem [resolvable:$true] %s3453_s14  ;;  %s5548_s24 = int_to_ptr.hbm [resolvable:$true] %s5547_s24 }
 0x9a7   :  { %s5549_s30 = scalar_lea.hbm %s5548_s24, 8  ;;  %s5551_s4 = scalar_lea.hbm %s5876_s27, 8 }
 0x9a8   :  { %p5550_p9 = scmp.ne.s32.totalorder %s5548_s24, %s5549_s30  ;;  %p5552_p10 = scmp.lt.s32.totalorder %s5548_s24, %s5876_s27 }
 0x9a9   :  { %p5553_p11 = scmp.lt.s32.totalorder %s5551_s4, %s5549_s30 }
 0x9ab   :  { %p5554_p12 = por %p5553_p11, %p5552_p10 }
 0x9ad   :  { %p5555_p13 = pnand %p5554_p12, %p5550_p9 }
 0x9af   :  { %5558 = shalt.err (!%p5555_p13)
}
 0x9b0   :  { %3458 = dma.vmem_to_hbm [thread:$0]  %s3454_s14, 128, %s3456_s19, [#allocation22]   ;;  %v3262_v5 = vadd.f32 %v3261_v9, %v3260_v49 }
 0x9b1   :  { %s3477_s7 = sshll.u32 %s5886_s9, 4  ;;  %s5686_s10 = smov [#allocation26]   ;;  %s3478_s7 = int_to_ptr.hbm [resolvable:$true] %s3477_s7 }
 0x9b2   :  { %s3475_s15 = sshll.u32 %s5686_s10, 4  ;;  %v3263_v50 = vrot.slane %v3262_v5, 1  ;;  %s5571_s6 = sshra.s32 %s3478_s7, 4  ;;  %s3476_s15 = int_to_ptr.vmem [resolvable:$true] %s3475_s15  ;;  %s5572_s6 = int_to_ptr.hbm [resolvable:$true] %s5571_s6 }
 0x9b3   :  { %s5573_s18 = scalar_lea.hbm %s5572_s6, 16  ;;  %s5575_s27 = scalar_lea.hbm %s5886_s9, 16 }
 0x9b4   :  { %p5574_p0 = scmp.ne.s32.totalorder %s5572_s6, %s5573_s18  ;;  %p5576_p1 = scmp.lt.s32.totalorder %s5572_s6, %s5886_s9 }
 0x9b5   :  { %p5577_p2 = scmp.lt.s32.totalorder %s5575_s27, %s5573_s18 }
 0x9b7   :  { %p5578_p3 = por %p5577_p2, %p5576_p1 }
 0x9b9   :  { %p5579_p4 = pnand %p5578_p3, %p5574_p0 }
 0x9bb   :  { %5582 = shalt.err (!%p5579_p4)
}
 0x9bc   :  { %3480 = dma.vmem_to_hbm [thread:$0]  %s3476_s15, 256, %s3478_s7, [#allocation25]   ;;  %v3264_v51 = vadd.f32 %v3263_v50, %v3262_v5  ;;  %v3333_v52 = vpop.xlane.xlu1 %3332  ;;  %v3293_v58 = vpop.xlane.xlu0 %3292 }
 0x9bd   :  { %v3334_v53 = vrot.slane %v3333_v52, 4  ;;  %v3294_v56 = vrot.slane %v3293_v58, 4  ;;  %v3346_v59 = vpop.xlane.xlu2 %3345  ;;  %s3486_s17 = sshll.u32 %s5891_s13, 4  ;;  %s3487_s17 = int_to_ptr.vmem [resolvable:$true] %s3486_s17 }
 0x9be   :  { %5094 = vpush %v3264_v51  ;;  %v3347_v61 = vrot.slane %v3346_v59, 4  ;;  %s5583_s3 = sshra.s32 %s3487_s17, 4  ;;  %s5584_s3 = int_to_ptr.vmem [resolvable:$true] %s5583_s3 }
 0x9bf   :  { %v3335_v54 = vadd.f32 %v3334_v53, %v3333_v52  ;;  %v3295_v57 = vadd.f32 %v3294_v56, %v3293_v58  ;;  %s5585_s25 = scalar_lea.vmem %s5584_s3, 1  ;;  %p5588_p6 = scmp.lt.s32.totalorder %s5584_s3, %s5891_s13 }
 0x9c0   :  { %v3348_v63 = vadd.f32 %v3347_v61, %v3346_v59  ;;  %p5586_p5 = scmp.ne.s32.totalorder %s5584_s3, %s5585_s25 }
 0x9c1   :  { %v3336_v55 = vrot.slane %v3335_v54, 2  ;;  %v3296_v62 = vrot.slane %v3295_v57, 2 }
 0x9c2   :  { %v3349_v18 = vrot.slane %v3348_v63, 2 }
 0x9c3   :  { %v3337_v60 = vadd.f32 %v3336_v55, %v3335_v54  ;;  %v3297_v0 = vadd.f32 %v3296_v62, %v3295_v57 }
 0x9c4   :  { %v3350_v6 = vadd.f32 %v3349_v18, %v3348_v63 }
 0x9c5   :  { %v3338_v1 = vrot.slane %v3337_v60, 1  ;;  %v3298_v4 = vrot.slane %v3297_v0, 1 }
 0x9c6   :  { %v3351_v3 = vrot.slane %v3350_v6, 1 }
 0x9c7   :  { %v3299_v7 = vadd.f32 %v3298_v4, %v3297_v0  ;;  %v3339_v8 = vadd.f32 %v3338_v1, %v3337_v60 }
 0x9c8   :  { %v3352_v35 = vadd.f32 %v3351_v3, %v3350_v6 }
 0x9c9   :  { %5096 = vpush %v3299_v7 }
 0x9ca   :  { %5098 = vpush %v3339_v8 }
 0x9cb   :  { %5100 = vpush %v3352_v35 }
 0x9ef   :  { %s5095_s9 = spop %5094 }
 0x9f0   :  { %s3274_s16 = smul.f32 %s5095_s9, %s6180_s2 }
 0x9f2   :  { %3371 = sst [smem:[#allocation27 + $0x1]] %s3274_s16 }
 0x9f3   :  { %s3364_s23 = sadd.f32 %s3274_s16, %s6183_s0  ;;  %s5587_s0 = scalar_lea.vmem %s5891_s13, 1 }
 0x9f4   :  { %p5589_p7 = scmp.lt.s32.totalorder %s5587_s0, %s5585_s25 }
 0x9f6   :  { %p5590_p8 = por %p5589_p7, %p5588_p6 }
 0x9f8   :  { %p5591_p9 = pnand %p5590_p8, %p5586_p5 }
 0x9fa   :  { %s5097_s26 = spop %5096 }
 0x9fb   :  { %s3309_s21 = smul.f32 %s5097_s26, %s6180_s2  ;;  %s5099_s5 = spop %5098 }
 0x9fc   :  { %s3366_s28 = smul.f32 10.0, %s5099_s5  ;;  %3375 = sst [smem:[#allocation27 + $0x3]] %s5099_s5 }
 0x9fd   :  { %s3365_s1 = sadd.f32 %s3364_s23, %s3309_s21  ;;  %s5101_s22 = spop %5100 }
 0x9fe   :  { %3373 = sst [smem:[#allocation27 + $0x2]] %s3309_s21  ;;  %s3362_s12 = smul.f32 %s5101_s22, %s6180_s2 }
 0x9ff   :  { %s3367_s20 = sadd.f32 %s3366_s28, %s3365_s1 }
 0xa00   :  { %s3363_s11 = smul.f32 -1.0, %s3362_s12 }
 0xa01   :  { %3379 = sst [smem:[#allocation27 + $0x5]] %s3367_s20 }
 0xa02   :  { %3377 = sst [smem:[#allocation27 + $0x4]] %s3363_s11 }
 0xa03   :  { %5594 = shalt.err (!%p5591_p9)
}
 0xa04   :  { %s5687_s29 = smov [#allocation27]  }
 0xa05   :  { %3489 = dma.smem_to_vmem %s5687_s29, 16, %s3487_s17, [#allocation5]  }
 0xa06   :  { %5603 = dma.done.wait [#allocation4], 128  }
 0xa07   :  { %5604 = vsyncadd [#allocation4], 4294967168 }
 0xa08   :  { %5605 = dma.done.wait [#allocation16], 256  }
 0xa09   :  { %5606 = vsyncadd [#allocation16], 4294967040 }
 0xa0a   :  { %5607 = dma.done.wait [#allocation19], 256  }
 0xa0b   :  { %5608 = vsyncadd [#allocation19], 4294967040 }
 0xa0c   :  { %5609 = dma.done.wait [#allocation22], 256  }
 0xa0d   :  { %5610 = vsyncadd [#allocation22], 4294967040 }
 0xa0e   :  { %5611 = dma.done.wait [#allocation25], 384  }
 0xa0f   :  { %5612 = vsyncadd [#allocation25], 4294966912 }
 0xa10   :  { %5613 = dma.done.wait [#allocation5], 16  }
 0xa11   :  { %5614 = vsyncadd [#allocation5], 4294967280 }
 0xa12   :  { %3532 = sfence }
 0xa13   :  { %3533 = vsyncpa [#allocation3], 1 }
 0xa14   :  { %3534 = vsyncpa [#allocation7], 1 }
 0xa15   :  { %3535 = vsyncpa [#allocation10], 1 }
 0xa16   :  { %3536 = vsyncpa [#allocation13], 1 }
 0xa17   :  { %3537 = vsyncpa [#allocation4], 1 }
 0xa18   :  { %3538 = vsyncpa [#allocation16], 1 }
 0xa19   :  { %3539 = vsyncpa [#allocation19], 1 }
 0xa1a   :  { %3540 = vsyncpa [#allocation22], 1 }
 0xa1b   :  { %3541 = vsyncpa [#allocation25], 1 }
 0xa1c   :  { %3542 = vsyncpa [#allocation5], 1 }

</bundles_post_ra>
